<compile_context>
chip_gen: v7x
topology: tpu7x:2x2x1
jax: 0.10.0
libtpu: 0.0.40
codegen_flags: <defaults>
</compile_context>

<pallas_src>
import jax
import jax.numpy as jnp
from jax.experimental import pallas as pl
from jax.experimental.pallas import tpu as pltpu


# ----------------------------------------------------------------------------
# generation-aware VMEM budget (v7x has 64 MiB physical, v5e/v6e 128 MiB)
# ----------------------------------------------------------------------------
def _vmem_budget_bytes():
    phys = 128 * 1024 * 1024
    try:
        phys = int(pltpu.get_tpu_info().vmem_capacity_bytes)
    except Exception:
        pass
    if phys <= 64 * 1024 * 1024:
        return 44 * 1024 * 1024      # v7x-class: leave compiler headroom
    return 64 * 1024 * 1024          # v5e / v6e


def _pick_conv_rows(h_out, wq, c, in_item, out_item, budget):
    """Output rows per tile, from a per-step VMEM estimate (multiple of 8)."""
    per_row = wq * c * (22 * in_item + 2 * out_item + 4)   # in(x2buf)+patch+temps+acc+out
    fixed = 9 * c * c * in_item + 12 * wq * c * in_item + (2 << 20)
    t = max(8, min((budget - fixed) // max(per_row, 1), 512))
    t = (int(t) // 8) * 8
    t = min(t, ((h_out + 7) // 8) * 8)   # never more rows than the image needs
    return max(t, 8)


def _pick_pool_rows(h_half, w_half, c, in_item, out_item, budget):
    per_row = w_half * c * (10 * in_item + 2 * out_item + 8)
    t = max(8, min((budget - (2 << 20)) // max(per_row, 1), 1024))
    t = (int(t) // 8) * 8
    t = max(t, 8)
    return min(t, h_half) if h_half >= 8 else h_half


# ----------------------------------------------------------------------------
# conv (with_conv=True) kernel: one row-tile per grid step.
# Inputs are flat polyphase strips (M rows) + a small 2*Wq-row halo block of
# the same arrays.  The 9 taps are static flat-row shifts; they are lane-
# concatenated into an (M, 9*C_in) im2col patch and reduced with a single
# K = 9*C_in MXU matmul (one accumulator write, deep K).
# ----------------------------------------------------------------------------
def _make_conv_kernel(m_rows, wq, w_out):
    def kernel(ee_ref, eeh_ref, eo_ref, eoh_ref, oe_ref, oeh_ref, oo_ref,
               w_ref, b_ref, o_ref):
        m = m_rows
        ee = jnp.concatenate([ee_ref[...], eeh_ref[...]], axis=0)   # (M+2Wq, C)
        eo = jnp.concatenate([eo_ref[...], eoh_ref[...]], axis=0)
        oe = jnp.concatenate([oe_ref[...], oeh_ref[...]], axis=0)
        oo = oo_ref[...]
        # tap (kh, kw) of output flat row m reads phase flat row
        # m + (kh//2)*Wq + (kw//2); row-major (kh, kw) order matches the
        # folded (9*C_in, C_out) weight built in the wrapper.
        taps = (ee[0:m],            eo[0:m],            ee[1:m + 1],            # kh=0
                oe[0:m],            oo,                 oe[1:m + 1],            # kh=1
                ee[wq:wq + m],      eo[wq:wq + m],      ee[wq + 1:wq + 1 + m])  # kh=2
        patch = jnp.concatenate(taps, axis=-1)                       # (M, 9*C_in)
        acc = jnp.dot(patch, w_ref[...], preferred_element_type=jnp.float32)
        acc = acc + b_ref[...]
        t = o_ref.shape[0]
        # (M, C) -> (T, Wq, C) is layout preserving (Wq % 8 == 0); drop the
        # junk right columns before storing so the HBM store is exact.
        o_ref[...] = acc.reshape(t, wq, -1)[:, :w_out, :].astype(o_ref.dtype)
    return kernel


# ----------------------------------------------------------------------------
# avg_pool2d(k=2, s=2) kernel: single merged block (T, 2, W_half, 2C) per
# step (one DMA), pairwise f32 reduction.
# ----------------------------------------------------------------------------
def _avgpool_kernel(x_ref, o_ref):
    c = o_ref.shape[-1]
    xs = x_ref[...].astype(jnp.float32)          # (T, 2, W_half, 2C)
    s = xs[:, 0] + xs[:, 1]                      # add the two input rows
    o_ref[...] = ((s[..., :c] + s[..., c:]) * 0.25).astype(o_ref.dtype)


def downsample(x_nchw, weight_oihw=None, bias=None, *, with_conv=True,
               compute_dtype=None):
    """Forward pass of Downsample. x_nchw: (N, C, H, W).

    compute_dtype: optional (e.g. jnp.bfloat16) dtype for activations/weights
    fed to the kernel; accumulation is always f32 and the output keeps the
    input dtype.
    """
    x = jnp.transpose(x_nchw, (0, 2, 3, 1))      # NCHW -> NHWC (channels on lanes)
    N, H, W, C = x.shape
    out_dtype = x.dtype
    cd = jnp.dtype(compute_dtype) if compute_dtype is not None else jnp.dtype(x.dtype)

    budget = _vmem_budget_bytes()
    cparams = pltpu.CompilerParams(
        dimension_semantics=("parallel", "parallel"),
        vmem_limit_bytes=budget)

    if with_conv:
        # pad(0,1,0,1) + k3 s2 conv: H_out = H//2, W_out = W//2 (also for odd H/W).
        H_out, W_out = H // 2, W // 2
        Wq = ((W_out + 1) + 7) // 8 * 8          # half-width incl. pad col, mult of 8
        T = _pick_conv_rows(H_out, Wq, C, cd.itemsize, out_dtype.itemsize, budget)
        R = -(-H_out // T)
        H_out_pad = R * T
        H_ph = H_out_pad + 2                     # phase rows incl. halo/junk rows
        M = T * Wq                               # matmul M per grid step
        E = 2 * Wq                               # halo block rows (mult of 8, divides M)

        # Single zero pad covering PyTorch's (0,1,0,1) plus alignment; extra
        # zeros only feed junk rows/columns that are never stored.
        Hp, Wp = 2 * H_ph, 2 * Wq
        xp = jnp.pad(x, ((0, 0), (0, Hp - H), (0, Wp - W), (0, 0))).astype(cd)

        # Polyphase split (one plain copy of the activation — NO per-tile
        # overlap duplication; the flatten over (H, W) is a free reshape).
        def phase(a, b):
            return xp[:, a::2, b::2, :].reshape(N, H_ph * Wq, C)

        x_ee, x_eo = phase(0, 0), phase(0, 1)
        x_oe, x_oo = phase(1, 0), phase(1, 1)

        # Folded im2col weight: row-major (kh, kw, C_in) -> (9*C_in, C_out).
        w9 = jnp.transpose(weight_oihw, (2, 3, 1, 0)).reshape(9 * C, C).astype(cd)
        b2 = bias.reshape(1, C).astype(jnp.float32)

        main_spec = pl.BlockSpec((None, M, C), lambda n, r: (n, r, 0))
        # Halo: the first 2 phase rows of the *next* tile, via a second spec
        # on the same array (offset = (r+1)*M since E divides M, T is even).
        halo_spec = pl.BlockSpec((None, E, C),
                                 lambda n, r: (n, (r + 1) * (T // 2), 0))

        cost = pl.CostEstimate(
            flops=2 * N * R * M * 9 * C * C,
            transcendentals=0,
            bytes_accessed=(4 * N * H_ph * Wq * C + 9 * C * C) * cd.itemsize
                           + N * H_out_pad * W_out * C * out_dtype.itemsize)

        def run_conv(single_buffer_consts):
            if single_buffer_consts and hasattr(pl, "Buffered"):
                # Constant operands: single-buffer to save VMEM (review item).
                w_spec = pl.BlockSpec((9 * C, C), lambda n, r: (0, 0),
                                      pipeline_mode=pl.Buffered(1))
                b_spec = pl.BlockSpec((1, C), lambda n, r: (0, 0),
                                      pipeline_mode=pl.Buffered(1))
            else:
                w_spec = pl.BlockSpec((9 * C, C), lambda n, r: (0, 0))
                b_spec = pl.BlockSpec((1, C), lambda n, r: (0, 0))
            res = pl.pallas_call(
                _make_conv_kernel(M, Wq, W_out),
                out_shape=jax.ShapeDtypeStruct((N, H_out_pad, W_out, C), out_dtype),
                grid=(N, R),
                in_specs=[main_spec, halo_spec,      # ee
                          main_spec, halo_spec,      # eo
                          main_spec, halo_spec,      # oe
                          main_spec,                 # oo
                          w_spec, b_spec],
                out_specs=pl.BlockSpec((None, T, W_out, C),
                                       lambda n, r: (n, r, 0, 0)),
                compiler_params=cparams,
                cost_estimate=cost,
            )(x_ee, x_ee, x_eo, x_eo, x_oe, x_oe, x_oo, w9, b2)
            return jax.block_until_ready(res)

        try:
            out = run_conv(True)
        except Exception:
            # Fallback if this jax/Mosaic build rejects pl.Buffered(1).
            out = run_conv(False)

        out = out[:, :H_out]        # drop tile-rounding junk rows (no junk cols)
    else:
        H_half, W_half = H // 2, W // 2          # odd trailing row/col truncated
        xe = x[:, :2 * H_half, :2 * W_half, :].astype(cd)
        # Free reshape (no HBM copy): the pallas DMA reads the window in place.
        x5 = xe.reshape(N, H_half, 2, W_half, 2 * C)

        T = _pick_pool_rows(H_half, W_half, C, cd.itemsize, out_dtype.itemsize,
                            budget)
        R = -(-H_half // T)
        out = pl.pallas_call(
            _avgpool_kernel,
            out_shape=jax.ShapeDtypeStruct((N, H_half, W_half, C), out_dtype),
            grid=(N, R),
            in_specs=[pl.BlockSpec((None, T, 2, W_half, 2 * C),
                                   lambda n, r: (n, r, 0, 0, 0))],
            out_specs=pl.BlockSpec((None, T, W_half, C),
                                   lambda n, r: (n, r, 0, 0)),
            compiler_params=cparams,
        )(x5)

    return jnp.transpose(out, (0, 3, 1, 2))      # NHWC -> NCHW


def _ref_downsample(x_nchw, weight_oihw, bias, with_conv):
    """Pure-JAX reference matching the PyTorch module."""
    if with_conv:
        xp = jnp.pad(x_nchw, ((0, 0), (0, 0), (0, 1), (0, 1)))
        out = jax.lax.conv_general_dilated(
            xp, weight_oihw, window_strides=(2, 2), padding="VALID",
            dimension_numbers=("NCHW", "OIHW", "NCHW"))
        return out + bias[None, :, None, None]
    else:
        N, C, H, W = x_nchw.shape
        return x_nchw.reshape(N, C, H // 2, 2, W // 2, 2).mean(axis=(3, 5))


if __name__ == "__main__":
    key = jax.random.PRNGKey(0)
    k_x, k_w, k_b = jax.random.split(key, 3)

    N, C, H, W = 2, 4, 16, 16
    x = jax.random.normal(k_x, (N, C, H, W), dtype=jnp.float32)

    # Conv2d(C, C, 3) parameters: weight OIHW, bias (C,)
    fan_in = C * 3 * 3
    bound = 1.0 / (fan_in ** 0.5)
    weight = jax.random.uniform(k_w, (C, C, 3, 3), jnp.float32, -bound, bound)
    bias = jax.random.uniform(k_b, (C,), jnp.float32, -bound, bound)

    # with_conv = True path (pad + conv3x3 stride 2), f32 compute
    y_conv = jax.block_until_ready(downsample(x, weight, bias, with_conv=True))
    y_conv_ref = _ref_downsample(x, weight, bias, True)
    assert y_conv.shape == (N, C, 8, 8), y_conv.shape
    assert jnp.allclose(y_conv, y_conv_ref, atol=1e-4, rtol=1e-4), (
        float(jnp.max(jnp.abs(y_conv - y_conv_ref))))

    # same path with bf16 activations/weights (halved HBM traffic), f32 accumulation
    y_bf16 = jax.block_until_ready(
        downsample(x, weight, bias, with_conv=True, compute_dtype=jnp.bfloat16))
    assert y_bf16.shape == (N, C, 8, 8), y_bf16.shape
    assert jnp.allclose(y_bf16, y_conv_ref, atol=1e-1), (
        float(jnp.max(jnp.abs(y_bf16 - y_conv_ref))))

    # with_conv = False path (avg_pool2d k=2 s=2)
    y_pool = jax.block_until_ready(downsample(x, with_conv=False))
    y_pool_ref = _ref_downsample(x, None, None, False)
    assert y_pool.shape == (N, C, 8, 8), y_pool.shape
    assert jnp.allclose(y_pool, y_pool_ref, atol=1e-5, rtol=1e-5), (
        float(jnp.max(jnp.abs(y_pool - y_pool_ref))))

    print("KERNEL_OK")
</pallas_src>

<mosaic_0001>
module attributes {stable_mosaic.version = 11 : i64} {
  func.func @kernel(%arg0: i32, %arg1: i32, %arg2: memref<1x128x4xf32, #tpu.memory_space<vmem>>, %arg3: memref<1x32x4xf32, #tpu.memory_space<vmem>>, %arg4: memref<1x128x4xf32, #tpu.memory_space<vmem>>, %arg5: memref<1x32x4xf32, #tpu.memory_space<vmem>>, %arg6: memref<1x128x4xf32, #tpu.memory_space<vmem>>, %arg7: memref<1x32x4xf32, #tpu.memory_space<vmem>>, %arg8: memref<1x128x4xf32, #tpu.memory_space<vmem>>, %arg9: memref<36x4xf32, #tpu.memory_space<vmem>>, %arg10: memref<1x4xf32, #tpu.memory_space<vmem>>, %arg11: memref<1x8x8x4xf32, #tpu.memory_space<vmem>>) attributes {dimension_semantics = [#tpu.dimension_semantics<parallel>, #tpu.dimension_semantics<parallel>], iteration_bounds = array<i64: 2, 1>, scalar_prefetch = 0 : i64, scratch_operands = 0 : i64, tpu.core_type = #tpu.core_type<tc>, window_params = [{transform_indices = @transform_0, window_bounds = array<i64: 1, 128, 4>}, {transform_indices = @transform_1, window_bounds = array<i64: 1, 32, 4>}, {transform_indices = @transform_2, window_bounds = array<i64: 1, 128, 4>}, {transform_indices = @transform_3, window_bounds = array<i64: 1, 32, 4>}, {transform_indices = @transform_4, window_bounds = array<i64: 1, 128, 4>}, {transform_indices = @transform_5, window_bounds = array<i64: 1, 32, 4>}, {transform_indices = @transform_6, window_bounds = array<i64: 1, 128, 4>}, {pipeline_mode = #tpu.pipeline_mode<synchronous>, transform_indices = @transform_7, window_bounds = array<i64: 36, 4>}, {pipeline_mode = #tpu.pipeline_mode<synchronous>, transform_indices = @transform_8, window_bounds = array<i64: 1, 4>}, {transform_indices = @transform_9, window_bounds = array<i64: 1, 8, 8, 4>}]} {
    %c0 = arith.constant 0 : index
    %c0_0 = arith.constant 0 : index
    %c0_1 = arith.constant 0 : index
    %0 = vector.load %arg2[%c0, %c0_0, %c0_1] : memref<1x128x4xf32, #tpu.memory_space<vmem>>, vector<1x128x4xf32>
    %1 = vector.shape_cast %0 : vector<1x128x4xf32> to vector<128x4xf32>
    %c0_2 = arith.constant 0 : index
    %c0_3 = arith.constant 0 : index
    %c0_4 = arith.constant 0 : index
    %2 = vector.load %arg3[%c0_2, %c0_3, %c0_4] : memref<1x32x4xf32, #tpu.memory_space<vmem>>, vector<1x32x4xf32>
    %3 = vector.shape_cast %2 : vector<1x32x4xf32> to vector<32x4xf32>
    %4 = tpu.concatenate %1, %3 in 0 : vector<128x4xf32>, vector<32x4xf32> -> vector<160x4xf32>
    %c0_5 = arith.constant 0 : index
    %c0_6 = arith.constant 0 : index
    %c0_7 = arith.constant 0 : index
    %5 = vector.load %arg4[%c0_5, %c0_6, %c0_7] : memref<1x128x4xf32, #tpu.memory_space<vmem>>, vector<1x128x4xf32>
    %6 = vector.shape_cast %5 : vector<1x128x4xf32> to vector<128x4xf32>
    %c0_8 = arith.constant 0 : index
    %c0_9 = arith.constant 0 : index
    %c0_10 = arith.constant 0 : index
    %7 = vector.load %arg5[%c0_8, %c0_9, %c0_10] : memref<1x32x4xf32, #tpu.memory_space<vmem>>, vector<1x32x4xf32>
    %8 = vector.shape_cast %7 : vector<1x32x4xf32> to vector<32x4xf32>
    %9 = tpu.concatenate %6, %8 in 0 : vector<128x4xf32>, vector<32x4xf32> -> vector<160x4xf32>
    %c0_11 = arith.constant 0 : index
    %c0_12 = arith.constant 0 : index
    %c0_13 = arith.constant 0 : index
    %10 = vector.load %arg6[%c0_11, %c0_12, %c0_13] : memref<1x128x4xf32, #tpu.memory_space<vmem>>, vector<1x128x4xf32>
    %11 = vector.shape_cast %10 : vector<1x128x4xf32> to vector<128x4xf32>
    %c0_14 = arith.constant 0 : index
    %c0_15 = arith.constant 0 : index
    %c0_16 = arith.constant 0 : index
    %12 = vector.load %arg7[%c0_14, %c0_15, %c0_16] : memref<1x32x4xf32, #tpu.memory_space<vmem>>, vector<1x32x4xf32>
    %13 = vector.shape_cast %12 : vector<1x32x4xf32> to vector<32x4xf32>
    %14 = tpu.concatenate %11, %13 in 0 : vector<128x4xf32>, vector<32x4xf32> -> vector<160x4xf32>
    %c0_17 = arith.constant 0 : index
    %c0_18 = arith.constant 0 : index
    %c0_19 = arith.constant 0 : index
    %15 = vector.load %arg8[%c0_17, %c0_18, %c0_19] : memref<1x128x4xf32, #tpu.memory_space<vmem>>, vector<1x128x4xf32>
    %16 = vector.shape_cast %15 : vector<1x128x4xf32> to vector<128x4xf32>
    %17 = vector.extract_strided_slice %4 {offsets = [0, 0], sizes = [128, 4], strides = [1, 1]} : vector<160x4xf32> to vector<128x4xf32>
    %18 = vector.extract_strided_slice %9 {offsets = [0, 0], sizes = [128, 4], strides = [1, 1]} : vector<160x4xf32> to vector<128x4xf32>
    %19 = vector.extract_strided_slice %4 {offsets = [1, 0], sizes = [128, 4], strides = [1, 1]} : vector<160x4xf32> to vector<128x4xf32>
    %20 = vector.extract_strided_slice %14 {offsets = [0, 0], sizes = [128, 4], strides = [1, 1]} : vector<160x4xf32> to vector<128x4xf32>
    %21 = vector.extract_strided_slice %14 {offsets = [1, 0], sizes = [128, 4], strides = [1, 1]} : vector<160x4xf32> to vector<128x4xf32>
    %22 = vector.extract_strided_slice %4 {offsets = [16, 0], sizes = [128, 4], strides = [1, 1]} : vector<160x4xf32> to vector<128x4xf32>
    %23 = vector.extract_strided_slice %9 {offsets = [16, 0], sizes = [128, 4], strides = [1, 1]} : vector<160x4xf32> to vector<128x4xf32>
    %24 = vector.extract_strided_slice %4 {offsets = [17, 0], sizes = [128, 4], strides = [1, 1]} : vector<160x4xf32> to vector<128x4xf32>
    %25 = tpu.concatenate %17, %18, %19, %20, %16, %21, %22, %23, %24 in 1 : vector<128x4xf32>, vector<128x4xf32>, vector<128x4xf32>, vector<128x4xf32>, vector<128x4xf32>, vector<128x4xf32>, vector<128x4xf32>, vector<128x4xf32>, vector<128x4xf32> -> vector<128x36xf32>
    %c0_20 = arith.constant 0 : index
    %c0_21 = arith.constant 0 : index
    %26 = vector.load %arg9[%c0_20, %c0_21] : memref<36x4xf32, #tpu.memory_space<vmem>>, vector<36x4xf32>
    %cst = arith.constant dense<0.000000e+00> : vector<128x4xf32>
    %27 = tpu.matmul %25, %26, %cst {dimension_numbers = #tpu.dot_dimension_numbers<[1], [0], [0], [1], [0, 0, 1, 1], [], []>} : vector<128x36xf32>, vector<36x4xf32>, vector<128x4xf32> -> vector<128x4xf32>
    %c0_22 = arith.constant 0 : index
    %c0_23 = arith.constant 0 : index
    %28 = vector.load %arg10[%c0_22, %c0_23] : memref<1x4xf32, #tpu.memory_space<vmem>>, vector<1x4xf32>
    %29 = vector.broadcast %28 : vector<1x4xf32> to vector<128x4xf32>
    %30 = arith.addf %27, %29 : vector<128x4xf32>
    %31 = vector.shape_cast %30 : vector<128x4xf32> to vector<8x16x4xf32>
    %32 = vector.extract_strided_slice %31 {offsets = [0, 0, 0], sizes = [8, 8, 4], strides = [1, 1, 1]} : vector<8x16x4xf32> to vector<8x8x4xf32>
    %c0_24 = arith.constant 0 : index
    %c0_25 = arith.constant 0 : index
    %c0_26 = arith.constant 0 : index
    %c0_27 = arith.constant 0 : index
    %33 = vector.load %arg11[%c0_24, %c0_25, %c0_26, %c0_27] : memref<1x8x8x4xf32, #tpu.memory_space<vmem>>, vector<1x8x8x4xf32>
    %34 = vector.shape_cast %33 : vector<1x8x8x4xf32> to vector<8x8x4xf32>
    %35 = vector.shape_cast %32 : vector<8x8x4xf32> to vector<1x8x8x4xf32>
    tpu.vector_store %arg11[%c0_24, %c0_25, %c0_26, %c0_27], %35 {strides = array<i32>} : memref<1x8x8x4xf32, #tpu.memory_space<vmem>>, vector<1x8x8x4xf32>,
    return
  }
  func.func @transform_0(%arg0: i32, %arg1: i32) -> (i32, i32, i32) {
    %c0_i32 = arith.constant 0 : i32
    %c0_i32_0 = arith.constant 0 : i32
    return %arg0, %arg1, %c0_i32 : i32, i32, i32
  }
  func.func @transform_1(%arg0: i32, %arg1: i32) -> (i32, i32, i32) {
    %c1_i32 = arith.constant 1 : i32
    %0 = arith.addi %arg1, %c1_i32 : i32
    %c4_i32 = arith.constant 4 : i32
    %1 = arith.muli %0, %c4_i32 : i32
    %c0_i32 = arith.constant 0 : i32
    %c0_i32_0 = arith.constant 0 : i32
    return %arg0, %1, %c0_i32 : i32, i32, i32
  }
  func.func @transform_2(%arg0: i32, %arg1: i32) -> (i32, i32, i32) {
    %c0_i32 = arith.constant 0 : i32
    %c0_i32_0 = arith.constant 0 : i32
    return %arg0, %arg1, %c0_i32 : i32, i32, i32
  }
  func.func @transform_3(%arg0: i32, %arg1: i32) -> (i32, i32, i32) {
    %c1_i32 = arith.constant 1 : i32
    %0 = arith.addi %arg1, %c1_i32 : i32
    %c4_i32 = arith.constant 4 : i32
    %1 = arith.muli %0, %c4_i32 : i32
    %c0_i32 = arith.constant 0 : i32
    %c0_i32_0 = arith.constant 0 : i32
    return %arg0, %1, %c0_i32 : i32, i32, i32
  }
  func.func @transform_4(%arg0: i32, %arg1: i32) -> (i32, i32, i32) {
    %c0_i32 = arith.constant 0 : i32
    %c0_i32_0 = arith.constant 0 : i32
    return %arg0, %arg1, %c0_i32 : i32, i32, i32
  }
  func.func @transform_5(%arg0: i32, %arg1: i32) -> (i32, i32, i32) {
    %c1_i32 = arith.constant 1 : i32
    %0 = arith.addi %arg1, %c1_i32 : i32
    %c4_i32 = arith.constant 4 : i32
    %1 = arith.muli %0, %c4_i32 : i32
    %c0_i32 = arith.constant 0 : i32
    %c0_i32_0 = arith.constant 0 : i32
    return %arg0, %1, %c0_i32 : i32, i32, i32
  }
  func.func @transform_6(%arg0: i32, %arg1: i32) -> (i32, i32, i32) {
    %c0_i32 = arith.constant 0 : i32
    %c0_i32_0 = arith.constant 0 : i32
    return %arg0, %arg1, %c0_i32 : i32, i32, i32
  }
  func.func @transform_7(%arg0: i32, %arg1: i32) -> (i32, i32) {
    %c0_i32 = arith.constant 0 : i32
    %c0_i32_0 = arith.constant 0 : i32
    %c0_i32_1 = arith.constant 0 : i32
    return %c0_i32, %c0_i32_0 : i32, i32
  }
  func.func @transform_8(%arg0: i32, %arg1: i32) -> (i32, i32) {
    %c0_i32 = arith.constant 0 : i32
    %c0_i32_0 = arith.constant 0 : i32
    %c0_i32_1 = arith.constant 0 : i32
    return %c0_i32, %c0_i32_0 : i32, i32
  }
  func.func @transform_9(%arg0: i32, %arg1: i32) -> (i32, i32, i32, i32) {
    %c0_i32 = arith.constant 0 : i32
    %c0_i32_0 = arith.constant 0 : i32
    %c0_i32_1 = arith.constant 0 : i32
    return %arg0, %arg1, %c0_i32, %c0_i32_0 : i32, i32, i32, i32
  }
}

module attributes {stable_mosaic.version = 11 : i64} {
  func.func @kernel(%arg0: i32, %arg1: i32, %arg2: memref<1x128x4xf32, #tpu.memory_space<vmem>>, %arg3: memref<1x32x4xf32, #tpu.memory_space<vmem>>, %arg4: memref<1x128x4xf32, #tpu.memory_space<vmem>>, %arg5: memref<1x32x4xf32, #tpu.memory_space<vmem>>, %arg6: memref<1x128x4xf32, #tpu.memory_space<vmem>>, %arg7: memref<1x32x4xf32, #tpu.memory_space<vmem>>, %arg8: memref<1x128x4xf32, #tpu.memory_space<vmem>>, %arg9: memref<36x4xf32, #tpu.memory_space<vmem>>, %arg10: memref<1x4xf32, #tpu.memory_space<vmem>>, %arg11: memref<1x8x8x4xf32, #tpu.memory_space<vmem>>) attributes {dimension_semantics = [#tpu.dimension_semantics<parallel>, #tpu.dimension_semantics<parallel>], iteration_bounds = array<i64: 2, 1>, scalar_prefetch = 0 : i64, scratch_operands = 0 : i64, tpu.core_type = #tpu.core_type<tc>, window_params = [{transform_indices = @transform_0, window_bounds = array<i64: 1, 128, 4>}, {transform_indices = @transform_1, window_bounds = array<i64: 1, 32, 4>}, {transform_indices = @transform_2, window_bounds = array<i64: 1, 128, 4>}, {transform_indices = @transform_3, window_bounds = array<i64: 1, 32, 4>}, {transform_indices = @transform_4, window_bounds = array<i64: 1, 128, 4>}, {transform_indices = @transform_5, window_bounds = array<i64: 1, 32, 4>}, {transform_indices = @transform_6, window_bounds = array<i64: 1, 128, 4>}, {pipeline_mode = #tpu.pipeline_mode<synchronous>, transform_indices = @transform_7, window_bounds = array<i64: 36, 4>}, {pipeline_mode = #tpu.pipeline_mode<synchronous>, transform_indices = @transform_8, window_bounds = array<i64: 1, 4>}, {transform_indices = @transform_9, window_bounds = array<i64: 1, 8, 8, 4>}]} {
    %c0 = arith.constant 0 : index
    %c0_0 = arith.constant 0 : index
    %c0_1 = arith.constant 0 : index
    %0 = vector.load %arg2[%c0, %c0_0, %c0_1] : memref<1x128x4xf32, #tpu.memory_space<vmem>>, vector<1x128x4xf32>
    %1 = vector.shape_cast %0 : vector<1x128x4xf32> to vector<128x4xf32>
    %c0_2 = arith.constant 0 : index
    %c0_3 = arith.constant 0 : index
    %c0_4 = arith.constant 0 : index
    %2 = vector.load %arg3[%c0_2, %c0_3, %c0_4] : memref<1x32x4xf32, #tpu.memory_space<vmem>>, vector<1x32x4xf32>
    %3 = vector.shape_cast %2 : vector<1x32x4xf32> to vector<32x4xf32>
    %4 = tpu.concatenate %1, %3 in 0 : vector<128x4xf32>, vector<32x4xf32> -> vector<160x4xf32>
    %c0_5 = arith.constant 0 : index
    %c0_6 = arith.constant 0 : index
    %c0_7 = arith.constant 0 : index
    %5 = vector.load %arg4[%c0_5, %c0_6, %c0_7] : memref<1x128x4xf32, #tpu.memory_space<vmem>>, vector<1x128x4xf32>
    %6 = vector.shape_cast %5 : vector<1x128x4xf32> to vector<128x4xf32>
    %c0_8 = arith.constant 0 : index
    %c0_9 = arith.constant 0 : index
    %c0_10 = arith.constant 0 : index
    %7 = vector.load %arg5[%c0_8, %c0_9, %c0_10] : memref<1x32x4xf32, #tpu.memory_space<vmem>>, vector<1x32x4xf32>
    %8 = vector.shape_cast %7 : vector<1x32x4xf32> to vector<32x4xf32>
    %9 = tpu.concatenate %6, %8 in 0 : vector<128x4xf32>, vector<32x4xf32> -> vector<160x4xf32>
    %c0_11 = arith.constant 0 : index
    %c0_12 = arith.constant 0 : index
    %c0_13 = arith.constant 0 : index
    %10 = vector.load %arg6[%c0_11, %c0_12, %c0_13] : memref<1x128x4xf32, #tpu.memory_space<vmem>>, vector<1x128x4xf32>
    %11 = vector.shape_cast %10 : vector<1x128x4xf32> to vector<128x4xf32>
    %c0_14 = arith.constant 0 : index
    %c0_15 = arith.constant 0 : index
    %c0_16 = arith.constant 0 : index
    %12 = vector.load %arg7[%c0_14, %c0_15, %c0_16] : memref<1x32x4xf32, #tpu.memory_space<vmem>>, vector<1x32x4xf32>
    %13 = vector.shape_cast %12 : vector<1x32x4xf32> to vector<32x4xf32>
    %14 = tpu.concatenate %11, %13 in 0 : vector<128x4xf32>, vector<32x4xf32> -> vector<160x4xf32>
    %c0_17 = arith.constant 0 : index
    %c0_18 = arith.constant 0 : index
    %c0_19 = arith.constant 0 : index
    %15 = vector.load %arg8[%c0_17, %c0_18, %c0_19] : memref<1x128x4xf32, #tpu.memory_space<vmem>>, vector<1x128x4xf32>
    %16 = vector.shape_cast %15 : vector<1x128x4xf32> to vector<128x4xf32>
    %17 = vector.extract_strided_slice %4 {offsets = [0, 0], sizes = [128, 4], strides = [1, 1]} : vector<160x4xf32> to vector<128x4xf32>
    %18 = vector.extract_strided_slice %9 {offsets = [0, 0], sizes = [128, 4], strides = [1, 1]} : vector<160x4xf32> to vector<128x4xf32>
    %19 = vector.extract_strided_slice %4 {offsets = [1, 0], sizes = [128, 4], strides = [1, 1]} : vector<160x4xf32> to vector<128x4xf32>
    %20 = vector.extract_strided_slice %14 {offsets = [0, 0], sizes = [128, 4], strides = [1, 1]} : vector<160x4xf32> to vector<128x4xf32>
    %21 = vector.extract_strided_slice %14 {offsets = [1, 0], sizes = [128, 4], strides = [1, 1]} : vector<160x4xf32> to vector<128x4xf32>
    %22 = vector.extract_strided_slice %4 {offsets = [16, 0], sizes = [128, 4], strides = [1, 1]} : vector<160x4xf32> to vector<128x4xf32>
    %23 = vector.extract_strided_slice %9 {offsets = [16, 0], sizes = [128, 4], strides = [1, 1]} : vector<160x4xf32> to vector<128x4xf32>
    %24 = vector.extract_strided_slice %4 {offsets = [17, 0], sizes = [128, 4], strides = [1, 1]} : vector<160x4xf32> to vector<128x4xf32>
    %25 = tpu.concatenate %17, %18, %19, %20, %16, %21, %22, %23, %24 in 1 : vector<128x4xf32>, vector<128x4xf32>, vector<128x4xf32>, vector<128x4xf32>, vector<128x4xf32>, vector<128x4xf32>, vector<128x4xf32>, vector<128x4xf32>, vector<128x4xf32> -> vector<128x36xf32>
    %c0_20 = arith.constant 0 : index
    %c0_21 = arith.constant 0 : index
    %26 = vector.load %arg9[%c0_20, %c0_21] : memref<36x4xf32, #tpu.memory_space<vmem>>, vector<36x4xf32>
    %cst = arith.constant dense<0.000000e+00> : vector<128x4xf32>
    %27 = tpu.matmul %25, %26, %cst {dimension_numbers = #tpu.dot_dimension_numbers<[1], [0], [0], [1], [0, 0, 1, 1], [], []>} : vector<128x36xf32>, vector<36x4xf32>, vector<128x4xf32> -> vector<128x4xf32>
    %c0_22 = arith.constant 0 : index
    %c0_23 = arith.constant 0 : index
    %28 = vector.load %arg10[%c0_22, %c0_23] : memref<1x4xf32, #tpu.memory_space<vmem>>, vector<1x4xf32>
    %29 = vector.broadcast %28 : vector<1x4xf32> to vector<128x4xf32>
    %30 = arith.addf %27, %29 : vector<128x4xf32>
    %31 = vector.shape_cast %30 : vector<128x4xf32> to vector<8x16x4xf32>
    %32 = vector.extract_strided_slice %31 {offsets = [0, 0, 0], sizes = [8, 8, 4], strides = [1, 1, 1]} : vector<8x16x4xf32> to vector<8x8x4xf32>
    %c0_24 = arith.constant 0 : index
    %c0_25 = arith.constant 0 : index
    %c0_26 = arith.constant 0 : index
    %c0_27 = arith.constant 0 : index
    %33 = vector.load %arg11[%c0_24, %c0_25, %c0_26, %c0_27] : memref<1x8x8x4xf32, #tpu.memory_space<vmem>>, vector<1x8x8x4xf32>
    %34 = vector.shape_cast %33 : vector<1x8x8x4xf32> to vector<8x8x4xf32>
    %35 = vector.shape_cast %32 : vector<8x8x4xf32> to vector<1x8x8x4xf32>
    tpu.vector_store %arg11[%c0_24, %c0_25, %c0_26, %c0_27], %35 {strides = array<i32>} : memref<1x8x8x4xf32, #tpu.memory_space<vmem>>, vector<1x8x8x4xf32>,
    return
  }
  func.func @transform_0(%arg0: i32, %arg1: i32) -> (i32, i32, i32) {
    %c0_i32 = arith.constant 0 : i32
    %c0_i32_0 = arith.constant 0 : i32
    return %arg0, %arg1, %c0_i32 : i32, i32, i32
  }
  func.func @transform_1(%arg0: i32, %arg1: i32) -> (i32, i32, i32) {
    %c1_i32 = arith.constant 1 : i32
    %0 = arith.addi %arg1, %c1_i32 : i32
    %c4_i32 = arith.constant 4 : i32
    %1 = arith.muli %0, %c4_i32 : i32
    %c0_i32 = arith.constant 0 : i32
    %c0_i32_0 = arith.constant 0 : i32
    return %arg0, %1, %c0_i32 : i32, i32, i32
  }
  func.func @transform_2(%arg0: i32, %arg1: i32) -> (i32, i32, i32) {
    %c0_i32 = arith.constant 0 : i32
    %c0_i32_0 = arith.constant 0 : i32
    return %arg0, %arg1, %c0_i32 : i32, i32, i32
  }
  func.func @transform_3(%arg0: i32, %arg1: i32) -> (i32, i32, i32) {
    %c1_i32 = arith.constant 1 : i32
    %0 = arith.addi %arg1, %c1_i32 : i32
    %c4_i32 = arith.constant 4 : i32
    %1 = arith.muli %0, %c4_i32 : i32
    %c0_i32 = arith.constant 0 : i32
    %c0_i32_0 = arith.constant 0 : i32
    return %arg0, %1, %c0_i32 : i32, i32, i32
  }
  func.func @transform_4(%arg0: i32, %arg1: i32) -> (i32, i32, i32) {
    %c0_i32 = arith.constant 0 : i32
    %c0_i32_0 = arith.constant 0 : i32
    return %arg0, %arg1, %c0_i32 : i32, i32, i32
  }
  func.func @transform_5(%arg0: i32, %arg1: i32) -> (i32, i32, i32) {
    %c1_i32 = arith.constant 1 : i32
    %0 = arith.addi %arg1, %c1_i32 : i32
    %c4_i32 = arith.constant 4 : i32
    %1 = arith.muli %0, %c4_i32 : i32
    %c0_i32 = arith.constant 0 : i32
    %c0_i32_0 = arith.constant 0 : i32
    return %arg0, %1, %c0_i32 : i32, i32, i32
  }
  func.func @transform_6(%arg0: i32, %arg1: i32) -> (i32, i32, i32) {
    %c0_i32 = arith.constant 0 : i32
    %c0_i32_0 = arith.constant 0 : i32
    return %arg0, %arg1, %c0_i32 : i32, i32, i32
  }
  func.func @transform_7(%arg0: i32, %arg1: i32) -> (i32, i32) {
    %c0_i32 = arith.constant 0 : i32
    %c0_i32_0 = arith.constant 0 : i32
    %c0_i32_1 = arith.constant 0 : i32
    return %c0_i32, %c0_i32_0 : i32, i32
  }
  func.func @transform_8(%arg0: i32, %arg1: i32) -> (i32, i32) {
    %c0_i32 = arith.constant 0 : i32
    %c0_i32_0 = arith.constant 0 : i32
    %c0_i32_1 = arith.constant 0 : i32
    return %c0_i32, %c0_i32_0 : i32, i32
  }
  func.func @transform_9(%arg0: i32, %arg1: i32) -> (i32, i32, i32, i32) {
    %c0_i32 = arith.constant 0 : i32
    %c0_i32_0 = arith.constant 0 : i32
    %c0_i32_1 = arith.constant 0 : i32
    return %arg0, %arg1, %c0_i32, %c0_i32_0 : i32, i32, i32, i32
  }
}

</mosaic_0001>

<bundles_post_ra>
// kernel: tpu_custom_call.1
= control target key start
LH: loop header
LB: loop body
LE: loop exit
PB: predicated region body
PF: predicated region fallthrough
CT: control target
= control target key end

     0   :  { %s3899_s0 = inlined_call_operand.hbm [shape: f32[2,160,4], index: 0, kind: input, shape index: {}]   ;;  %s3900_s1 = inlined_call_operand.hbm [shape: f32[2,160,4], index: 1, kind: input, shape index: {}]   ;;  %s3901_s2 = inlined_call_operand.hbm [shape: f32[2,160,4], index: 2, kind: input, shape index: {}]   ;;  %s3902_s3 = inlined_call_operand.hbm [shape: f32[2,160,4], index: 3, kind: input, shape index: {}]   ;;  %s3903_s4 = inlined_call_operand.hbm [shape: f32[2,160,4], index: 4, kind: input, shape index: {}]   ;;  %s3904_s5 = inlined_call_operand.hbm [shape: f32[2,160,4], index: 5, kind: input, shape index: {}]   ;;  %s3905_s6 = inlined_call_operand.hbm [shape: f32[2,160,4], index: 6, kind: input, shape index: {}]   ;;  %s3906_s7 = inlined_call_operand.hbm [shape: f32[36,4], index: 7, kind: input, shape index: {}]   ;;  %s3907_s8 = inlined_call_operand.hbm [shape: f32[1,4], index: 8, kind: input, shape index: {}]   ;;  %s3908_s9 = inlined_call_operand.hbm [shape: f32[2,8,8,4], index: 9, kind: output, shape index: {}]  }
   0x1   :  { %3954 = sst [smem:[#allocation47_spill]] %s3900_s1 }
   0x2   :  { %3955 = sst [smem:[#allocation48_spill]] %s3902_s3 }
   0x3   :  { %3956 = sst [smem:[#allocation49_spill]] %s3908_s9 }
   0x4   :  { %14 = vsyncpa [#allocation3], 0 }
   0x5   :  { %16 = vsyncpa [#allocation3 + $0x1], 0 }
   0x6   :  { %17 = vsyncpa [#allocation6], 0 }
   0x7   :  { %19 = vsyncpa [#allocation6 + $0x1], 0 }
   0x8   :  { %20 = vsyncpa [#allocation9], 0 }
   0x9   :  { %22 = vsyncpa [#allocation9 + $0x1], 0 }
   0xa   :  { %23 = vsyncpa [#allocation12], 0 }
   0xb   :  { %25 = vsyncpa [#allocation12 + $0x1], 0 }
   0xc   :  { %26 = vsyncpa [#allocation15], 0 }
   0xd   :  { %27 = vsyncpa [#allocation4], 0 }
   0xe   :  { %29 = vsyncpa [#allocation4 + $0x1], 0  ;;  %s2628_s30 = smov 0   ;;  %s2630_s10 = smov 0  }
   0xf   :  { %s2632_s11 = smov 0   ;;  %s2634_s12 = smov 0  }
  0x10   :  { %s2636_s13 = smov 0   ;;  %s2638_s14 = smov 0  }
  0x11 LB: > { %3957 = sst [smem:[#allocation24_spill]] %s2535_s30  ;;  %s2659_s15 = sadd.s32 4294967295, %s2555_s14   ;;  %s2555_s14 = sphi %s2638_s14, %s35_s14   ;;  %s2551_s13 = sphi %s2636_s13, %s4033_s13   ;;  %s2547_s12 = sphi %s2634_s12, %s4032_s12   ;;  %s2543_s11 = sphi %s2632_s11, %s4031_s11   ;;  %s2539_s10 = sphi %s2630_s10, %s4035_s10   ;;  %s2535_s30 = sphi %s2628_s30, %s4034_s30  }
  0x12   : > { %3958 = sst [smem:[#allocation25_spill]] %s2543_s11  ;;  %s1937_s16 = sadd.s32 4294967294, %s2555_s14  }
  0x13   : > { %3959 = sst [smem:[#allocation26_spill]] %s2547_s12  ;;  %s47_s17 = sadd.s32 1, %s2551_s13 }
  0x14   : > { %3960 = sst [smem:[#allocation27_spill]] %s2551_s13  ;;  %s56_s18 = sadd.s32 1, %s2543_s11 }
  0x15   : > { %3961 = sst [smem:[#allocation28_spill]] %s2555_s14  ;;  %p49_p0 = scmp.ge.s32.totalorder %s47_s17, 2 }
  0x16   : > { %3962 = sst [smem:[#allocation29_spill]] %s2659_s15  ;;  %p63_p1 = scmp.ne.s32.totalorder %s2543_s11, %s2539_s10 }
  0x17   : > { %p64_p2 = scmp.eq.s32.totalorder %s2555_s14, 0  ;;  %p69_p3 = scmp.ne.s32.totalorder %s2539_s10, %s2535_s30 }
  0x18   : > { %s4037_s17 = smov (%p49_p0, %s47_s17), 0  ;;  %p3913_p5 = scmp.eq.s32.totalorder %s2659_s15, 0 }
  0x19   : > { %3963 = sst [smem:[#allocation30_spill]] %s4037_s17  ;;  %p2671_p4 = por %p64_p2, %p63_p1 }
  0x1a   : > { %s51_s20 = ssub.s32 %s2551_s13, %s4037_s17  ;;  %p317_p6 = scmp.eq.s32.totalorder %s2659_s15, 1 }
  0x1b   : > { %p54_p7 = scmp.eq.s32.totalorder %s51_s20, 0  ;;  %p2681_p8 = por %p3913_p5, %p69_p3 }
  0x1c   : > { %p2685_p9 = por %p317_p6, %p63_p1  ;;  %p323_p10 = scmp.eq.s32.totalorder %s1937_s16, 1 }
  0x1d   : > { %s3965_s21 = scalar_select %p2681_p8, 1, 0 }
  0x1e   : > { %s3966_s22 = scalar_select %p2685_p9, 1, 0 }
  0x1f   : > { %s2690_s23 = scalar_select %p54_p7, %s2543_s11, %s56_s18  }
  0x20   : > { %3967 = sst [smem:[#allocation31_spill]] %s3966_s22  ;;  %p2692_p11 = por %p323_p10, %p69_p3 }
  0x21   : > { %3968 = sst [smem:[#allocation32_spill]] %s2690_s23  ;;  %p1938_p12 = scmp.ge.s32.totalorder %s2555_s14, 1 }
  0x22   : > { %s3969_s24 = scalar_select %p2692_p11, 1, 0 }
  0x23   : > { %p330_p13 = scmp.lt.s32.totalorder %s2555_s14, 3  ;;  %s2557_s26 = smov [#allocation14]  }
  0x24   : > { %3970 = sst [smem:[#allocation33_spill]] %s3969_s24  ;;  %s342_s27 = sshll.u32 %s2557_s26, 4  ;;  %s2702_s27 = int_to_ptr.vmem [resolvable:$true] %s342_s27 }
  0x25   : > { %p2698_p0 = pnand %p1938_p12, %p330_p13  ;;  %p2123_p6 = scmp.lt.s32.totalorder %s2555_s14, 2 }
  0x26   : > { %s2709_s28 = smul.u32 2560, %s2551_s13  ;;  %s2718_s16 = sand.u32 1, %s2543_s11  }
  0x27   : > { %s3971_s25 = scalar_select %p2698_p0, 1, 0 }
  0x28   : > { %p2088_p1 = pneg %p2698_p0  ;;  %p2722_p7 = pnand %p2123_p6, %p2671_p4 }
  0x29   : > { %s2727_s20 = sand.u32 1, %s2555_s14   ;;  %s2188_s13 = scalar_lea.hbm %s3906_s7, 640 }
  0x2a   : > { %p2713_p3 = pnand %p2088_p1, %p3913_p5  ;;  %p2189_p10 = scmp.ne.s32.totalorder %s3906_s7, %s2188_s13 }
  0x2b   : > { %s3973_s18 = scalar_select %p2722_p7, 1, 0 }
  0x2c   : > { %s3972_s29 = scalar_select %p2713_p3, 1, 0 }
  0x2d   : > { %p3924_p12 = pneg %p2713_p3  ;;  %p2195_p4 = scmp.lt.u32.totalorder %s2188_s13, %s3906_s7 }
  0x2f   : > { %p2191_p13 = pnand %p3924_p12, %p2189_p10 }
  0x31   : > { %p2192_p1 = pneg %p2191_p13 }
  0x33   : > { %p2197_p6 = pnand %p2195_p4, %p2192_p1 }
  0x35   : > { %2200 = shalt.err (!%p2197_p6)
}
  0x36   : > { %s2201_s17 = scalar_lea.vmem %s2702_s27, 640  ;;  %p2209_p9 = scmp.lt.s32.totalorder %s2702_s27, %s2702_s27 }
  0x37   : > { %p2202_p2 = scmp.ne.s32.totalorder %s2702_s27, %s2201_s17  ;;  %p2210_p10 = scmp.lt.s32.totalorder %s2201_s17, %s2201_s17 }
  0x39   : > { %p2204_p5 = pnand %p2202_p2, %p3924_p12  ;;  %p2211_p13 = por %p2210_p10, %p2209_p9 }
  0x3b   : > { %p2205_p11 = pneg %p2204_p5 }
  0x3d   : > { %p2212_p8 = pnand %p2211_p13, %p2205_p11 }
  0x3f   : > { %2215 = shalt.err (!%p2212_p8)
}
  0x40   : > { %s2558_s11 = smov 128   ;;  %s2559_s13 = smov 8  }
  0x41   : > { %2091 = dma.hbm_to_vmem [thread:$0]  (!%p2713_p3), %s3906_s7, 640, %s2702_s27, [#allocation15], %s2558_s11, %s2558_s11, %s2559_s13  }
  0x42   : > { %s2760_s26 = sshll.u32 %s2718_s16, 5  ;;  %s3974_s1 = sld [smem:[#allocation47_spill]] }
  0x43   : > { %s400_s9 = scalar_lea.vmem [#allocation5], %s2760_s26  ;;  %s3928_s12 = scalar_lea.sflag [#allocation6], %s2727_s20 }
  0x44   : > { %s411_s22 = sshll.u32 %s400_s9, 4  ;;  %p2775_p8 = pneg %p2722_p7  ;;  %s2769_s22 = int_to_ptr.vmem [resolvable:$true] %s411_s22 }
  0x46   : > { %s3975_s27 = scalar_select %p2775_p8, 1, 0 }
  0x48   : > { %s1732_s14 = scalar_lea.hbm %s3974_s1, %s2709_s28  ;;  %s2221_s19 = scalar_lea.hbm %s3974_s1, 5120 }
  0x49   : > { %s2766_s30 = scalar_lea.hbm %s1732_s14, 2048  ;;  %s2246_s15 = scalar_lea.hbm %s1732_s14, 2560 }
  0x4a   : > { %p2217_p5 = scmp.ne.s32.totalorder %s2766_s30, %s2246_s15  ;;  %p2222_p2 = scmp.lt.u32.totalorder %s2766_s30, %s3974_s1 }
  0x4b   : > { %p2223_p1 = scmp.lt.u32.totalorder %s2221_s19, %s2246_s15  ;;  %p2225_p6 = scmp.lt.u32.totalorder %s2246_s15, %s2766_s30 }
  0x4c   : > { %p2219_p9 = pnand %p2775_p8, %p2217_p5 }
  0x4d   : > { %p2224_p4 = por %p2223_p1, %p2222_p2 }
  0x4e   : > { %p2220_p11 = pneg %p2219_p9 }
  0x4f   : > { %p2226_p10 = por %p2225_p6, %p2224_p4 }
  0x51   : > { %p2227_p13 = pnand %p2226_p10, %p2220_p11 }
  0x53   : > { %2230 = shalt.err (!%p2227_p13)
}
  0x54   : > { %s2231_s14 = scalar_lea.vmem %s2769_s22, 512  ;;  %s2560_s23 = smov [#allocation5]  }
  0x55   : > { %p2232_p5 = scmp.ne.s32.totalorder %s2769_s22, %s2231_s14  ;;  %s2236_s24 = sshll.u32 %s2560_s23, 4  ;;  %s2237_s24 = int_to_ptr.vmem [resolvable:$false] %s2236_s24 }
  0x56   : > { %s2238_s17 = scalar_lea.vmem %s2237_s24, 1024  ;;  %p2239_p0 = scmp.lt.s32.totalorder %s2769_s22, %s2237_s24 }
  0x57   : > { %p2234_p9 = pnand %p2232_p5, %p2775_p8  ;;  %p2240_p3 = scmp.lt.s32.totalorder %s2238_s17, %s2231_s14 }
  0x59   : > { %p2235_p12 = pneg %p2234_p9  ;;  %p2241_p2 = por %p2240_p3, %p2239_p0 }
  0x5b   : > { %p2242_p1 = pnand %p2241_p2, %p2235_p12 }
  0x5d   : > { %2245 = shalt.err (!%p2242_p1)
}
  0x5e   : > { %2101 = dma.hbm_to_vmem [thread:$0]  (!%p2722_p7), %s2766_s30, 512, %s2769_s22, %s3928_s12, %s2558_s11, %s2558_s11, %s2559_s13  }
  0x5f   : > { %s3976_s3 = sld [smem:[#allocation48_spill]]  ;;  %s454_s23 = scalar_lea.vmem [#allocation8], %s2760_s26 }
  0x60   : > { %s465_s24 = sshll.u32 %s454_s23, 4  ;;  %s3929_s17 = scalar_lea.sflag [#allocation9], %s2727_s20  ;;  %s2810_s24 = int_to_ptr.vmem [resolvable:$true] %s465_s24 }
  0x65   : > { %s1749_s9 = scalar_lea.hbm %s3976_s3, %s2709_s28  ;;  %s2252_s15 = scalar_lea.hbm %s3976_s3, 5120 }
  0x66   : > { %s2807_s14 = scalar_lea.hbm %s1749_s9, 2048  ;;  %s2277_s1 = scalar_lea.hbm %s1749_s9, 2560 }
  0x67   : > { %p2248_p0 = scmp.ne.s32.totalorder %s2807_s14, %s2277_s1  ;;  %p2253_p11 = scmp.lt.u32.totalorder %s2807_s14, %s3976_s3 }
  0x68   : > { %p2254_p4 = scmp.lt.u32.totalorder %s2252_s15, %s2277_s1  ;;  %p2256_p10 = scmp.lt.u32.totalorder %s2277_s1, %s2807_s14 }
  0x69   : > { %p2250_p3 = pnand %p2248_p0, %p2775_p8 }
  0x6a   : > { %p2255_p6 = por %p2254_p4, %p2253_p11 }
  0x6b   : > { %p2251_p12 = pneg %p2250_p3 }
  0x6c   : > { %p2257_p13 = por %p2256_p10, %p2255_p6 }
  0x6e   : > { %p2258_p5 = pnand %p2257_p13, %p2251_p12 }
  0x70   : > { %2261 = shalt.err (!%p2258_p5)
}
  0x71   : > { %s2262_s9 = scalar_lea.vmem %s2810_s24, 512  ;;  %s2561_s23 = smov [#allocation8]  }
  0x72   : > { %p2263_p9 = scmp.ne.s32.totalorder %s2810_s24, %s2262_s9  ;;  %s2267_s30 = sshll.u32 %s2561_s23, 4  ;;  %s2268_s30 = int_to_ptr.vmem [resolvable:$false] %s2267_s30 }
  0x73   : > { %s2269_s12 = scalar_lea.vmem %s2268_s30, 1024  ;;  %p2270_p0 = scmp.lt.s32.totalorder %s2810_s24, %s2268_s30 }
  0x74   : > { %p2265_p2 = pnand %p2263_p9, %p2775_p8  ;;  %p2271_p3 = scmp.lt.s32.totalorder %s2269_s12, %s2262_s9 }
  0x76   : > { %p2266_p1 = pneg %p2265_p2  ;;  %p2272_p11 = por %p2271_p3, %p2270_p0 }
  0x78   : > { %p2273_p4 = pnand %p2272_p11, %p2266_p1 }
  0x7a   : > { %2276 = shalt.err (!%p2273_p4)
}
  0x7b   : > { %2107 = dma.hbm_to_vmem [thread:$0]  (!%p2722_p7), %s2807_s14, 512, %s2810_s24, %s3929_s17, %s2558_s11, %s2558_s11, %s2559_s13  }
  0x7c   : > { %s1766_s15 = scalar_lea.hbm %s3904_s5, %s2709_s28  ;;  %s508_s9 = scalar_lea.vmem [#allocation11], %s2760_s26 }
  0x7d   : > { %s2842_s19 = scalar_lea.hbm %s1766_s15, 2048  ;;  %s519_s23 = sshll.u32 %s508_s9, 4  ;;  %s2845_s23 = int_to_ptr.vmem [resolvable:$true] %s519_s23 }
  0x7e   : > { %s3934_s30 = scalar_lea.sflag [#allocation12], %s2727_s20  ;;  %s2308_s12 = scalar_lea.hbm %s1766_s15, 2560 }
  0x7f   : > { %p2279_p12 = scmp.ne.s32.totalorder %s2842_s19, %s2308_s12  ;;  %s2283_s1 = scalar_lea.hbm %s3904_s5, 5120 }
  0x80   : > { %p2284_p13 = scmp.lt.u32.totalorder %s2842_s19, %s3904_s5  ;;  %p2285_p5 = scmp.lt.u32.totalorder %s2283_s1, %s2308_s12 }
  0x81   : > { %p2281_p6 = pnand %p2279_p12, %p2775_p8  ;;  %p2287_p2 = scmp.lt.u32.totalorder %s2308_s12, %s2842_s19 }
  0x82   : > { %p2286_p9 = por %p2285_p5, %p2284_p13 }
  0x83   : > { %p2282_p10 = pneg %p2281_p6 }
  0x84   : > { %p2288_p1 = por %p2287_p2, %p2286_p9 }
  0x86   : > { %p2289_p0 = pnand %p2288_p1, %p2282_p10 }
  0x88   : > { %2292 = shalt.err (!%p2289_p0)
}
  0x89   : > { %s2293_s26 = scalar_lea.vmem %s2845_s23, 512  ;;  %s2562_s15 = smov [#allocation11]  }
  0x8a   : > { %p2294_p3 = scmp.ne.s32.totalorder %s2845_s23, %s2293_s26  ;;  %s2298_s9 = sshll.u32 %s2562_s15, 4  ;;  %s2299_s9 = int_to_ptr.vmem [resolvable:$false] %s2298_s9 }
  0x8b   : > { %s2300_s17 = scalar_lea.vmem %s2299_s9, 1024  ;;  %p2301_p12 = scmp.lt.s32.totalorder %s2845_s23, %s2299_s9 }
  0x8c   : > { %p2296_p11 = pnand %p2294_p3, %p2775_p8  ;;  %p2302_p6 = scmp.lt.s32.totalorder %s2300_s17, %s2293_s26 }
  0x8e   : > { %p2297_p4 = pneg %p2296_p11  ;;  %p2303_p13 = por %p2302_p6, %p2301_p12 }
  0x90   : > { %p2304_p5 = pnand %p2303_p13, %p2297_p4 }
  0x92   : > { %2307 = shalt.err (!%p2304_p5)
}
  0x93   : > { %2113 = dma.hbm_to_vmem [thread:$0]  (!%p2722_p7), %s2842_s19, 512, %s2845_s23, %s3934_s30, %s2558_s11, %s2558_s11, %s2559_s13  }
  0x94   : > { %s2563_s12 = smov [#allocation16]   ;;  %s2874_s24 = sshll.u32 %s2718_s16, 7 }
  0x95   : > { %s356_s14 = sshll.u32 %s2563_s12, 4  ;;  %s2309_s26 = scalar_lea.hbm %s3907_s8, 16  ;;  %s357_s14 = int_to_ptr.vmem [resolvable:$true] %s356_s14 }
  0x96   : > { %p2310_p10 = scmp.ne.s32.totalorder %s3907_s8, %s2309_s26  ;;  %p3977_p9 = scmp.ne.s32.totalorder %s3972_s29, 0 }
  0x97   : > { %p2316_p3 = scmp.lt.u32.totalorder %s2309_s26, %s3907_s8 }
  0x98   : > { %p3978_p2 = pneg %p3977_p9 }
  0x9a   : > { %p2312_p1 = pnand %p2310_p10, %p3978_p2 }
  0x9c   : > { %p2313_p0 = pneg %p2312_p1 }
  0x9e   : > { %p2318_p11 = pnand %p2316_p3, %p2313_p0 }
  0xa0   : > { %2321 = shalt.err (!%p2318_p11)
}
  0xa1   : > { %s2322_s19 = scalar_lea.vmem %s357_s14, 16  ;;  %p3979_p12 = pmov %p3978_p2 }
  0xa2   : > { %p2323_p4 = scmp.ne.s32.totalorder %s357_s14, %s2322_s19  ;;  %s2329_s23 = scalar_lea.vmem %s357_s14, 32 }
  0xa3   : > { %p2330_p5 = scmp.lt.s32.totalorder %s357_s14, %s357_s14  ;;  %p2331_p7 = scmp.lt.s32.totalorder %s2329_s23, %s2322_s19 }
  0xa4   : > { %p2325_p6 = pnand %p2323_p4, %p3979_p12 }
  0xa5   : > { %p2332_p8 = por %p2331_p7, %p2330_p5 }
  0xa6   : > { %p2326_p13 = pneg %p2325_p6 }
  0xa8   : > { %p2333_p2 = pnand %p2332_p8, %p2326_p13 }
  0xaa   : > { %2336 = shalt.err (!%p2333_p2)
}
  0xab   : > { %2094 = dma.hbm_to_vmem [thread:$0]  (!%p3977_p9), %s3907_s8, 16, %s357_s14, [#allocation15]  }
  0xac   : > { %s2900_s26 = scalar_lea.hbm %s3899_s0, %s2709_s28  ;;  %s371_s15 = scalar_lea.vmem [#allocation2], %s2874_s24 }
  0xad   : > { %s386_s29 = sshll.u32 %s371_s15, 4  ;;  %s2909_s19 = scalar_lea.hbm %s3901_s2, %s2709_s28  ;;  %s2903_s29 = int_to_ptr.vmem [resolvable:$true] %s386_s29 }
  0xae   : > { %s368_s23 = scalar_lea.sflag [#allocation3], %s2718_s16  ;;  %s2337_s14 = scalar_lea.hbm %s2900_s26, 2048 }
  0xaf   : > { %p2338_p7 = scmp.ne.s32.totalorder %s2900_s26, %s2337_s14  ;;  %p3980_p8 = scmp.ne.s32.totalorder %s3975_s27, 0 }
  0xb0   : > { %s2342_s1 = scalar_lea.hbm %s3899_s0, 5120  ;;  %p2343_p1 = scmp.lt.u32.totalorder %s2900_s26, %s3899_s0 }
  0xb1   : > { %p2340_p10 = pnand %p2338_p7, %p3980_p8  ;;  %p2344_p0 = scmp.lt.u32.totalorder %s2342_s1, %s2337_s14 }
  0xb2   : > { %p2346_p11 = scmp.lt.u32.totalorder %s2337_s14, %s2900_s26 }
  0xb3   : > { %p2341_p9 = pneg %p2340_p10  ;;  %p2345_p3 = por %p2344_p0, %p2343_p1 }
  0xb5   : > { %p2347_p4 = por %p2346_p11, %p2345_p3 }
  0xb7   : > { %p2348_p12 = pnand %p2347_p4, %p2341_p9 }
  0xb9   : > { %2351 = shalt.err (!%p2348_p12)
}
  0xba   : > { %s2352_s15 = scalar_lea.vmem %s2903_s29, 2048  ;;  %s2564_s9 = smov [#allocation2]  }
  0xbb   : > { %p2353_p6 = scmp.ne.s32.totalorder %s2903_s29, %s2352_s15  ;;  %s2357_s17 = sshll.u32 %s2564_s9, 4  ;;  %s2358_s17 = int_to_ptr.vmem [resolvable:$false] %s2357_s17 }
  0xbc   : > { %s2359_s30 = scalar_lea.vmem %s2358_s17, 4096  ;;  %p2360_p2 = scmp.lt.s32.totalorder %s2903_s29, %s2358_s17 }
  0xbd   : > { %p2355_p13 = pnand %p2353_p6, %p3980_p8  ;;  %p2361_p7 = scmp.lt.s32.totalorder %s2359_s30, %s2352_s15 }
  0xbf   : > { %p2356_p5 = pneg %p2355_p13  ;;  %p2362_p10 = por %p2361_p7, %p2360_p2 }
  0xc1   : > { %p2363_p1 = pnand %p2362_p10, %p2356_p5 }
  0xc3   : > { %2366 = shalt.err (!%p2363_p1)
}
  0xc4   : > { %p3981_p9 = scmp.ne.s32.totalorder %s3973_s18, 0  ;;  %s425_s14 = scalar_lea.vmem [#allocation7], %s2874_s24 }
  0xc5   : > { %s440_s12 = sshll.u32 %s425_s14, 4  ;;  %s2945_s22 = scalar_lea.hbm %s3903_s4, %s2709_s28  ;;  %s2939_s12 = int_to_ptr.vmem [resolvable:$true] %s440_s12 }
  0xc6   : > { %2098 = dma.hbm_to_vmem [thread:$0]  (!%p3981_p9), %s2900_s26, 2048, %s2903_s29, %s368_s23, %s2558_s11, %s2558_s11, %s2559_s13  }
  0xc7   : > { %s2367_s16 = scalar_lea.hbm %s2909_s19, 2048  ;;  %s2372_s17 = scalar_lea.hbm %s3901_s2, 5120 }
  0xc8   : > { %p2368_p0 = scmp.ne.s32.totalorder %s2909_s19, %s2367_s16  ;;  %p2373_p4 = scmp.lt.u32.totalorder %s2909_s19, %s3901_s2 }
  0xc9   : > { %p2374_p12 = scmp.lt.u32.totalorder %s2372_s17, %s2367_s16  ;;  %p2376_p13 = scmp.lt.u32.totalorder %s2367_s16, %s2909_s19 }
  0xca   : > { %p2370_p3 = pnand %p2368_p0, %p3980_p8 }
  0xcb   : > { %p2375_p6 = por %p2374_p12, %p2373_p4 }
  0xcc   : > { %p2371_p11 = pneg %p2370_p3 }
  0xcd   : > { %p2377_p5 = por %p2376_p13, %p2375_p6 }
  0xcf   : > { %p2378_p2 = pnand %p2377_p5, %p2371_p11 }
  0xd1   : > { %2381 = shalt.err (!%p2378_p2)
}
  0xd2   : > { %s2382_s29 = scalar_lea.vmem %s2939_s12, 2048  ;;  %s2565_s23 = smov [#allocation7]  }
  0xd3   : > { %p2383_p7 = scmp.ne.s32.totalorder %s2939_s12, %s2382_s29  ;;  %s2387_s14 = sshll.u32 %s2565_s23, 4  ;;  %s2388_s14 = int_to_ptr.vmem [resolvable:$false] %s2387_s14 }
  0xd4   : > { %s2389_s3 = scalar_lea.vmem %s2388_s14, 4096  ;;  %p2390_p0 = scmp.lt.s32.totalorder %s2939_s12, %s2388_s14 }
  0xd5   : > { %p2385_p10 = pnand %p2383_p7, %p3980_p8  ;;  %p2391_p3 = scmp.lt.s32.totalorder %s2389_s3, %s2382_s29 }
  0xd7   : > { %p2386_p1 = pneg %p2385_p10  ;;  %p2392_p4 = por %p2391_p3, %p2390_p0 }
  0xd9   : > { %p2393_p12 = pnand %p2392_p4, %p2386_p1 }
  0xdb   : > { %2396 = shalt.err (!%p2393_p12)
}
  0xdc   : > { %s3982_s1 = scalar_lea.sflag [#allocation6], %s2727_s20  ;;  %s479_s16 = scalar_lea.vmem [#allocation10], %s2874_s24 }
  0xdd   : > { %2104 = dma.hbm_to_vmem [thread:$0]  (!%p3981_p9), %s2909_s19, 2048, %s2939_s12, %s3982_s1, %s2558_s11, %s2558_s11, %s2559_s13  }
  0xde   : > { %s494_s15 = sshll.u32 %s479_s16, 4  ;;  %s2980_s30 = scalar_lea.hbm %s3905_s6, %s2709_s28  ;;  %s2974_s15 = int_to_ptr.vmem [resolvable:$true] %s494_s15 }
  0xdf   : > { %s2397_s26 = scalar_lea.hbm %s2945_s22, 2048  ;;  %s2402_s14 = scalar_lea.hbm %s3903_s4, 5120 }
  0xe0   : > { %p2398_p11 = scmp.ne.s32.totalorder %s2945_s22, %s2397_s26  ;;  %p2403_p5 = scmp.lt.u32.totalorder %s2945_s22, %s3903_s4 }
  0xe1   : > { %p2404_p2 = scmp.lt.u32.totalorder %s2402_s14, %s2397_s26  ;;  %p2406_p10 = scmp.lt.u32.totalorder %s2397_s26, %s2945_s22 }
  0xe2   : > { %p2400_p6 = pnand %p2398_p11, %p3980_p8 }
  0xe3   : > { %p2405_p7 = por %p2404_p2, %p2403_p5 }
  0xe4   : > { %p2401_p13 = pneg %p2400_p6 }
  0xe5   : > { %p2407_p1 = por %p2406_p10, %p2405_p7 }
  0xe7   : > { %p2408_p0 = pnand %p2407_p1, %p2401_p13 }
  0xe9   : > { %2411 = shalt.err (!%p2408_p0)
}
  0xea   : > { %s2412_s28 = scalar_lea.vmem %s2974_s15, 2048  ;;  %s2566_s12 = smov [#allocation10]  }
  0xeb   : > { %p2413_p3 = scmp.ne.s32.totalorder %s2974_s15, %s2412_s28  ;;  %s2417_s1 = sshll.u32 %s2566_s12, 4  ;;  %s2418_s1 = int_to_ptr.vmem [resolvable:$false] %s2417_s1 }
  0xec   : > { %s2419_s16 = scalar_lea.vmem %s2418_s1, 4096  ;;  %p2420_p11 = scmp.lt.s32.totalorder %s2974_s15, %s2418_s1 }
  0xed   : > { %p2415_p4 = pnand %p2413_p3, %p3980_p8  ;;  %p2421_p6 = scmp.lt.s32.totalorder %s2419_s16, %s2412_s28 }
  0xef   : > { %p2416_p12 = pneg %p2415_p4  ;;  %p2422_p5 = por %p2421_p6, %p2420_p11 }
  0xf1   : > { %p2423_p2 = pnand %p2422_p5, %p2416_p12 }
  0xf3   : > { %2426 = shalt.err (!%p2423_p2)
}
  0xf4   : > { %s3983_s9 = scalar_lea.sflag [#allocation9], %s2727_s20  ;;  %s533_s17 = scalar_lea.vmem [#allocation13], %s2874_s24 }
  0xf5   : > { %2110 = dma.hbm_to_vmem [thread:$0]  (!%p3981_p9), %s2945_s22, 2048, %s2974_s15, %s3983_s9, %s2558_s11, %s2558_s11, %s2559_s13  }
  0xf6   : > { %s548_s26 = sshll.u32 %s533_s17, 4  ;;  %s2427_s29 = scalar_lea.hbm %s2980_s30, 2048  ;;  %s3009_s26 = int_to_ptr.vmem [resolvable:$true] %s548_s26 }
  0xf7   : > { %p2428_p13 = scmp.ne.s32.totalorder %s2980_s30, %s2427_s29  ;;  %s2432_s3 = scalar_lea.hbm %s3905_s6, 5120 }
  0xf8   : > { %p2433_p1 = scmp.lt.u32.totalorder %s2980_s30, %s3905_s6  ;;  %p2434_p0 = scmp.lt.u32.totalorder %s2432_s3, %s2427_s29 }
  0xf9   : > { %p2430_p7 = pnand %p2428_p13, %p3980_p8  ;;  %p2436_p4 = scmp.lt.u32.totalorder %s2427_s29, %s2980_s30 }
  0xfa   : > { %p2435_p3 = por %p2434_p0, %p2433_p1 }
  0xfb   : > { %p2431_p10 = pneg %p2430_p7 }
  0xfc   : > { %p2437_p12 = por %p2436_p4, %p2435_p3 }
  0xfe   : > { %p2438_p11 = pnand %p2437_p12, %p2431_p10 }
 0x100   : > { %2441 = shalt.err (!%p2438_p11)
}
 0x101   : > { %s2442_s24 = scalar_lea.vmem %s3009_s26, 2048  ;;  %s2567_s22 = smov [#allocation13]  }
 0x102   : > { %p2443_p6 = scmp.ne.s32.totalorder %s3009_s26, %s2442_s24  ;;  %s2447_s15 = sshll.u32 %s2567_s22, 4  ;;  %s2448_s15 = int_to_ptr.vmem [resolvable:$false] %s2447_s15 }
 0x103   : > { %s2449_s12 = scalar_lea.vmem %s2448_s15, 4096  ;;  %p2450_p13 = scmp.lt.s32.totalorder %s3009_s26, %s2448_s15 }
 0x104   : > { %p2445_p5 = pnand %p2443_p6, %p3980_p8  ;;  %p2451_p7 = scmp.lt.s32.totalorder %s2449_s12, %s2442_s24 }
 0x106   : > { %p2446_p2 = pneg %p2445_p5  ;;  %p2452_p1 = por %p2451_p7, %p2450_p13 }
 0x108   : > { %p2453_p0 = pnand %p2452_p1, %p2446_p2 }
 0x10a   : > { %2456 = shalt.err (!%p2453_p0)
}
 0x10b   : > { %s3984_s1 = scalar_lea.sflag [#allocation12], %s2727_s20  ;;  %p3985_p8 = scmp.ne.s32.totalorder %s3971_s25, 0 }
 0x10c   : > { %2116 = dma.hbm_to_vmem [thread:$0]  (!%p3981_p9), %s2980_s30, 2048, %s3009_s26, %s3984_s1, %s2558_s11, %s2558_s11, %s2559_s13  }
 0x10d   : > { %560 = sbr.rel (%p3985_p8) target bundleno = 898 (0x382), region = 56 }
 0x114   : > { %s3040_s27 = sand.u32 1, %s2539_s10   ;;  %p3986_p10 = scmp.ne.s32.totalorder %s3965_s21, 0 }
 0x115   : > { %s1957_s16 = sshll.u32 %s3040_s27, 7  ;;  %s563_s9 = scalar_lea.sflag [#allocation3], %s3040_s27 }
 0x116   : > { %s3044_s18 = scalar_lea.vmem [#allocation2], %s1957_s16 }
 0x117   : > { %2510 = dma.done.wait (%p3986_p10), %s563_s9, 2048  }
 0x118   : > { %2512 = vsyncadd (%p3986_p10), %s563_s9, 4294965248  ;;  %s3987_s20 = sld [smem:[#allocation29_spill]]  ;;  %s3052_s11 = sshll.u32 %s3040_s27, 5 }
 0x119   : > { %s3055_s30 = scalar_lea.vmem [#allocation5], %s3052_s11 }
 0x11e   : > { %s571_s25 = sand.u32 1, %s3987_s20  }
 0x11f   : > { %s572_s13 = scalar_lea.sflag [#allocation6], %s571_s25 }
 0x120   : > { %2514 = dma.done.wait (%p3986_p10), %s572_s13, 2560  }
 0x121   : > { %2516 = vsyncadd (%p3986_p10), %s572_s13, 4294964736  ;;  %s3061_s17 = scalar_lea.vmem [#allocation7], %s1957_s16  ;;  %s590_s26 = scalar_lea.sflag [#allocation9], %s571_s25 }
 0x122   : > { %s593_s29 = scalar_lea.vmem [#allocation8], %s3052_s11 }
 0x123   : > { %2518 = dma.done.wait (%p3986_p10), %s590_s26, 2560  }
 0x124   : > { %2520 = vsyncadd (%p3986_p10), %s590_s26, 4294964736  ;;  %s3068_s23 = scalar_lea.vmem [#allocation10], %s1957_s16  ;;  %s608_s14 = scalar_lea.sflag [#allocation12], %s571_s25 }
 0x125   : > { %s611_s3 = scalar_lea.vmem [#allocation11], %s3052_s11 }
 0x126   : > { %2522 = dma.done.wait (%p3986_p10), %s608_s14, 2560  }
 0x127   : > { %2524 = vsyncadd (%p3986_p10), %s608_s14, 4294964736  ;;  %s3075_s19 = scalar_lea.vmem [#allocation13], %s1957_s16  ;;  %p3988_p9 = scmp.eq.s32.totalorder %s3987_s20, 0 }
 0x129   : > { %2526 = dma.done.wait (%p3988_p9), [#allocation15], 656   ;;  %p3989_p3 = pmov %p3988_p9 }
 0x12a   : > { %v743_v0 = vld [vmem:[%s3061_s17 + $0x8] sm:$0xff]  ;;  %v742_v1 = vld [vmem:[%s3061_s17] sm:$0xff]  ;;  %s2568_s21 = smov 4   ;;  %vm874_vm0 = vcmask 1046528   ;;  %v3108_v12 = vld [vmem:[%s3044_s18 + $0x50] sm:$0xff]  ;;  %s2569_s28 = smov 8  }
 0x12b   : > { %2528 = vsyncadd (%p3989_p3), [#allocation15], 4294966640  ;;  %v3084_v2 = vld [vmem:[%s3061_s17 + $0x48] sm:$0xff]  ;;  %811 = vrot.lane.b32.xlu1 %v743_v0, %s2568_s21  ;;  %809 = vrot.lane.b32.xlu0 %v742_v1, %s2568_s21  ;;  %v3089_v3 = vld [vmem:[%s3061_s17 + $0x40] sm:$0xff]  ;;  %v894_v16 = vrot.slane %v3108_v12, 1  ;;  %s2570_s24 = smov 12  }
 0x12c   : > { %3990 = vst [vmem:[#allocation34_spill] sm:$0xff] %v3084_v2  ;;  %3991 = vst [vmem:[#allocation35_spill] sm:$0xff] %v3089_v3  ;;  %v3092_v4 = vld [vmem:[%s3044_s18 + $0x40] sm:$0xff]  ;;  %v3095_v5 = vld [vmem:[%s3044_s18 + $0x48] sm:$0xff]  ;;  %s2571_s22 = smov 16   ;;  %s2572_s15 = smov 20  }
 0x12d   : > { %v3936_v6 = vrot.slane %v3092_v4, 1  ;;  %v3099_v7 = vld [vmem:[%s3044_s18] sm:$0xff]  ;;  %v3102_v8 = vld [vmem:[%s3044_s18 + $0x8] sm:$0xff]  ;;  %v892_v9 = vrot.slane %v3095_v5, 1  ;;  %v3111_v13 = vld [vmem:[%s3044_s18 + $0x10] sm:$0xff]  ;;  %s2573_s12 = smov 24  }
 0x12e   : > { %v875_v10 = vrot.slane %v3099_v7, 1  ;;  %v876_v11 = vrot.slane %v3102_v8, 1  ;;  %v878_v17 = vrot.slane %v3111_v13, 1  ;;  %v3136_v20 = vld [vmem:[%s3068_s23 + $0x40] sm:$0xff]  ;;  %v769_v22 = vld [vmem:[%s3068_s23 + $0x48] sm:$0xff]  ;;  %v752_v26 = vld [vmem:[%s3061_s17 + $0x50] sm:$0xff] }
 0x12f   : > { %827 = vrot.lane.b32.xlu1 %v3084_v2, %s2568_s21  ;;  %825 = vrot.lane.b32.xlu0 %v3089_v3, %s2568_s21  ;;  %v3120_v14 = vsel %vm874_vm0, %v3936_v6, %v892_v9  ;;  %v3129_v18 = vsel %vm874_vm0, %v892_v9, %v894_v16  ;;  %3994 = vst [vmem:[#allocation38_spill] sm:$0xff] %v3136_v20  ;;  %v760_v21 = vld [vmem:[%s3068_s23] sm:$0xff]  ;;  %v761_v23 = vld [vmem:[%s3068_s23 + $0x8] sm:$0xff]  ;;  %v3935_v28 = vrot.slane %v3136_v20, 1  ;;  %v1102_v30 = vrot.slane %v769_v22, 1  ;;  %s2574_s1 = smov 28  }
 0x130   : > { %3992 = vst [vmem:[#allocation36_spill] sm:$0xff] %v3120_v14  ;;  %v877_v15 = vsel %vm874_vm0, %v875_v10, %v876_v11  ;;  %3993 = vst [vmem:[#allocation37_spill] sm:$0xff] %v3129_v18  ;;  %v879_v19 = vsel %vm874_vm0, %v876_v11, %v878_v17  ;;  %v785_v24 = vld [vmem:[%s3075_s19 + $0x40] sm:$0xff]  ;;  %v744_v27 = vld [vmem:[%s3061_s17 + $0x10] sm:$0xff]  ;;  %v1085_v29 = vrot.slane %v760_v21, 1  ;;  %v1086_v31 = vrot.slane %v761_v23, 1 }
 0x131   : > { %v777_v25 = vld [vmem:[%s3075_s19] sm:$0xff]  ;;  %v786_v32 = vld [vmem:[%s3075_s19 + $0x48] sm:$0xff]  ;;  %v1103_v34 = vsel %vm874_vm0, %v3935_v28, %v1102_v30  ;;  %v3164_v36 = vld [vmem:[%s3044_s18 + $0x58] sm:$0xff]  ;;  %s2575_s16 = smov 32   ;;  %vm1515_vm1 = vcmask 1043456   ;;  %vm1318_vm2 = vcmask 31744  }
 0x132   : > { %v778_v33 = vld [vmem:[%s3075_s19 + $0x8] sm:$0xff]  ;;  %v1087_v35 = vsel %vm874_vm0, %v1085_v29, %v1086_v31  ;;  %v3167_v37 = vld [vmem:[%s3044_s18 + $0x18] sm:$0xff]  ;;  %v896_v40 = vrot.slane %v3164_v36, 1  ;;  %v3176_v42 = vld [vmem:[%s3068_s23 + $0x50] sm:$0xff]  ;;  %vm1335_vm3 = vcmask 64512   ;;  %vm1352_vm4 = vcmask 97280  }
 0x133   : > { %924 = vrot.lane.b32.xlu1 %v3120_v14, %s2569_s28  ;;  %908 = vrot.lane.b32.xlu0 %v877_v15, %s2569_s28  ;;  %v753_v38 = vld [vmem:[%s3061_s17 + $0x58] sm:$0xff]  ;;  %v880_v41 = vrot.slane %v3167_v37, 1  ;;  %v3179_v43 = vld [vmem:[%s3068_s23 + $0x10] sm:$0xff]  ;;  %v1104_v46 = vrot.slane %v3176_v42, 1  ;;  %v1454_v60 = vld [vmem:[#allocation14] sm:$0xff]  ;;  %vm1369_vm5 = vcmask 130048  }
 0x134   : > { %v745_v39 = vld [vmem:[%s3061_s17 + $0x18] sm:$0xff]  ;;  %v897_v44 = vsel %vm874_vm0, %v894_v16, %v896_v40  ;;  %v1088_v47 = vrot.slane %v3179_v43, 1  ;;  %v3196_v50 = vld [vmem:[%s3044_s18 + $0x60] sm:$0xff]  ;;  %v787_v58 = vld [vmem:[%s3075_s19 + $0x50] sm:$0xff]  ;;  %vm1386_vm6 = vcmask 162816   ;;  %vm1403_vm7 = vcmask 195584  }
 0x135   : > { %v881_v45 = vsel %vm874_vm0, %v878_v17, %v880_v41  ;;  %v1105_v48 = vsel %vm874_vm0, %v1102_v30, %v1104_v46  ;;  %3995 = vst [vmem:[#allocation39_spill] sm:$0xff] %v3196_v50  ;;  %v3199_v51 = vld [vmem:[%s3044_s18 + $0x20] sm:$0xff]  ;;  %v898_v52 = vrot.slane %v3196_v50, 1  ;;  %v3228_v56 = vld [vmem:[%s3068_s23 + $0x58] sm:$0xff]  ;;  %v779_v59 = vld [vmem:[%s3075_s19 + $0x10] sm:$0xff]  ;;  %vm1420_vm8 = vcmask 228352  }
 0x136   : > { %v1089_v49 = vsel %vm874_vm0, %v1086_v31, %v1088_v47  ;;  %3996 = vst [vmem:[#allocation40_spill] sm:$0xff] %v3199_v51  ;;  %v882_v53 = vrot.slane %v3199_v51, 1  ;;  %v3231_v57 = vld [vmem:[%s3068_s23 + $0x18] sm:$0xff]  ;;  %v1455_v61 = vld [vmem:[#allocation14 + $0x8] sm:$0xff]  ;;  %v1456_v63 = vld [vmem:[#allocation14 + $0x10] sm:$0xff]  ;;  %v1106_v15 = vrot.slane %v3228_v56, 1 }
 0x137   : > { %926 = vrot.lane.b32.xlu1 %v3129_v18, %s2569_s28  ;;  %910 = vrot.lane.b32.xlu0 %v879_v19, %s2569_s28  ;;  %v899_v54 = vsel %vm874_vm0, %v896_v40, %v898_v52  ;;  %v2046_v62 = vpack.c.bf16 %v1455_v61, %v1454_v60  ;;  %v1457_v0 = vld [vmem:[#allocation14 + $0x18] sm:$0xff]  ;;  %v3246_v9 = vld [vmem:[%s3061_s17 + $0x60] sm:$0xff]  ;;  %v1090_v16 = vrot.slane %v3231_v57, 1  ;;  %v3306_v40 = vld [vmem:[%s3044_s18 + $0x70] sm:$0xff]  ;;  %vm1437_vm9 = vcmask 261120   ;;  %s1966_s9 = sshll.u32 %s3040_s27, 6 }
 0x138   : > { %v883_v55 = vsel %vm874_vm0, %v880_v41, %v882_v53  ;;  %v2050_v1 = vpack.c.bf16 %v1457_v0, %v1456_v63  ;;  %v3249_v10 = vld [vmem:[%s3061_s17 + $0x20] sm:$0xff]  ;;  %v788_v17 = vld [vmem:[%s3075_s19 + $0x58] sm:$0xff]  ;;  %3999 = vst [vmem:[#allocation43_spill] sm:$0xff] %v3306_v40  ;;  %v3309_v41 = vld [vmem:[%s3044_s18 + $0x30] sm:$0xff]  ;;  %vm1466_vm10 = vcmask 293888   ;;  %s4021_s20 = sld [smem:[#allocation26_spill]] }
 0x139   : > { %2047 = vmatprep.subr.bf16.mxu0 %v2046_v62  ;;  %2054 = vmatprep.subr.bf16.mxu1 %v2046_v62  ;;  %v1458_v11 = vld [vmem:[#allocation14 + $0x20] sm:$0xf]  ;;  %v780_v19 = vld [vmem:[%s3075_s19 + $0x18] sm:$0xff]  ;;  %4000 = vst [vmem:[#allocation44_spill] sm:$0xff] %v3309_v41  ;;  %v3453_v28 = vld [vmem:[%s3068_s23 + $0x30] sm:$0xff]  ;;  %s4022_s25 = sld [smem:[#allocation31_spill]] }
 0x13a   : > { %2049 = vmatpush3.bf16.msra.mxu0 %v2046_v62  ;;  %2057 = vmatpush3.bf16.msra.mxu1 %v2046_v62  ;;  %v3282_v30 = vld [vmem:[%s3068_s23 + $0x60] sm:$0xff]  ;;  %v3946_v18 = vrot.slane %v3453_v28, 1  ;;  %s4023_s26 = sld [smem:[#allocation49_spill]] }
 0x13b   : > { %988 = vrot.lane.b32.xlu1 %v3136_v20, %s2570_s24  ;;  %972 = vrot.lane.b32.xlu0 %v760_v21, %s2570_s24  ;;  %v1107_v21 = vsel %vm874_vm0, %v1104_v46, %v1106_v15  ;;  %v3285_v31 = vld [vmem:[%s3068_s23 + $0x20] sm:$0xff] }
 0x13c   : > { %2051 = vmatprep.subr.bf16.mxu0 %v2050_v1  ;;  %2055 = vmatprep.subr.bf16.mxu1 %v2050_v1  ;;  %v789_v62 = vld [vmem:[%s3075_s19 + $0x60] sm:$0xff] }
 0x13d   : > { %v781_v63 = vld [vmem:[%s3075_s19 + $0x20] sm:$0xff] }
 0x13e   : > { %2053 = vmatpush3.bf16.msra.mxu0 %v2050_v1  ;;  %2058 = vmatpush3.bf16.msra.mxu1 %v2050_v1  ;;  %s1990_s11 = sshll.u32 %s4021_s20, 10 }
 0x13f   : > { %990 = vrot.lane.b32.xlu1 %v769_v22, %s2570_s24  ;;  %974 = vrot.lane.b32.xlu0 %v761_v23, %s2570_s24  ;;  %v1091_v22 = vsel %vm874_vm0, %v1088_v47, %v1090_v16  ;;  %v3270_v23 = vld [vmem:[%s3044_s18 + $0x68] sm:$0xff]  ;;  %p4024_p12 = scmp.ne.s32.totalorder %s4022_s25, 0 }
 0x140   : > { %2020 = vmatprep.subr.msk.mxu0 %vm1515_vm1, %v1458_v11  ;;  %2056 = vmatprep.subr.msk.mxu1 %vm1515_vm1, %v1458_v11  ;;  %3997 = vst [vmem:[#allocation41_spill] sm:$0xff] %v3270_v23 }
 0x142   : > { %2021 = vmatpush3.msk.msra.mxu0 %vm1515_vm1, %v1458_v11  ;;  %2059 = vmatpush3.msk.msra.mxu1 %vm1515_vm1, %v1458_v11 }
 0x143   : > { %1052 = vrot.lane.b32.xlu1 %v785_v24, %s2571_s22  ;;  %1036 = vrot.lane.b32.xlu0 %v777_v25, %s2571_s22  ;;  %v3273_v24 = vld [vmem:[%s3044_s18 + $0x28] sm:$0xff] }
 0x144   : > { %3998 = vst [vmem:[#allocation42_spill] sm:$0xff] %v3273_v24  ;;  %v755_v25 = vld [vmem:[%s3061_s17 + $0x68] sm:$0xff]  ;;  %v884_v29 = vrot.slane %v3273_v24, 1 }
 0x147   : > { %829 = vrot.lane.b32.xlu1 %v752_v26, %s2568_s21  ;;  %813 = vrot.lane.b32.xlu0 %v744_v27, %s2568_s21 }
 0x14b   : > { %1054 = vrot.lane.b32.xlu1 %v786_v32, %s2571_s22  ;;  %1038 = vrot.lane.b32.xlu0 %v778_v33, %s2571_s22  ;;  %v885_v33 = vsel %vm874_vm0, %v882_v53, %v884_v29 }
 0x14f   : > { %1134 = vrot.lane.b32.xlu1 %v1103_v34, %s2572_s15  ;;  %1118 = vrot.lane.b32.xlu0 %v1087_v35, %s2572_s15  ;;  %v1108_v34 = vrot.slane %v3282_v30, 1  ;;  %v1092_v35 = vrot.slane %v3285_v31, 1 }
 0x153   : > { %831 = vrot.lane.b32.xlu1 %v753_v38, %s2568_s21  ;;  %815 = vrot.lane.b32.xlu0 %v745_v39, %s2568_s21 }
 0x157   : > { %928 = vrot.lane.b32.xlu1 %v897_v44, %s2569_s28  ;;  %912 = vrot.lane.b32.xlu0 %v881_v45, %s2569_s28 }
 0x15b   : > { %1136 = vrot.lane.b32.xlu1 %v1105_v48, %s2572_s15  ;;  %1120 = vrot.lane.b32.xlu0 %v1089_v49, %s2572_s15 }
 0x15f   : > { %1183 = vrot.lane.b32.xlu1 %v3108_v12, %s2573_s12  ;;  %1167 = vrot.lane.b32.xlu0 %v3111_v13, %s2573_s12 }
 0x163   : > { %930 = vrot.lane.b32.xlu1 %v899_v54, %s2569_s28  ;;  %914 = vrot.lane.b32.xlu0 %v883_v55, %s2569_s28 }
 0x167   : > { %992 = vrot.lane.b32.xlu1 %v3176_v42, %s2570_s24  ;;  %976 = vrot.lane.b32.xlu0 %v3179_v43, %s2570_s24  ;;  %v902_v42 = vrot.slane %v3306_v40, 1  ;;  %v886_v43 = vrot.slane %v3309_v41, 1 }
 0x169   : > { %v887_v47 = vsel %vm874_vm0, %v884_v29, %v886_v43 }
 0x16b   : > { %1185 = vrot.lane.b32.xlu1 %v3164_v36, %s2573_s12  ;;  %1169 = vrot.lane.b32.xlu0 %v3167_v37, %s2573_s12 }
 0x16f   : > { %1233 = vrot.lane.b32.xlu1 %v752_v26, %s2574_s1  ;;  %1217 = vrot.lane.b32.xlu0 %v744_v27, %s2574_s1  ;;  %v747_v26 = vld [vmem:[%s3061_s17 + $0x28] sm:$0xff]  ;;  %v900_v27 = vrot.slane %v3270_v23, 1 }
 0x171   : > { %v901_v32 = vsel %vm874_vm0, %v898_v52, %v900_v27  ;;  %v903_v46 = vsel %vm874_vm0, %v900_v27, %v902_v42  ;;  %v782_v27 = vld [vmem:[%s3075_s19 + $0x28] sm:$0xff] }
 0x173   : > { %994 = vrot.lane.b32.xlu1 %v3228_v56, %s2570_s24  ;;  %978 = vrot.lane.b32.xlu0 %v3231_v57, %s2570_s24 }
 0x177   : > { %1056 = vrot.lane.b32.xlu1 %v787_v58, %s2571_s22  ;;  %1040 = vrot.lane.b32.xlu0 %v779_v59, %s2571_s22  ;;  %v3360_v58 = vld [vmem:[%s3068_s23 + $0x68] sm:$0xff] }
 0x178   : > { %v3363_v59 = vld [vmem:[%s3068_s23 + $0x28] sm:$0xff] }
 0x17b   : > { %1235 = vrot.lane.b32.xlu1 %v753_v38, %s2574_s1  ;;  %1219 = vrot.lane.b32.xlu0 %v745_v39, %s2574_s1  ;;  %v1109_v38 = vsel %vm874_vm0, %v1106_v15, %v1108_v34  ;;  %v1093_v39 = vsel %vm874_vm0, %v1090_v16, %v1092_v35  ;;  %v3394_v16 = vld [vmem:[%s3061_s17 + $0x70] sm:$0xff] }
 0x17f   : > { %1286 = vrot.lane.b32.xlu1 %v897_v44, %s2575_s16  ;;  %1270 = vrot.lane.b32.xlu0 %v881_v45, %s2575_s16 }
 0x183   : > { %833 = vrot.lane.b32.xlu1 %v3246_v9, %s2568_s21  ;;  %817 = vrot.lane.b32.xlu0 %v3249_v10, %s2568_s21 }
 0x187   : > { %1058 = vrot.lane.b32.xlu1 %v788_v17, %s2571_s22  ;;  %1042 = vrot.lane.b32.xlu0 %v780_v19, %s2571_s22  ;;  %v3397_v17 = vld [vmem:[%s3061_s17 + $0x30] sm:$0xff] }
 0x18b   : > { %1138 = vrot.lane.b32.xlu1 %v1107_v21, %s2572_s15  ;;  %1122 = vrot.lane.b32.xlu0 %v1091_v22, %s2572_s15  ;;  %v1110_v22 = vrot.slane %v3360_v58, 1 }
 0x18f   : > { %1288 = vrot.lane.b32.xlu1 %v899_v54, %s2575_s16  ;;  %1272 = vrot.lane.b32.xlu0 %v883_v55, %s2575_s16 }
 0x193   : > { %835 = vrot.lane.b32.xlu1 %v755_v25, %s2568_s21  ;;  %819 = vrot.lane.b32.xlu0 %v747_v26, %s2568_s21 }
 0x197   : > { %932 = vrot.lane.b32.xlu1 %v901_v32, %s2569_s28  ;;  %916 = vrot.lane.b32.xlu0 %v885_v33, %s2569_s28 }
 0x19b   : > { %1140 = vrot.lane.b32.xlu1 %v1109_v38, %s2572_s15  ;;  %1124 = vrot.lane.b32.xlu0 %v1093_v39, %s2572_s15 }
 0x19d   : > { %v3315_v44 = vpop.permute.xlu1 %811  ;;  %v3317_v45 = vpop.permute.xlu0 %809 }
 0x19f   : > { %1187 = vrot.lane.b32.xlu1 %v3196_v50, %s2573_s12  ;;  %1171 = vrot.lane.b32.xlu0 %v3199_v51, %s2573_s12 }
 0x1a1   : > { %v3329_v48 = vpop.permute.xlu1 %827  ;;  %v3331_v49 = vpop.permute.xlu0 %825 }
 0x1a3   : > { %934 = vrot.lane.b32.xlu1 %v903_v46, %s2569_s28  ;;  %918 = vrot.lane.b32.xlu0 %v887_v47, %s2569_s28 }
 0x1a5   : > { %v3335_v52 = vpop.permute.xlu1 %924  ;;  %v3337_v53 = vpop.permute.xlu0 %908 }
 0x1a7   : > { %996 = vrot.lane.b32.xlu1 %v3282_v30, %s2570_s24  ;;  %980 = vrot.lane.b32.xlu0 %v3285_v31, %s2570_s24  ;;  %v3433_v30 = vld [vmem:[%s3044_s18 + $0x38] sm:$0xff] }
 0x1a8   : > { %v3438_v31 = vld [vmem:[%s3061_s17 + $0x78] sm:$0xff] }
 0x1a9   : > { %v3343_v54 = vpop.permute.xlu1 %926  ;;  %v3345_v55 = vpop.permute.xlu0 %910 }
 0x1ab   : > { %1189 = vrot.lane.b32.xlu1 %v3270_v23, %s2573_s12  ;;  %1173 = vrot.lane.b32.xlu0 %v3273_v24, %s2573_s12  ;;  %v3486_v23 = vld [vmem:[%s3055_s30] sm:$0xff] }
 0x1ac   : > { %4001 = vst [vmem:[#allocation45_spill] sm:$0xff] %v3486_v23  ;;  %v3949_v20 = vrot.slane %v3486_v23, 1 }
 0x1ad   : > { %v3351_v56 = vpop.permute.xlu1 %988  ;;  %v3353_v57 = vpop.permute.xlu0 %972 }
 0x1af   : > { %1237 = vrot.lane.b32.xlu1 %v3246_v9, %s2574_s1  ;;  %1221 = vrot.lane.b32.xlu0 %v3249_v10, %s2574_s1 }
 0x1b1   : > { %v3365_v60 = vpop.permute.xlu1 %990  ;;  %v3367_v61 = vpop.permute.xlu0 %974 }
 0x1b3   : > { %998 = vrot.lane.b32.xlu1 %v3360_v58, %s2570_s24  ;;  %982 = vrot.lane.b32.xlu0 %v3363_v59, %s2570_s24 }
 0x1b5   : > { %v3375_v0 = vpop.permute.xlu1 %1052  ;;  %v3377_v1 = vpop.permute.xlu0 %1036 }
 0x1b7   : > { %1060 = vrot.lane.b32.xlu1 %v789_v62, %s2571_s22  ;;  %1044 = vrot.lane.b32.xlu0 %v781_v63, %s2571_s22  ;;  %v3430_v63 = vld [vmem:[%s3044_s18 + $0x78] sm:$0xff]  ;;  %s692_s18 = scalar_lea.vmem [#allocation17], %s1966_s9 }
 0x1b8   : > { %s1680_s13 = sshll.u32 %s692_s18, 4  ;;  %s3847_s13 = int_to_ptr.vmem [resolvable:$true] %s1680_s13 }
 0x1b9   : > { %v3381_v9 = vpop.permute.xlu1 %829  ;;  %v3383_v10 = vpop.permute.xlu0 %813  ;;  %s2457_s14 = scalar_lea.vmem %s3847_s13, 1024 }
 0x1ba   : > { %p2458_p4 = scmp.ne.s32.totalorder %s3847_s13, %s2457_s14 }
 0x1bb   : > { %1239 = vrot.lane.b32.xlu1 %v755_v25, %s2574_s1  ;;  %1223 = vrot.lane.b32.xlu0 %v747_v26, %s2574_s1  ;;  %v1094_v25 = vrot.slane %v3363_v59, 1  ;;  %v790_v26 = vld [vmem:[%s3075_s19 + $0x68] sm:$0xff] }
 0x1bc   : > { %p2459_p11 = pnand %p2458_p4, %p4024_p12 }
 0x1bd   : > { %v3387_v11 = vpop.permute.xlu1 %1054  ;;  %v3389_v15 = vpop.permute.xlu0 %1038  ;;  %v1095_v38 = vsel %vm874_vm0, %v1092_v35, %v1094_v25  ;;  %v904_v35 = vrot.slane %v3430_v63, 1 }
 0x1be   : > { %p2460_p6 = pneg %p2459_p11 }
 0x1bf   : > { %1290 = vrot.lane.b32.xlu1 %v901_v32, %s2575_s16  ;;  %1274 = vrot.lane.b32.xlu0 %v885_v33, %s2575_s16  ;;  %v1111_v33 = vsel %vm874_vm0, %v1108_v34, %v1110_v22  ;;  %v3441_v34 = vld [vmem:[%s3061_s17 + $0x38] sm:$0xff] }
 0x1c1   : > { %v3399_v19 = vpop.permute.xlu1 %1134  ;;  %v3401_v21 = vpop.permute.xlu0 %1118 }
 0x1c3   : > { %837 = vrot.lane.b32.xlu1 %v3394_v16, %s2568_s21  ;;  %821 = vrot.lane.b32.xlu0 %v3397_v17, %s2568_s21 }
 0x1c5   : > { %v3411_v29 = vpop.permute.xlu1 %831  ;;  %v3413_v32 = vpop.permute.xlu0 %815 }
 0x1c7   : > { %1062 = vrot.lane.b32.xlu1 %v790_v26, %s2571_s22  ;;  %1046 = vrot.lane.b32.xlu0 %v782_v27, %s2571_s22  ;;  %v888_v26 = vrot.slane %v3433_v30, 1 }
 0x1c9   : > { %v929_v39 = vpop.permute.xlu1 %928  ;;  %v913_v58 = vpop.permute.xlu0 %912 }
 0x1cb   : > { %1142 = vrot.lane.b32.xlu1 %v1111_v33, %s2572_s15  ;;  %1126 = vrot.lane.b32.xlu0 %v1095_v38, %s2572_s15  ;;  %v3450_v38 = vld [vmem:[%s3068_s23 + $0x70] sm:$0xff] }
 0x1cc   : > { %v3947_v6 = vrot.slane %v3450_v38, 1 }
 0x1cd   : > { %v3425_v59 = vpop.permute.xlu1 %1136  ;;  %v3427_v62 = vpop.permute.xlu0 %1120 }
 0x1cf   : > { %1292 = vrot.lane.b32.xlu1 %v903_v46, %s2575_s16  ;;  %1276 = vrot.lane.b32.xlu0 %v887_v47, %s2575_s16  ;;  %v3462_v46 = vsel %vm874_vm0, %v902_v42, %v904_v35  ;;  %v3467_v47 = vsel %vm874_vm0, %v886_v43, %v888_v26  ;;  %v1113_v42 = vsel %vm874_vm0, %v1110_v22, %v3947_v6 }
 0x1d0   : > { %v1097_v43 = vsel %vm874_vm0, %v1094_v25, %v3946_v18  ;;  %v3502_v22 = vsel %vm874_vm0, %v904_v35, %v3949_v20  ;;  %v4002_v25 = vrot.slane %v3092_v4, 1  ;;  %v1329_v35 = vsel %vm1318_vm2, %v3108_v12, %v3381_v9 }
 0x1d1   : > { %v3445_v27 = vpop.permute.xlu1 %1183  ;;  %v3447_v33 = vpop.permute.xlu0 %1167 }
 0x1d3   : > { %839 = vrot.lane.b32.xlu1 %v3438_v31, %s2568_s21  ;;  %823 = vrot.lane.b32.xlu0 %v3441_v34, %s2568_s21 }
 0x1d5   : > { %v3471_v14 = vpop.permute.xlu1 %930  ;;  %v3473_v2 = vpop.permute.xlu0 %914 }
 0x1d7   : > { %936 = vrot.lane.b32.xlu1 %v3462_v46, %s2569_s28  ;;  %920 = vrot.lane.b32.xlu0 %v3467_v47, %s2569_s28 }
 0x1d9   : > { %v993_v3 = vpop.permute.xlu1 %992  ;;  %v977_v24 = vpop.permute.xlu0 %976 }
 0x1db   : > { %1144 = vrot.lane.b32.xlu1 %v1113_v42, %s2572_s15  ;;  %1128 = vrot.lane.b32.xlu0 %v1097_v43, %s2572_s15  ;;  %v3507_v42 = vsel %vm874_vm0, %v888_v26, %v4002_v25  ;;  %v1321_v26 = vsel %vm1318_vm2, %v3111_v13, %v3383_v10  ;;  %v1346_v25 = vsel %vm1335_vm3, %v1329_v35, %v929_v39 }
 0x1dc   : > { %4003 = vst [vmem:[#allocation46_spill] sm:$0xff] %v3507_v42  ;;  %v1338_v20 = vsel %vm1335_vm3, %v1321_v26, %v913_v58  ;;  %v1327_v39 = vsel %vm1318_vm2, %v3092_v4, %v3331_v49  ;;  %v3577_v58 = vld [vmem:[%s3068_s23 + $0x38] sm:$0xff]  ;;  %v1330_v35 = vsel %vm1318_vm2, %v3164_v36, %v3411_v29  ;;  %v1322_v26 = vsel %vm1318_vm2, %v3167_v37, %v3413_v32 }
 0x1dd   : > { %v3491_v51 = vpop.permute.xlu1 %1185  ;;  %v3493_v50 = vpop.permute.xlu0 %1169  ;;  %v1355_v12 = vsel %vm1352_vm4, %v1338_v20, %v977_v24 }
 0x1df   : > { %1191 = vrot.lane.b32.xlu1 %v3306_v40, %s2573_s12  ;;  %1175 = vrot.lane.b32.xlu0 %v3309_v41, %s2573_s12  ;;  %v1363_v40 = vsel %vm1352_vm4, %v1346_v25, %v993_v3  ;;  %v1344_v3 = vsel %vm1335_vm3, %v1327_v39, %v3335_v52  ;;  %v1347_v25 = vsel %vm1335_vm3, %v1330_v35, %v3471_v14 }
 0x1e0   : > { %v1328_v14 = vsel %vm1318_vm2, %v3095_v5, %v3329_v48 }
 0x1e1   : > { %v1234_v43 = vpop.permute.xlu1 %1233  ;;  %v1218_v18 = vpop.permute.xlu0 %1217 }
 0x1e3   : > { %938 = vrot.lane.b32.xlu1 %v3502_v22, %s2569_s28  ;;  %922 = vrot.lane.b32.xlu0 %v3507_v42, %s2569_s28  ;;  %v1319_v42 = vsel %vm1318_vm2, %v3099_v7, %v3317_v45  ;;  %v1361_v7 = vsel %vm1352_vm4, %v1344_v3, %v3351_v56 }
 0x1e4   : > { %v1336_v20 = vsel %vm1335_vm3, %v1319_v42, %v3337_v53  ;;  %v1378_v45 = vsel %vm1369_vm5, %v1361_v7, %v3375_v0  ;;  %v3572_v0 = vld [vmem:[%s3068_s23 + $0x78] sm:$0xff]  ;;  %s1665_s23 = scalar_lea.sflag [#allocation4], %s3040_s27 }
 0x1e5   : > { %v3513_v6 = vpop.permute.xlu1 %994  ;;  %v3515_v41 = vpop.permute.xlu0 %978  ;;  %v1395_v52 = vsel %vm1386_vm6, %v1378_v45, %v3399_v19 }
 0x1e6   : > { %v1412_v56 = vsel %vm1403_vm7, %v1395_v52, %v3445_v27  ;;  %v791_v27 = vld [vmem:[%s3075_s19 + $0x70] sm:$0xff] }
 0x1e7   : > { %1000 = vrot.lane.b32.xlu1 %v3450_v38, %s2570_s24  ;;  %984 = vrot.lane.b32.xlu0 %v3453_v28, %s2570_s24 }
 0x1e9   : > { %v1057_v9 = vpop.permute.xlu1 %1056  ;;  %v1041_v23 = vpop.permute.xlu0 %1040 }
 0x1ea   : > { %v3532_v13 = vsel %vm1369_vm5, %v1363_v40, %v1057_v9  ;;  %v3535_v10 = vsel %vm1369_vm5, %v1355_v12, %v1041_v23  ;;  %v1353_v23 = vsel %vm1352_vm4, %v1336_v20, %v3353_v57  ;;  %v1339_v12 = vsel %vm1335_vm3, %v1322_v26, %v3473_v2  ;;  %v4011_v26 = vld [vmem:[#allocation45_spill] sm:$0xff] }
 0x1eb   : > { %1193 = vrot.lane.b32.xlu1 %v3430_v63, %s2573_s12  ;;  %1177 = vrot.lane.b32.xlu0 %v3433_v30, %s2573_s12  ;;  %v1370_v49 = vsel %vm1369_vm5, %v1353_v23, %v3377_v1  ;;  %v1429_v1 = vsel %vm1420_vm8, %v1412_v56, %v1234_v43  ;;  %v783_v43 = vld [vmem:[%s3075_s19 + $0x30] sm:$0xff]  ;;  %v1364_v9 = vsel %vm1352_vm4, %v1347_v25, %v3513_v6  ;;  %v1098_v20 = vrot.slane %v3577_v58, 1  ;;  %v784_v23 = vld [vmem:[%s3075_s19 + $0x38] sm:$0xff] }
 0x1ec   : > { %v1387_v53 = vsel %vm1386_vm6, %v1370_v49, %v3401_v21  ;;  %v1356_v36 = vsel %vm1352_vm4, %v1339_v12, %v3515_v41  ;;  %v1320_v2 = vsel %vm1318_vm2, %v3102_v8, %v3315_v44  ;;  %v1345_v6 = vsel %vm1335_vm3, %v1328_v14, %v3343_v54  ;;  %v740_v25 = vld [vmem:[%s3055_s30 + $0x8] sm:$0xff] }
 0x1ed   : > { %v1236_v24 = vpop.permute.xlu1 %1235  ;;  %v1220_v40 = vpop.permute.xlu0 %1219  ;;  %v1404_v57 = vsel %vm1403_vm7, %v1387_v53, %v3447_v33  ;;  %v1337_v41 = vsel %vm1335_vm3, %v1320_v2, %v3345_v55  ;;  %v1362_v8 = vsel %vm1352_vm4, %v1345_v6, %v3365_v60  ;;  %v4005_v49 = vrot.slane %v3453_v28, 1  ;;  %v776_v53 = vld [vmem:[%s611_s3] sm:$0xff]  ;;  %s2576_s3 = smov [#allocation17]  }
 0x1ee   : > { %v1421_v19 = vsel %vm1420_vm8, %v1404_v57, %v1218_v18  ;;  %v1354_v44 = vsel %vm1352_vm4, %v1337_v41, %v3367_v61  ;;  %v1379_v54 = vsel %vm1369_vm5, %v1362_v8, %v3387_v11  ;;  %v1114_v11 = vrot.slane %v3572_v0, 1  ;;  %v4006_v57 = vld [vmem:[#allocation39_spill] sm:$0xff]  ;;  %v4012_v12 = vld [vmem:[#allocation41_spill] sm:$0xff] }
 0x1ef   : > { %1241 = vrot.lane.b32.xlu1 %v3394_v16, %s2574_s1  ;;  %1225 = vrot.lane.b32.xlu0 %v3397_v17, %s2574_s1  ;;  %v1371_v55 = vsel %vm1369_vm5, %v1354_v44, %v3389_v15  ;;  %v792_v15 = vld [vmem:[%s3075_s19 + $0x78] sm:$0xff]  ;;  %v1099_v52 = vsel %vm874_vm0, %v4005_v49, %v1098_v20  ;;  %v1116_v56 = vrot.slane %v776_v53, 1  ;;  %s2461_s19 = sshll.u32 %s2576_s3, 4  ;;  %s2462_s19 = int_to_ptr.vmem [resolvable:$false] %s2461_s19 }
 0x1f0   : > { %v1388_v60 = vsel %vm1386_vm6, %v1371_v55, %v3427_v62  ;;  %v1266_v55 = vrot.slane %v740_v25, 1  ;;  %s2463_s21 = scalar_lea.vmem %s2462_s19, 2048  ;;  %p2464_p5 = scmp.lt.s32.totalorder %s3847_s13, %s2462_s19 }
 0x1f1   : > { %v1287_v16 = vpop.permute.xlu1 %1286  ;;  %v1271_v21 = vpop.permute.xlu0 %1270  ;;  %p2465_p2 = scmp.lt.s32.totalorder %s2463_s21, %s2457_s14 }
 0x1f2   : > { %v1446_v17 = vsel %vm1437_vm9, %v1429_v1, %v1287_v16  ;;  %v1438_v42 = vsel %vm1437_vm9, %v1421_v19, %v1271_v21  ;;  %v4007_v1 = vld [vmem:[#allocation40_spill] sm:$0xff] }
 0x1f3   : > { %1002 = vrot.lane.b32.xlu1 %v3572_v0, %s2570_s24  ;;  %2034 = vmatprep.mubr.msk.f32.mxu1 %vm1466_vm10, %v1446_v17  ;;  %v1117_v17 = vsel %vm874_vm0, %v1114_v11, %v1116_v56  ;;  %p2466_p13 = por %p2465_p2, %p2464_p5 }
 0x1f4   : > { %986 = vrot.lane.b32.xlu0 %v3577_v58, %s2570_s24  ;;  %2022 = vmatprep.mubr.msk.f32.mxu0 %vm1466_vm10, %v1438_v42  ;;  %v4008_v58 = vld [vmem:[#allocation46_spill] sm:$0xff] }
 0x1f5   : > { %v834_v18 = vpop.permute.xlu1 %833  ;;  %v818_v33 = vpop.permute.xlu0 %817  ;;  %p2467_p7 = pnand %p2466_p13, %p2460_p6 }
 0x1f6   : > { %v1331_v0 = vsel %vm1318_vm2, %v4006_v57, %v834_v18  ;;  %v4009_v18 = vld [vmem:[#allocation38_spill] sm:$0xff] }
 0x1f7   : > { %1064 = vrot.lane.b32.xlu1 %v791_v27, %s2571_s22 }
 0x1f8   : > { %1048 = vrot.lane.b32.xlu0 %v783_v43, %s2571_s22 }
 0x1f9   : > { %v1059_v29 = vpop.permute.xlu1 %1058  ;;  %v1043_v39 = vpop.permute.xlu0 %1042 }
 0x1fa   : > { %v3606_v37 = vsel %vm1369_vm5, %v1364_v9, %v1059_v29  ;;  %v3609_v32 = vsel %vm1369_vm5, %v1356_v36, %v1043_v39  ;;  %v4013_v36 = vld [vmem:[#allocation42_spill] sm:$0xff] }
 0x1fb   : > { %1243 = vrot.lane.b32.xlu1 %v3438_v31, %s2574_s1  ;;  %v1396_v31 = vsel %vm1386_vm6, %v1379_v54, %v3425_v59 }
 0x1fc   : > { %1227 = vrot.lane.b32.xlu0 %v3441_v34, %s2574_s1  ;;  %v1413_v61 = vsel %vm1403_vm7, %v1396_v31, %v3491_v51  ;;  %v1405_v34 = vsel %vm1403_vm7, %v1388_v60, %v3493_v50  ;;  %v4014_v31 = vld [vmem:[#allocation35_spill] sm:$0xff]  ;;  %v759_v60 = vld [vmem:[%s593_s29 + $0x8] sm:$0xff] }
 0x1fd   : > { %v3629_v48 = vpop.permute.xlu1 %1138  ;;  %v3631_v3 = vpop.permute.xlu0 %1122  ;;  %v1430_v59 = vsel %vm1420_vm8, %v1413_v61, %v1236_v24  ;;  %v1422_v62 = vsel %vm1420_vm8, %v1405_v34, %v1220_v40 }
 0x1ff   : > { %1294 = vrot.lane.b32.xlu1 %v3462_v46, %s2575_s16 }
 0x200   : > { %1278 = vrot.lane.b32.xlu0 %v3467_v47, %s2575_s16  ;;  %v4004_v47 = vrot.slane %v3450_v38, 1  ;;  %v1323_v38 = vsel %vm1318_vm2, %v4007_v1, %v818_v33  ;;  %v4010_v33 = vrot.slane %v4009_v18, 1  ;;  %v1389_v1 = vsel %vm1386_vm6, %v3535_v10, %v3631_v3 }
 0x201   : > { %v1289_v46 = vpop.permute.xlu1 %1288  ;;  %v1273_v7 = vpop.permute.xlu0 %1272 }
 0x202   : > { %v1447_v51 = vsel %vm1437_vm9, %v1430_v59, %v1289_v46  ;;  %v1439_v50 = vsel %vm1437_vm9, %v1422_v62, %v1273_v7  ;;  %v1115_v24 = vsel %vm874_vm0, %v4004_v47, %v1114_v11  ;;  %v1101_v43 = vsel %vm874_vm0, %v1098_v20, %v4010_v33  ;;  %v741_v11 = vld [vmem:[%s3055_s30 + $0x10] sm:$0xff]  ;;  %v4017_v7 = vld [vmem:[#allocation36_spill] sm:$0xff] }
 0x203   : > { %1066 = vrot.lane.b32.xlu1 %v792_v15, %s2571_s22  ;;  %2035 = vmatmul.mubr.msk.f32.vlgmr.msra.gmra.mrb[0].mxu1 %vm1466_vm10, %v1447_v51  ;;  %v4016_v15 = vrot.slane %v4011_v26, 1  ;;  %v1268_v62 = vrot.slane %v741_v11, 1 }
 0x204   : > { %1050 = vrot.lane.b32.xlu0 %v784_v23, %s2571_s22  ;;  %2023 = vmatmul.mubr.msk.f32.vlgmr.msra.gmra.mrb[0].mxu0 %vm1466_vm10, %v1439_v50 }
 0x205   : > { %v836_v40 = vpop.permute.xlu1 %835  ;;  %v820_v45 = vpop.permute.xlu0 %819  ;;  %v1267_v59 = vsel %vm874_vm0, %v4016_v15, %v1266_v55  ;;  %v1269_v23 = vsel %vm874_vm0, %v1266_v55, %v1268_v62 }
 0x206   : > { %v1332_v9 = vsel %vm1318_vm2, %v4012_v12, %v836_v40  ;;  %v1324_v29 = vsel %vm1318_vm2, %v4013_v36, %v820_v45  ;;  %v4018_v40 = vld [vmem:[#allocation37_spill] sm:$0xff] }
 0x207   : > { %1146 = vrot.lane.b32.xlu1 %v1115_v24, %s2572_s15 }
 0x208   : > { %1130 = vrot.lane.b32.xlu0 %v1099_v52, %s2572_s15 }
 0x209   : > { %v933_v19 = vpop.permute.xlu1 %932  ;;  %v917_v16 = vpop.permute.xlu0 %916 }
 0x20a   : > { %v1348_v28 = vsel %vm1335_vm3, %v1331_v0, %v933_v19  ;;  %v1340_v21 = vsel %vm1335_vm3, %v1323_v38, %v917_v16  ;;  %v1397_v0 = vsel %vm1386_vm6, %v3532_v13, %v3629_v48 }
 0x20b   : > { %1296 = vrot.lane.b32.xlu1 %v3502_v22, %s2575_s16 }
 0x20c   : > { %1280 = vrot.lane.b32.xlu0 %v4008_v58, %s2575_s16 }
 0x20d   : > { %v3682_v42 = vpop.permute.xlu1 %1140  ;;  %v3684_v27 = vpop.permute.xlu0 %1124 }
 0x20f   : > { %1148 = vrot.lane.b32.xlu1 %v1117_v17, %s2572_s15 }
 0x210   : > { %1132 = vrot.lane.b32.xlu0 %v1101_v43, %s2572_s15 }
 0x211   : > { %v1188_v35 = vpop.permute.xlu1 %1187  ;;  %v1172_v22 = vpop.permute.xlu0 %1171 }
 0x212   : > { %v1414_v38 = vsel %vm1403_vm7, %v1397_v0, %v1188_v35  ;;  %v1406_v19 = vsel %vm1403_vm7, %v1389_v1, %v1172_v22 }
 0x213   : > { %1195 = vrot.lane.b32.xlu1 %v4011_v26, %s2573_s12  ;;  %v1398_v26 = vsel %vm1386_vm6, %v3606_v37, %v3682_v42  ;;  %v4019_v42 = vld [vmem:[#allocation43_spill] sm:$0xff] }
 0x214   : > { %1179 = vrot.lane.b32.xlu0 %v3092_v4, %s2573_s12  ;;  %v758_v4 = vld [vmem:[%s593_s29] sm:$0xff]  ;;  %s3845_s29 = scalar_lea.hbm %s4023_s26, %s1990_s11 }
 0x215   : > { %v935_v39 = vpop.permute.xlu1 %934  ;;  %v919_v2 = vpop.permute.xlu0 %918 }
 0x216   : > { %v1349_v14 = vsel %vm1335_vm3, %v1332_v9, %v935_v39  ;;  %v1341_v6 = vsel %vm1335_vm3, %v1324_v29, %v919_v2 }
 0x217   : > { %1197 = vrot.lane.b32.xlu1 %v740_v25, %s2573_s12  ;;  %v1390_v25 = vsel %vm1386_vm6, %v3609_v32, %v3684_v27 }
 0x218   : > { %1181 = vrot.lane.b32.xlu0 %v3095_v5, %s2573_s12  ;;  %v4015_v5 = vld [vmem:[#allocation34_spill] sm:$0xff] }
 0x219   : > { %v997_v41 = vpop.permute.xlu1 %996  ;;  %v981_v8 = vpop.permute.xlu0 %980 }
 0x21a   : > { %v1365_v44 = vsel %vm1352_vm4, %v1348_v28, %v997_v41  ;;  %v1357_v54 = vsel %vm1352_vm4, %v1340_v21, %v981_v8 }
 0x21b   : > { %1245 = vrot.lane.b32.xlu1 %v758_v4, %s2574_s1  ;;  %v4020_v4 = vld [vmem:[#allocation44_spill] sm:$0xff] }
 0x21c   : > { %1229 = vrot.lane.b32.xlu0 %v4014_v31, %s2574_s1 }
 0x21d   : > { %v1190_v61 = vpop.permute.xlu1 %1189  ;;  %v1174_v34 = vpop.permute.xlu0 %1173 }
 0x21e   : > { %v1415_v12 = vsel %vm1403_vm7, %v1398_v26, %v1190_v61  ;;  %v1407_v9 = vsel %vm1403_vm7, %v1390_v25, %v1174_v34 }
 0x21f   : > { %1247 = vrot.lane.b32.xlu1 %v759_v60, %s2574_s1 }
 0x220   : > { %1231 = vrot.lane.b32.xlu0 %v4015_v5, %s2574_s1 }
 0x221   : > { %v1238_v20 = vpop.permute.xlu1 %1237  ;;  %v1222_v46 = vpop.permute.xlu0 %1221 }
 0x222   : > { %v1431_v16 = vsel %vm1420_vm8, %v1414_v38, %v1238_v20  ;;  %v1423_v28 = vsel %vm1420_vm8, %v1406_v19, %v1222_v46 }
 0x223   : > { %1298 = vrot.lane.b32.xlu1 %v1267_v59, %s2575_s16 }
 0x224   : > { %1282 = vrot.lane.b32.xlu0 %v4017_v7, %s2575_s16 }
 0x225   : > { %v999_v51 = vpop.permute.xlu1 %998  ;;  %v983_v50 = vpop.permute.xlu0 %982 }
 0x226   : > { %v1366_v47 = vsel %vm1352_vm4, %v1349_v14, %v999_v51  ;;  %v1358_v24 = vsel %vm1352_vm4, %v1341_v6, %v983_v50 }
 0x227   : > { %1300 = vrot.lane.b32.xlu1 %v1269_v23, %s2575_s16 }
 0x228   : > { %1284 = vrot.lane.b32.xlu0 %v4018_v40, %s2575_s16 }
 0x229   : > { %v1061_v45 = vpop.permute.xlu1 %1060  ;;  %v1045_v49 = vpop.permute.xlu0 %1044 }
 0x22a   : > { %v3731_v52 = vsel %vm1369_vm5, %v1365_v44, %v1061_v45  ;;  %v3734_v53 = vsel %vm1369_vm5, %v1357_v54, %v1045_v49 }
 0x22d   : > { %v1240_v56 = vpop.permute.xlu1 %1239  ;;  %v1224_v57 = vpop.permute.xlu0 %1223 }
 0x22e   : > { %v1432_v36 = vsel %vm1420_vm8, %v1415_v12, %v1240_v56  ;;  %v1424_v29 = vsel %vm1420_vm8, %v1407_v9, %v1224_v57 }
 0x231   : > { %v1291_v21 = vpop.permute.xlu1 %1290  ;;  %v1275_v58 = vpop.permute.xlu0 %1274 }
 0x232   : > { %v1448_v17 = vsel %vm1437_vm9, %v1431_v16, %v1291_v21  ;;  %v1440_v18 = vsel %vm1437_vm9, %v1423_v28, %v1275_v58 }
 0x233   : > { %2025 = vmatprep.mubr.msk.f32.mxu0 %vm1466_vm10, %v1440_v18  ;;  %2037 = vmatprep.mubr.msk.f32.mxu1 %vm1466_vm10, %v1448_v17 }
 0x235   : > { %v838_v13 = vpop.permute.xlu1 %837  ;;  %v822_v10 = vpop.permute.xlu0 %821 }
 0x236   : > { %v1333_v27 = vsel %vm1318_vm2, %v4019_v42, %v838_v13  ;;  %v1325_v41 = vsel %vm1318_vm2, %v4020_v4, %v822_v10 }
 0x239   : > { %v1063_v48 = vpop.permute.xlu1 %1062  ;;  %v1047_v3 = vpop.permute.xlu0 %1046 }
 0x23a   : > { %v1383_v33 = vsel %vm1369_vm5, %v1366_v47, %v1063_v48  ;;  %v1375_v43 = vsel %vm1369_vm5, %v1358_v24, %v1047_v3 }
 0x23d   : > { %v1143_v35 = vpop.permute.xlu1 %1142  ;;  %v1127_v22 = vpop.permute.xlu0 %1126 }
 0x23e   : > { %v1399_v45 = vsel %vm1386_vm6, %v3731_v52, %v1143_v35  ;;  %v1391_v49 = vsel %vm1386_vm6, %v3734_v53, %v1127_v22 }
 0x241   : > { %v1293_v39 = vpop.permute.xlu1 %1292  ;;  %v1277_v2 = vpop.permute.xlu0 %1276 }
 0x242   : > { %v1449_v14 = vsel %vm1437_vm9, %v1432_v36, %v1293_v39  ;;  %v1441_v6 = vsel %vm1437_vm9, %v1424_v29, %v1277_v2 }
 0x243   : > { %2026 = vmatmul.mubr.msk.f32.gmra.mrb[2].mxu0 %vm1466_vm10, %v1441_v6  ;;  %2038 = vmatmul.mubr.msk.f32.gmra.mrb[2].mxu1 %vm1466_vm10, %v1449_v14 }
 0x245   : > { %v3766_v37 = vpop.permute.xlu1 %839  ;;  %v3768_v32 = vpop.permute.xlu0 %823 }
 0x249   : > { %v937_v8 = vpop.permute.xlu1 %936  ;;  %v921_v44 = vpop.permute.xlu0 %920 }
 0x24a   : > { %v1350_v54 = vsel %vm1335_vm3, %v1333_v27, %v937_v8  ;;  %v1342_v55 = vsel %vm1335_vm3, %v1325_v41, %v921_v44  ;;  %v1334_v41 = vsel %vm1318_vm2, %v3430_v63, %v3766_v37 }
 0x24d   : > { %v1145_v31 = vpop.permute.xlu1 %1144  ;;  %v1129_v60 = vpop.permute.xlu0 %1128 }
 0x24e   : > { %v1400_v17 = vsel %vm1386_vm6, %v1383_v33, %v1145_v31  ;;  %v1392_v18 = vsel %vm1386_vm6, %v1375_v43, %v1129_v60  ;;  %v1326_v31 = vsel %vm1318_vm2, %v3433_v30, %v3768_v32 }
 0x251   : > { %v1192_v61 = vpop.permute.xlu1 %1191  ;;  %v1176_v34 = vpop.permute.xlu0 %1175 }
 0x252   : > { %v1416_v56 = vsel %vm1403_vm7, %v1399_v45, %v1192_v61  ;;  %v1408_v57 = vsel %vm1403_vm7, %v1391_v49, %v1176_v34 }
 0x255   : > { %v939_v11 = vpop.permute.xlu1 %938  ;;  %v923_v5 = vpop.permute.xlu0 %922 }
 0x256   : > { %v1343_v61 = vsel %vm1335_vm3, %v1326_v31, %v923_v5 }
 0x259   : > { %v1001_v15 = vpop.permute.xlu1 %1000  ;;  %v985_v59 = vpop.permute.xlu0 %984 }
 0x25a   : > { %v1367_v14 = vsel %vm1352_vm4, %v1350_v54, %v1001_v15  ;;  %v1359_v42 = vsel %vm1352_vm4, %v1342_v55, %v985_v59  ;;  %v1351_v54 = vsel %vm1335_vm3, %v1334_v41, %v939_v11 }
 0x25d   : > { %v1194_v62 = vpop.permute.xlu1 %1193  ;;  %v1178_v20 = vpop.permute.xlu0 %1177 }
 0x25e   : > { %v1417_v13 = vsel %vm1403_vm7, %v1400_v17, %v1194_v62  ;;  %v1409_v10 = vsel %vm1403_vm7, %v1392_v18, %v1178_v20 }
 0x261   : > { %v1242_v46 = vpop.permute.xlu1 %1241  ;;  %v1226_v7 = vpop.permute.xlu0 %1225 }
 0x262   : > { %v1433_v0 = vsel %vm1420_vm8, %v1416_v56, %v1242_v46  ;;  %v1425_v38 = vsel %vm1420_vm8, %v1408_v57, %v1226_v7  ;;  %v1967_v56 = vld [vmem:[#allocation16] ss:$0 sm:$0xff] }
 0x265   : > { %v1003_v23 = vpop.permute.xlu1 %1002 }
 0x266   : > { %v987_v51 = vpop.permute.xlu0 %986  ;;  %v1368_v34 = vsel %vm1352_vm4, %v1351_v54, %v1003_v23 }
 0x267   : > { %v1360_v59 = vsel %vm1352_vm4, %v1343_v61, %v987_v51 }
 0x269   : > { %v1065_v50 = vpop.permute.xlu1 %1064 }
 0x26a   : > { %v1049_v47 = vpop.permute.xlu0 %1048  ;;  %v1384_v27 = vsel %vm1369_vm5, %v1367_v14, %v1065_v50 }
 0x26b   : > { %v1376_v8 = vsel %vm1369_vm5, %v1359_v42, %v1049_v47 }
 0x26d   : > { %v1244_v24 = vpop.permute.xlu1 %1243 }
 0x26e   : > { %v1228_v40 = vpop.permute.xlu0 %1227  ;;  %v1434_v48 = vsel %vm1420_vm8, %v1417_v13, %v1244_v24 }
 0x26f   : > { %v1426_v35 = vsel %vm1420_vm8, %v1409_v10, %v1228_v40 }
 0x271   : > { %v1295_v1 = vpop.permute.xlu1 %1294 }
 0x272   : > { %v1450_v19 = vsel %vm1437_vm9, %v1433_v0, %v1295_v1  ;;  %v1279_v16 = vpop.permute.xlu0 %1278 }
 0x273   : > { %v1442_v28 = vsel %vm1437_vm9, %v1425_v38, %v1279_v16  ;;  %2040 = vmatprep.mubr.msk.f32.mxu1 %vm1466_vm10, %v1450_v19 }
 0x274   : > { %2028 = vmatprep.mubr.msk.f32.mxu0 %vm1466_vm10, %v1442_v28 }
 0x275   : > { %v1067_v52 = vpop.permute.xlu1 %1066 }
 0x276   : > { %v1051_v53 = vpop.permute.xlu0 %1050  ;;  %v1385_v62 = vsel %vm1369_vm5, %v1368_v34, %v1067_v52 }
 0x277   : > { %v1377_v20 = vsel %vm1369_vm5, %v1360_v59, %v1051_v53 }
 0x279   : > { %v1147_v21 = vpop.permute.xlu1 %1146 }
 0x27a   : > { %v1131_v58 = vpop.permute.xlu0 %1130  ;;  %v1401_v44 = vsel %vm1386_vm6, %v1384_v27, %v1147_v21 }
 0x27b   : > { %v1393_v60 = vsel %vm1386_vm6, %v1376_v8, %v1131_v58 }
 0x27d   : > { %v1297_v3 = vpop.permute.xlu1 %1296 }
 0x27e   : > { %v1451_v22 = vsel %vm1437_vm9, %v1434_v48, %v1297_v3  ;;  %v1281_v26 = vpop.permute.xlu0 %1280 }
 0x27f   : > { %v1443_v25 = vsel %vm1437_vm9, %v1426_v35, %v1281_v26  ;;  %2041 = vmatmul.mubr.msk.f32.gmra.mrb[4].mxu1 %vm1466_vm10, %v1451_v22 }
 0x280   : > { %2029 = vmatmul.mubr.msk.f32.gmra.mrb[4].mxu0 %vm1466_vm10, %v1443_v25 }
 0x281   : > { %v1149_v33 = vpop.permute.xlu1 %1148 }
 0x282   : > { %v1133_v43 = vpop.permute.xlu0 %1132  ;;  %v1402_v5 = vsel %vm1386_vm6, %v1385_v62, %v1149_v33 }
 0x283   : > { %v1394_v7 = vsel %vm1386_vm6, %v1377_v20, %v1133_v43 }
 0x285   : > { %v1196_v12 = vpop.permute.xlu1 %1195 }
 0x286   : > { %v1180_v9 = vpop.permute.xlu0 %1179  ;;  %v1418_v55 = vsel %vm1403_vm7, %v1401_v44, %v1196_v12 }
 0x287   : > { %v1410_v63 = vsel %vm1403_vm7, %v1393_v60, %v1180_v9 }
 0x289   : > { %v1198_v36 = vpop.permute.xlu1 %1197 }
 0x28a   : > { %v1182_v29 = vpop.permute.xlu0 %1181  ;;  %v1419_v23 = vsel %vm1403_vm7, %v1402_v5, %v1198_v36 }
 0x28b   : > { %v1411_v51 = vsel %vm1403_vm7, %v1394_v7, %v1182_v29 }
 0x28d   : > { %v1246_v39 = vpop.permute.xlu1 %1245 }
 0x28e   : > { %v1230_v2 = vpop.permute.xlu0 %1229  ;;  %v1435_v37 = vsel %vm1420_vm8, %v1418_v55, %v1246_v39 }
 0x28f   : > { %v1427_v30 = vsel %vm1420_vm8, %v1410_v63, %v1230_v2 }
 0x291   : > { %v1248_v6 = vpop.permute.xlu1 %1247 }
 0x292   : > { %v1232_v4 = vpop.permute.xlu0 %1231  ;;  %v1436_v50 = vsel %vm1420_vm8, %v1419_v23, %v1248_v6 }
 0x293   : > { %v1428_v24 = vsel %vm1420_vm8, %v1411_v51, %v1232_v4 }
 0x295   : > { %v1299_v15 = vpop.permute.xlu1 %1298 }
 0x296   : > { %v1452_v32 = vsel %vm1437_vm9, %v1435_v37, %v1299_v15  ;;  %v1283_v11 = vpop.permute.xlu0 %1282 }
 0x297   : > { %v1444_v46 = vsel %vm1437_vm9, %v1427_v30, %v1283_v11  ;;  %2043 = vmatprep.mubr.msk.f32.mxu1 %vm1466_vm10, %v1452_v32 }
 0x298   : > { %2031 = vmatprep.mubr.msk.f32.mxu0 %vm1466_vm10, %v1444_v46 }
 0x299   : > { %v1301_v47 = vpop.permute.xlu1 %1300 }
 0x29a   : > { %v1453_v40 = vsel %vm1437_vm9, %v1436_v50, %v1301_v47  ;;  %v1285_v45 = vpop.permute.xlu0 %1284 }
 0x29b   : > { %v1445_v49 = vsel %vm1437_vm9, %v1428_v24, %v1285_v45  ;;  %2044 = vmatmul.mubr.msk.f32.gmra.mrb[6].mxu1 %vm1466_vm10, %v1453_v40 }
 0x29c   : > { %2032 = vmatmul.mubr.msk.f32.gmra.mrb[6].mxu0 %vm1466_vm10, %v1445_v49 }
 0x2d6   : > { %v2036_v57 = vpop.f32.mrb[0].mxu1 }
 0x2d7   : > { %v2024_v0 = vpop.f32.mrb[0].mxu0  ;;  %v1621_v1 = vpop.f32.mrb[1].mxu1 }
 0x2d8   : > { %v1585_v38 = vpop.f32.mrb[1].mxu0  ;;  %v1622_v19 = vadd.f32 %v1967_v56, %v1621_v1 }
 0x2d9   : > { %v1586_v16 = vadd.f32 %v1967_v56, %v1585_v38 }
 0x2da   : > { %1660 = vst.msk [vmem:[%s692_s18 + $0x20] sm:$0xff] %vm1318_vm2, %v1622_v19 }
 0x2db   : > { %1656 = vst.msk [vmem:[%s692_s18] sm:$0xff] %vm1318_vm2, %v1586_v16 }
 0x316   : > { %v2027_v28 = vpop.f32.mrb[2].mxu0  ;;  %v2039_v52 = vpop.f32.mrb[2].mxu1 }
 0x317   : > { %v1594_v53 = vpop.f32.mrb[3].mxu0  ;;  %v1630_v21 = vpop.f32.mrb[3].mxu1 }
 0x318   : > { %v1595_v58 = vadd.f32 %v1967_v56, %v1594_v53  ;;  %v1631_v17 = vadd.f32 %v1967_v56, %v1630_v21 }
 0x31a   : > { %1657 = vst.msk [vmem:[%s692_s18 + $0x8] sm:$0xff] %vm1318_vm2, %v1595_v58  ;;  %1661 = vst.msk [vmem:[%s692_s18 + $0x28] sm:$0xff] %vm1318_vm2, %v1631_v17 }
 0x352   : > { %v2042_v18 = vpop.f32.mrb[4].mxu1 }
 0x353   : > { %v2030_v13 = vpop.f32.mrb[4].mxu0  ;;  %v1639_v10 = vpop.f32.mrb[5].mxu1 }
 0x354   : > { %v1603_v48 = vpop.f32.mrb[5].mxu0  ;;  %v1640_v3 = vadd.f32 %v1967_v56, %v1639_v10 }
 0x355   : > { %v1604_v35 = vadd.f32 %v1967_v56, %v1603_v48 }
 0x356   : > { %1662 = vst.msk [vmem:[%s692_s18 + $0x30] sm:$0xff] %vm1318_vm2, %v1640_v3 }
 0x357   : > { %1658 = vst.msk [vmem:[%s692_s18 + $0x10] sm:$0xff] %vm1318_vm2, %v1604_v35 }
 0x36e   : > { %v2045_v22 = vpop.f32.mrb[6].mxu1 }
 0x36f   : > { %v2033_v26 = vpop.f32.mrb[6].mxu0  ;;  %v1648_v25 = vpop.f32.mrb[7].mxu1 }
 0x370   : > { %v1612_v33 = vpop.f32.mrb[7].mxu0  ;;  %v1649_v43 = vadd.f32 %v1967_v56, %v1648_v25 }
 0x371   : > { %v1613_v12 = vadd.f32 %v1967_v56, %v1612_v33 }
 0x372   : > { %1663 = vst.msk [vmem:[%s692_s18 + $0x38] sm:$0xff] %vm1318_vm2, %v1649_v43 }
 0x373   : > { %1659 = vst.msk [vmem:[%s692_s18 + $0x18] sm:$0xff] %vm1318_vm2, %v1613_v12 }
 0x374   : > { %2470 = shalt.err (!%p2467_p7)
}
 0x375   : > { %s2471_s24 = scalar_lea.hbm %s3845_s29, 1024  ;;  %s2475_s12 = scalar_lea.hbm %s4023_s26, 2048 }
 0x376   : > { %p2472_p1 = scmp.ne.s32.totalorder %s3845_s29, %s2471_s24  ;;  %p2476_p10 = scmp.lt.u32.totalorder %s3845_s29, %s4023_s26 }
 0x377   : > { %p2477_p9 = scmp.lt.u32.totalorder %s2475_s12, %s2471_s24  ;;  %p2479_p4 = scmp.lt.u32.totalorder %s2471_s24, %s3845_s29 }
 0x378   : > { %p2473_p0 = pnand %p2472_p1, %p4024_p12 }
 0x379   : > { %p2478_p3 = por %p2477_p9, %p2476_p10 }
 0x37a   : > { %p2474_p8 = pneg %p2473_p0 }
 0x37b   : > { %p2480_p11 = por %p2479_p4, %p2478_p3 }
 0x37d   : > { %p2481_p6 = pnand %p2480_p11, %p2474_p8 }
 0x37f   : > { %2484 = shalt.err (!%p2481_p6)
}
 0x380   : > { %s2577_s9 = smov 128  }
 0x381   : > { %2086 = dma.vmem_to_hbm [thread:$0]  (%p4024_p12), %s3847_s13, 1024, %s3845_s29, %s1665_s23, %s2577_s9, %s2577_s9, %s2569_s28  }
 0x382 PF: > { %s4025_s18 = sld [smem:[#allocation24_spill]]  ;;  %s4026_s20 = sld [smem:[#allocation33_spill]] }
 0x383   : > { %s4027_s11 = sld [smem:[#allocation28_spill]] }
 0x388   : > { %s1695_s30 = sand.u32 1, %s4025_s18   ;;  %p4028_p5 = scmp.ne.s32.totalorder %s4026_s20, 0 }
 0x389   : > { %p4029_p2 = scmp.ge.s32.totalorder %s4027_s11, 2  ;;  %s1696_s17 = scalar_lea.sflag [#allocation4], %s1695_s30 }
 0x38b   : > { %p2118_p13 = pnand %p4029_p2, %p4028_p5 }
 0x38d   : > { %2530 = dma.done.wait (!%p2118_p13), %s1696_s17, 1024  }
 0x38e   : > { %2532 = vsyncadd (!%p2118_p13), %s1696_s17, 4294966272  ;;  %s35_s14 = sadd.s32 1, %s4027_s11   ;;  %s4030_s25 = sld [smem:[#allocation25_spill]] }
 0x38f   : > { %p32_p7 = scmp.ge.s32.totalorder %s35_s14, 4   ;;  %s4031_s11 = sld [smem:[#allocation32_spill]] }
 0x390   : > { %s4032_s12 = sld [smem:[#allocation27_spill]]  ;;  %s4033_s13 = sld [smem:[#allocation30_spill]] }
 0x391   : > { %s4034_s30 = smov %s2539_s10  ;;  %34 = sbr.rel (!%p32_p7) target bundleno = 17 (0x11), region = 181 }
 0x394   : > { %s4035_s10 = smov %s4030_s25 }
 0x398   :  { %1701 = vsyncpa [#allocation3], 1 }
 0x399   :  { %1703 = vsyncpa [#allocation3 + $0x1], 1 }
 0x39a   :  { %1704 = vsyncpa [#allocation6], 1 }
 0x39b   :  { %1706 = vsyncpa [#allocation6 + $0x1], 1 }
 0x39c   :  { %1707 = vsyncpa [#allocation9], 1 }
 0x39d   :  { %1709 = vsyncpa [#allocation9 + $0x1], 1 }
 0x39e   :  { %1710 = vsyncpa [#allocation12], 1 }
 0x39f   :  { %1712 = vsyncpa [#allocation12 + $0x1], 1 }
 0x3a0   :  { %1713 = vsyncpa [#allocation15], 1 }
 0x3a1   :  { %1714 = vsyncpa [#allocation4], 1 }
 0x3a2   :  { %1716 = vsyncpa [#allocation4 + $0x1], 1 }

// kernel: tpu_custom_call.1
= control target key start
LH: loop header
LB: loop body
LE: loop exit
PB: predicated region body
PF: predicated region fallthrough
CT: control target
= control target key end

     0   :  { %s3899_s0 = inlined_call_operand.hbm [shape: f32[2,160,4], index: 0, kind: input, shape index: {}]   ;;  %s3900_s1 = inlined_call_operand.hbm [shape: f32[2,160,4], index: 1, kind: input, shape index: {}]   ;;  %s3901_s2 = inlined_call_operand.hbm [shape: f32[2,160,4], index: 2, kind: input, shape index: {}]   ;;  %s3902_s3 = inlined_call_operand.hbm [shape: f32[2,160,4], index: 3, kind: input, shape index: {}]   ;;  %s3903_s4 = inlined_call_operand.hbm [shape: f32[2,160,4], index: 4, kind: input, shape index: {}]   ;;  %s3904_s5 = inlined_call_operand.hbm [shape: f32[2,160,4], index: 5, kind: input, shape index: {}]   ;;  %s3905_s6 = inlined_call_operand.hbm [shape: f32[2,160,4], index: 6, kind: input, shape index: {}]   ;;  %s3906_s7 = inlined_call_operand.hbm [shape: f32[36,4], index: 7, kind: input, shape index: {}]   ;;  %s3907_s8 = inlined_call_operand.hbm [shape: f32[1,4], index: 8, kind: input, shape index: {}]   ;;  %s3908_s9 = inlined_call_operand.hbm [shape: f32[2,8,8,4], index: 9, kind: output, shape index: {}]  }
   0x1   :  { %3954 = sst [smem:[#allocation47_spill]] %s3900_s1 }
   0x2   :  { %3955 = sst [smem:[#allocation48_spill]] %s3902_s3 }
   0x3   :  { %3956 = sst [smem:[#allocation49_spill]] %s3908_s9 }
   0x4   :  { %14 = vsyncpa [#allocation3], 0 }
   0x5   :  { %16 = vsyncpa [#allocation3 + $0x1], 0 }
   0x6   :  { %17 = vsyncpa [#allocation6], 0 }
   0x7   :  { %19 = vsyncpa [#allocation6 + $0x1], 0 }
   0x8   :  { %20 = vsyncpa [#allocation9], 0 }
   0x9   :  { %22 = vsyncpa [#allocation9 + $0x1], 0 }
   0xa   :  { %23 = vsyncpa [#allocation12], 0 }
   0xb   :  { %25 = vsyncpa [#allocation12 + $0x1], 0 }
   0xc   :  { %26 = vsyncpa [#allocation15], 0 }
   0xd   :  { %27 = vsyncpa [#allocation4], 0 }
   0xe   :  { %29 = vsyncpa [#allocation4 + $0x1], 0  ;;  %s2628_s30 = smov 0   ;;  %s2630_s10 = smov 0  }
   0xf   :  { %s2632_s11 = smov 0   ;;  %s2634_s12 = smov 0  }
  0x10   :  { %s2636_s13 = smov 0   ;;  %s2638_s14 = smov 0  }
  0x11 LB: > { %3957 = sst [smem:[#allocation24_spill]] %s2535_s30  ;;  %s2659_s15 = sadd.s32 4294967295, %s2555_s14   ;;  %s2555_s14 = sphi %s2638_s14, %s35_s14   ;;  %s2551_s13 = sphi %s2636_s13, %s4033_s13   ;;  %s2547_s12 = sphi %s2634_s12, %s4032_s12   ;;  %s2543_s11 = sphi %s2632_s11, %s4031_s11   ;;  %s2539_s10 = sphi %s2630_s10, %s4035_s10   ;;  %s2535_s30 = sphi %s2628_s30, %s4034_s30  }
  0x12   : > { %3958 = sst [smem:[#allocation25_spill]] %s2543_s11  ;;  %s1937_s16 = sadd.s32 4294967294, %s2555_s14  }
  0x13   : > { %3959 = sst [smem:[#allocation26_spill]] %s2547_s12  ;;  %s47_s17 = sadd.s32 1, %s2551_s13 }
  0x14   : > { %3960 = sst [smem:[#allocation27_spill]] %s2551_s13  ;;  %s56_s18 = sadd.s32 1, %s2543_s11 }
  0x15   : > { %3961 = sst [smem:[#allocation28_spill]] %s2555_s14  ;;  %p49_p0 = scmp.ge.s32.totalorder %s47_s17, 2 }
  0x16   : > { %3962 = sst [smem:[#allocation29_spill]] %s2659_s15  ;;  %p63_p1 = scmp.ne.s32.totalorder %s2543_s11, %s2539_s10 }
  0x17   : > { %p64_p2 = scmp.eq.s32.totalorder %s2555_s14, 0  ;;  %p69_p3 = scmp.ne.s32.totalorder %s2539_s10, %s2535_s30 }
  0x18   : > { %s4037_s17 = smov (%p49_p0, %s47_s17), 0  ;;  %p3913_p5 = scmp.eq.s32.totalorder %s2659_s15, 0 }
  0x19   : > { %3963 = sst [smem:[#allocation30_spill]] %s4037_s17  ;;  %p2671_p4 = por %p64_p2, %p63_p1 }
  0x1a   : > { %s51_s20 = ssub.s32 %s2551_s13, %s4037_s17  ;;  %p317_p6 = scmp.eq.s32.totalorder %s2659_s15, 1 }
  0x1b   : > { %p54_p7 = scmp.eq.s32.totalorder %s51_s20, 0  ;;  %p2681_p8 = por %p3913_p5, %p69_p3 }
  0x1c   : > { %p2685_p9 = por %p317_p6, %p63_p1  ;;  %p323_p10 = scmp.eq.s32.totalorder %s1937_s16, 1 }
  0x1d   : > { %s3965_s21 = scalar_select %p2681_p8, 1, 0 }
  0x1e   : > { %s3966_s22 = scalar_select %p2685_p9, 1, 0 }
  0x1f   : > { %s2690_s23 = scalar_select %p54_p7, %s2543_s11, %s56_s18  }
  0x20   : > { %3967 = sst [smem:[#allocation31_spill]] %s3966_s22  ;;  %p2692_p11 = por %p323_p10, %p69_p3 }
  0x21   : > { %3968 = sst [smem:[#allocation32_spill]] %s2690_s23  ;;  %p1938_p12 = scmp.ge.s32.totalorder %s2555_s14, 1 }
  0x22   : > { %s3969_s24 = scalar_select %p2692_p11, 1, 0 }
  0x23   : > { %p330_p13 = scmp.lt.s32.totalorder %s2555_s14, 3  ;;  %s2557_s26 = smov [#allocation14]  }
  0x24   : > { %3970 = sst [smem:[#allocation33_spill]] %s3969_s24  ;;  %s342_s27 = sshll.u32 %s2557_s26, 4  ;;  %s2702_s27 = int_to_ptr.vmem [resolvable:$true] %s342_s27 }
  0x25   : > { %p2698_p0 = pnand %p1938_p12, %p330_p13  ;;  %p2123_p6 = scmp.lt.s32.totalorder %s2555_s14, 2 }
  0x26   : > { %s2709_s28 = smul.u32 2560, %s2551_s13  ;;  %s2718_s16 = sand.u32 1, %s2543_s11  }
  0x27   : > { %s3971_s25 = scalar_select %p2698_p0, 1, 0 }
  0x28   : > { %p2088_p1 = pneg %p2698_p0  ;;  %p2722_p7 = pnand %p2123_p6, %p2671_p4 }
  0x29   : > { %s2727_s20 = sand.u32 1, %s2555_s14   ;;  %s2188_s13 = scalar_lea.hbm %s3906_s7, 640 }
  0x2a   : > { %p2713_p3 = pnand %p2088_p1, %p3913_p5  ;;  %p2189_p10 = scmp.ne.s32.totalorder %s3906_s7, %s2188_s13 }
  0x2b   : > { %s3973_s18 = scalar_select %p2722_p7, 1, 0 }
  0x2c   : > { %s3972_s29 = scalar_select %p2713_p3, 1, 0 }
  0x2d   : > { %p3924_p12 = pneg %p2713_p3  ;;  %p2195_p4 = scmp.lt.u32.totalorder %s2188_s13, %s3906_s7 }
  0x2f   : > { %p2191_p13 = pnand %p3924_p12, %p2189_p10 }
  0x31   : > { %p2192_p1 = pneg %p2191_p13 }
  0x33   : > { %p2197_p6 = pnand %p2195_p4, %p2192_p1 }
  0x35   : > { %2200 = shalt.err (!%p2197_p6)
}
  0x36   : > { %s2201_s17 = scalar_lea.vmem %s2702_s27, 640  ;;  %p2209_p9 = scmp.lt.s32.totalorder %s2702_s27, %s2702_s27 }
  0x37   : > { %p2202_p2 = scmp.ne.s32.totalorder %s2702_s27, %s2201_s17  ;;  %p2210_p10 = scmp.lt.s32.totalorder %s2201_s17, %s2201_s17 }
  0x39   : > { %p2204_p5 = pnand %p2202_p2, %p3924_p12  ;;  %p2211_p13 = por %p2210_p10, %p2209_p9 }
  0x3b   : > { %p2205_p11 = pneg %p2204_p5 }
  0x3d   : > { %p2212_p8 = pnand %p2211_p13, %p2205_p11 }
  0x3f   : > { %2215 = shalt.err (!%p2212_p8)
}
  0x40   : > { %s2558_s11 = smov 128   ;;  %s2559_s13 = smov 8  }
  0x41   : > { %2091 = dma.hbm_to_vmem [thread:$0]  (!%p2713_p3), %s3906_s7, 640, %s2702_s27, [#allocation15], %s2558_s11, %s2558_s11, %s2559_s13  }
  0x42   : > { %s2760_s26 = sshll.u32 %s2718_s16, 5  ;;  %s3974_s1 = sld [smem:[#allocation47_spill]] }
  0x43   : > { %s400_s9 = scalar_lea.vmem [#allocation5], %s2760_s26  ;;  %s3928_s12 = scalar_lea.sflag [#allocation6], %s2727_s20 }
  0x44   : > { %s411_s22 = sshll.u32 %s400_s9, 4  ;;  %p2775_p8 = pneg %p2722_p7  ;;  %s2769_s22 = int_to_ptr.vmem [resolvable:$true] %s411_s22 }
  0x46   : > { %s3975_s27 = scalar_select %p2775_p8, 1, 0 }
  0x48   : > { %s1732_s14 = scalar_lea.hbm %s3974_s1, %s2709_s28  ;;  %s2221_s19 = scalar_lea.hbm %s3974_s1, 5120 }
  0x49   : > { %s2766_s30 = scalar_lea.hbm %s1732_s14, 2048  ;;  %s2246_s15 = scalar_lea.hbm %s1732_s14, 2560 }
  0x4a   : > { %p2217_p5 = scmp.ne.s32.totalorder %s2766_s30, %s2246_s15  ;;  %p2222_p2 = scmp.lt.u32.totalorder %s2766_s30, %s3974_s1 }
  0x4b   : > { %p2223_p1 = scmp.lt.u32.totalorder %s2221_s19, %s2246_s15  ;;  %p2225_p6 = scmp.lt.u32.totalorder %s2246_s15, %s2766_s30 }
  0x4c   : > { %p2219_p9 = pnand %p2775_p8, %p2217_p5 }
  0x4d   : > { %p2224_p4 = por %p2223_p1, %p2222_p2 }
  0x4e   : > { %p2220_p11 = pneg %p2219_p9 }
  0x4f   : > { %p2226_p10 = por %p2225_p6, %p2224_p4 }
  0x51   : > { %p2227_p13 = pnand %p2226_p10, %p2220_p11 }
  0x53   : > { %2230 = shalt.err (!%p2227_p13)
}
  0x54   : > { %s2231_s14 = scalar_lea.vmem %s2769_s22, 512  ;;  %s2560_s23 = smov [#allocation5]  }
  0x55   : > { %p2232_p5 = scmp.ne.s32.totalorder %s2769_s22, %s2231_s14  ;;  %s2236_s24 = sshll.u32 %s2560_s23, 4  ;;  %s2237_s24 = int_to_ptr.vmem [resolvable:$false] %s2236_s24 }
  0x56   : > { %s2238_s17 = scalar_lea.vmem %s2237_s24, 1024  ;;  %p2239_p0 = scmp.lt.s32.totalorder %s2769_s22, %s2237_s24 }
  0x57   : > { %p2234_p9 = pnand %p2232_p5, %p2775_p8  ;;  %p2240_p3 = scmp.lt.s32.totalorder %s2238_s17, %s2231_s14 }
  0x59   : > { %p2235_p12 = pneg %p2234_p9  ;;  %p2241_p2 = por %p2240_p3, %p2239_p0 }
  0x5b   : > { %p2242_p1 = pnand %p2241_p2, %p2235_p12 }
  0x5d   : > { %2245 = shalt.err (!%p2242_p1)
}
  0x5e   : > { %2101 = dma.hbm_to_vmem [thread:$0]  (!%p2722_p7), %s2766_s30, 512, %s2769_s22, %s3928_s12, %s2558_s11, %s2558_s11, %s2559_s13  }
  0x5f   : > { %s3976_s3 = sld [smem:[#allocation48_spill]]  ;;  %s454_s23 = scalar_lea.vmem [#allocation8], %s2760_s26 }
  0x60   : > { %s465_s24 = sshll.u32 %s454_s23, 4  ;;  %s3929_s17 = scalar_lea.sflag [#allocation9], %s2727_s20  ;;  %s2810_s24 = int_to_ptr.vmem [resolvable:$true] %s465_s24 }
  0x65   : > { %s1749_s9 = scalar_lea.hbm %s3976_s3, %s2709_s28  ;;  %s2252_s15 = scalar_lea.hbm %s3976_s3, 5120 }
  0x66   : > { %s2807_s14 = scalar_lea.hbm %s1749_s9, 2048  ;;  %s2277_s1 = scalar_lea.hbm %s1749_s9, 2560 }
  0x67   : > { %p2248_p0 = scmp.ne.s32.totalorder %s2807_s14, %s2277_s1  ;;  %p2253_p11 = scmp.lt.u32.totalorder %s2807_s14, %s3976_s3 }
  0x68   : > { %p2254_p4 = scmp.lt.u32.totalorder %s2252_s15, %s2277_s1  ;;  %p2256_p10 = scmp.lt.u32.totalorder %s2277_s1, %s2807_s14 }
  0x69   : > { %p2250_p3 = pnand %p2248_p0, %p2775_p8 }
  0x6a   : > { %p2255_p6 = por %p2254_p4, %p2253_p11 }
  0x6b   : > { %p2251_p12 = pneg %p2250_p3 }
  0x6c   : > { %p2257_p13 = por %p2256_p10, %p2255_p6 }
  0x6e   : > { %p2258_p5 = pnand %p2257_p13, %p2251_p12 }
  0x70   : > { %2261 = shalt.err (!%p2258_p5)
}
  0x71   : > { %s2262_s9 = scalar_lea.vmem %s2810_s24, 512  ;;  %s2561_s23 = smov [#allocation8]  }
  0x72   : > { %p2263_p9 = scmp.ne.s32.totalorder %s2810_s24, %s2262_s9  ;;  %s2267_s30 = sshll.u32 %s2561_s23, 4  ;;  %s2268_s30 = int_to_ptr.vmem [resolvable:$false] %s2267_s30 }
  0x73   : > { %s2269_s12 = scalar_lea.vmem %s2268_s30, 1024  ;;  %p2270_p0 = scmp.lt.s32.totalorder %s2810_s24, %s2268_s30 }
  0x74   : > { %p2265_p2 = pnand %p2263_p9, %p2775_p8  ;;  %p2271_p3 = scmp.lt.s32.totalorder %s2269_s12, %s2262_s9 }
  0x76   : > { %p2266_p1 = pneg %p2265_p2  ;;  %p2272_p11 = por %p2271_p3, %p2270_p0 }
  0x78   : > { %p2273_p4 = pnand %p2272_p11, %p2266_p1 }
  0x7a   : > { %2276 = shalt.err (!%p2273_p4)
}
  0x7b   : > { %2107 = dma.hbm_to_vmem [thread:$0]  (!%p2722_p7), %s2807_s14, 512, %s2810_s24, %s3929_s17, %s2558_s11, %s2558_s11, %s2559_s13  }
  0x7c   : > { %s1766_s15 = scalar_lea.hbm %s3904_s5, %s2709_s28  ;;  %s508_s9 = scalar_lea.vmem [#allocation11], %s2760_s26 }
  0x7d   : > { %s2842_s19 = scalar_lea.hbm %s1766_s15, 2048  ;;  %s519_s23 = sshll.u32 %s508_s9, 4  ;;  %s2845_s23 = int_to_ptr.vmem [resolvable:$true] %s519_s23 }
  0x7e   : > { %s3934_s30 = scalar_lea.sflag [#allocation12], %s2727_s20  ;;  %s2308_s12 = scalar_lea.hbm %s1766_s15, 2560 }
  0x7f   : > { %p2279_p12 = scmp.ne.s32.totalorder %s2842_s19, %s2308_s12  ;;  %s2283_s1 = scalar_lea.hbm %s3904_s5, 5120 }
  0x80   : > { %p2284_p13 = scmp.lt.u32.totalorder %s2842_s19, %s3904_s5  ;;  %p2285_p5 = scmp.lt.u32.totalorder %s2283_s1, %s2308_s12 }
  0x81   : > { %p2281_p6 = pnand %p2279_p12, %p2775_p8  ;;  %p2287_p2 = scmp.lt.u32.totalorder %s2308_s12, %s2842_s19 }
  0x82   : > { %p2286_p9 = por %p2285_p5, %p2284_p13 }
  0x83   : > { %p2282_p10 = pneg %p2281_p6 }
  0x84   : > { %p2288_p1 = por %p2287_p2, %p2286_p9 }
  0x86   : > { %p2289_p0 = pnand %p2288_p1, %p2282_p10 }
  0x88   : > { %2292 = shalt.err (!%p2289_p0)
}
  0x89   : > { %s2293_s26 = scalar_lea.vmem %s2845_s23, 512  ;;  %s2562_s15 = smov [#allocation11]  }
  0x8a   : > { %p2294_p3 = scmp.ne.s32.totalorder %s2845_s23, %s2293_s26  ;;  %s2298_s9 = sshll.u32 %s2562_s15, 4  ;;  %s2299_s9 = int_to_ptr.vmem [resolvable:$false] %s2298_s9 }
  0x8b   : > { %s2300_s17 = scalar_lea.vmem %s2299_s9, 1024  ;;  %p2301_p12 = scmp.lt.s32.totalorder %s2845_s23, %s2299_s9 }
  0x8c   : > { %p2296_p11 = pnand %p2294_p3, %p2775_p8  ;;  %p2302_p6 = scmp.lt.s32.totalorder %s2300_s17, %s2293_s26 }
  0x8e   : > { %p2297_p4 = pneg %p2296_p11  ;;  %p2303_p13 = por %p2302_p6, %p2301_p12 }
  0x90   : > { %p2304_p5 = pnand %p2303_p13, %p2297_p4 }
  0x92   : > { %2307 = shalt.err (!%p2304_p5)
}
  0x93   : > { %2113 = dma.hbm_to_vmem [thread:$0]  (!%p2722_p7), %s2842_s19, 512, %s2845_s23, %s3934_s30, %s2558_s11, %s2558_s11, %s2559_s13  }
  0x94   : > { %s2563_s12 = smov [#allocation16]   ;;  %s2874_s24 = sshll.u32 %s2718_s16, 7 }
  0x95   : > { %s356_s14 = sshll.u32 %s2563_s12, 4  ;;  %s2309_s26 = scalar_lea.hbm %s3907_s8, 16  ;;  %s357_s14 = int_to_ptr.vmem [resolvable:$true] %s356_s14 }
  0x96   : > { %p2310_p10 = scmp.ne.s32.totalorder %s3907_s8, %s2309_s26  ;;  %p3977_p9 = scmp.ne.s32.totalorder %s3972_s29, 0 }
  0x97   : > { %p2316_p3 = scmp.lt.u32.totalorder %s2309_s26, %s3907_s8 }
  0x98   : > { %p3978_p2 = pneg %p3977_p9 }
  0x9a   : > { %p2312_p1 = pnand %p2310_p10, %p3978_p2 }
  0x9c   : > { %p2313_p0 = pneg %p2312_p1 }
  0x9e   : > { %p2318_p11 = pnand %p2316_p3, %p2313_p0 }
  0xa0   : > { %2321 = shalt.err (!%p2318_p11)
}
  0xa1   : > { %s2322_s19 = scalar_lea.vmem %s357_s14, 16  ;;  %p3979_p12 = pmov %p3978_p2 }
  0xa2   : > { %p2323_p4 = scmp.ne.s32.totalorder %s357_s14, %s2322_s19  ;;  %s2329_s23 = scalar_lea.vmem %s357_s14, 32 }
  0xa3   : > { %p2330_p5 = scmp.lt.s32.totalorder %s357_s14, %s357_s14  ;;  %p2331_p7 = scmp.lt.s32.totalorder %s2329_s23, %s2322_s19 }
  0xa4   : > { %p2325_p6 = pnand %p2323_p4, %p3979_p12 }
  0xa5   : > { %p2332_p8 = por %p2331_p7, %p2330_p5 }
  0xa6   : > { %p2326_p13 = pneg %p2325_p6 }
  0xa8   : > { %p2333_p2 = pnand %p2332_p8, %p2326_p13 }
  0xaa   : > { %2336 = shalt.err (!%p2333_p2)
}
  0xab   : > { %2094 = dma.hbm_to_vmem [thread:$0]  (!%p3977_p9), %s3907_s8, 16, %s357_s14, [#allocation15]  }
  0xac   : > { %s2900_s26 = scalar_lea.hbm %s3899_s0, %s2709_s28  ;;  %s371_s15 = scalar_lea.vmem [#allocation2], %s2874_s24 }
  0xad   : > { %s386_s29 = sshll.u32 %s371_s15, 4  ;;  %s2909_s19 = scalar_lea.hbm %s3901_s2, %s2709_s28  ;;  %s2903_s29 = int_to_ptr.vmem [resolvable:$true] %s386_s29 }
  0xae   : > { %s368_s23 = scalar_lea.sflag [#allocation3], %s2718_s16  ;;  %s2337_s14 = scalar_lea.hbm %s2900_s26, 2048 }
  0xaf   : > { %p2338_p7 = scmp.ne.s32.totalorder %s2900_s26, %s2337_s14  ;;  %p3980_p8 = scmp.ne.s32.totalorder %s3975_s27, 0 }
  0xb0   : > { %s2342_s1 = scalar_lea.hbm %s3899_s0, 5120  ;;  %p2343_p1 = scmp.lt.u32.totalorder %s2900_s26, %s3899_s0 }
  0xb1   : > { %p2340_p10 = pnand %p2338_p7, %p3980_p8  ;;  %p2344_p0 = scmp.lt.u32.totalorder %s2342_s1, %s2337_s14 }
  0xb2   : > { %p2346_p11 = scmp.lt.u32.totalorder %s2337_s14, %s2900_s26 }
  0xb3   : > { %p2341_p9 = pneg %p2340_p10  ;;  %p2345_p3 = por %p2344_p0, %p2343_p1 }
  0xb5   : > { %p2347_p4 = por %p2346_p11, %p2345_p3 }
  0xb7   : > { %p2348_p12 = pnand %p2347_p4, %p2341_p9 }
  0xb9   : > { %2351 = shalt.err (!%p2348_p12)
}
  0xba   : > { %s2352_s15 = scalar_lea.vmem %s2903_s29, 2048  ;;  %s2564_s9 = smov [#allocation2]  }
  0xbb   : > { %p2353_p6 = scmp.ne.s32.totalorder %s2903_s29, %s2352_s15  ;;  %s2357_s17 = sshll.u32 %s2564_s9, 4  ;;  %s2358_s17 = int_to_ptr.vmem [resolvable:$false] %s2357_s17 }
  0xbc   : > { %s2359_s30 = scalar_lea.vmem %s2358_s17, 4096  ;;  %p2360_p2 = scmp.lt.s32.totalorder %s2903_s29, %s2358_s17 }
  0xbd   : > { %p2355_p13 = pnand %p2353_p6, %p3980_p8  ;;  %p2361_p7 = scmp.lt.s32.totalorder %s2359_s30, %s2352_s15 }
  0xbf   : > { %p2356_p5 = pneg %p2355_p13  ;;  %p2362_p10 = por %p2361_p7, %p2360_p2 }
  0xc1   : > { %p2363_p1 = pnand %p2362_p10, %p2356_p5 }
  0xc3   : > { %2366 = shalt.err (!%p2363_p1)
}
  0xc4   : > { %p3981_p9 = scmp.ne.s32.totalorder %s3973_s18, 0  ;;  %s425_s14 = scalar_lea.vmem [#allocation7], %s2874_s24 }
  0xc5   : > { %s440_s12 = sshll.u32 %s425_s14, 4  ;;  %s2945_s22 = scalar_lea.hbm %s3903_s4, %s2709_s28  ;;  %s2939_s12 = int_to_ptr.vmem [resolvable:$true] %s440_s12 }
  0xc6   : > { %2098 = dma.hbm_to_vmem [thread:$0]  (!%p3981_p9), %s2900_s26, 2048, %s2903_s29, %s368_s23, %s2558_s11, %s2558_s11, %s2559_s13  }
  0xc7   : > { %s2367_s16 = scalar_lea.hbm %s2909_s19, 2048  ;;  %s2372_s17 = scalar_lea.hbm %s3901_s2, 5120 }
  0xc8   : > { %p2368_p0 = scmp.ne.s32.totalorder %s2909_s19, %s2367_s16  ;;  %p2373_p4 = scmp.lt.u32.totalorder %s2909_s19, %s3901_s2 }
  0xc9   : > { %p2374_p12 = scmp.lt.u32.totalorder %s2372_s17, %s2367_s16  ;;  %p2376_p13 = scmp.lt.u32.totalorder %s2367_s16, %s2909_s19 }
  0xca   : > { %p2370_p3 = pnand %p2368_p0, %p3980_p8 }
  0xcb   : > { %p2375_p6 = por %p2374_p12, %p2373_p4 }
  0xcc   : > { %p2371_p11 = pneg %p2370_p3 }
  0xcd   : > { %p2377_p5 = por %p2376_p13, %p2375_p6 }
  0xcf   : > { %p2378_p2 = pnand %p2377_p5, %p2371_p11 }
  0xd1   : > { %2381 = shalt.err (!%p2378_p2)
}
  0xd2   : > { %s2382_s29 = scalar_lea.vmem %s2939_s12, 2048  ;;  %s2565_s23 = smov [#allocation7]  }
  0xd3   : > { %p2383_p7 = scmp.ne.s32.totalorder %s2939_s12, %s2382_s29  ;;  %s2387_s14 = sshll.u32 %s2565_s23, 4  ;;  %s2388_s14 = int_to_ptr.vmem [resolvable:$false] %s2387_s14 }
  0xd4   : > { %s2389_s3 = scalar_lea.vmem %s2388_s14, 4096  ;;  %p2390_p0 = scmp.lt.s32.totalorder %s2939_s12, %s2388_s14 }
  0xd5   : > { %p2385_p10 = pnand %p2383_p7, %p3980_p8  ;;  %p2391_p3 = scmp.lt.s32.totalorder %s2389_s3, %s2382_s29 }
  0xd7   : > { %p2386_p1 = pneg %p2385_p10  ;;  %p2392_p4 = por %p2391_p3, %p2390_p0 }
  0xd9   : > { %p2393_p12 = pnand %p2392_p4, %p2386_p1 }
  0xdb   : > { %2396 = shalt.err (!%p2393_p12)
}
  0xdc   : > { %s3982_s1 = scalar_lea.sflag [#allocation6], %s2727_s20  ;;  %s479_s16 = scalar_lea.vmem [#allocation10], %s2874_s24 }
  0xdd   : > { %2104 = dma.hbm_to_vmem [thread:$0]  (!%p3981_p9), %s2909_s19, 2048, %s2939_s12, %s3982_s1, %s2558_s11, %s2558_s11, %s2559_s13  }
  0xde   : > { %s494_s15 = sshll.u32 %s479_s16, 4  ;;  %s2980_s30 = scalar_lea.hbm %s3905_s6, %s2709_s28  ;;  %s2974_s15 = int_to_ptr.vmem [resolvable:$true] %s494_s15 }
  0xdf   : > { %s2397_s26 = scalar_lea.hbm %s2945_s22, 2048  ;;  %s2402_s14 = scalar_lea.hbm %s3903_s4, 5120 }
  0xe0   : > { %p2398_p11 = scmp.ne.s32.totalorder %s2945_s22, %s2397_s26  ;;  %p2403_p5 = scmp.lt.u32.totalorder %s2945_s22, %s3903_s4 }
  0xe1   : > { %p2404_p2 = scmp.lt.u32.totalorder %s2402_s14, %s2397_s26  ;;  %p2406_p10 = scmp.lt.u32.totalorder %s2397_s26, %s2945_s22 }
  0xe2   : > { %p2400_p6 = pnand %p2398_p11, %p3980_p8 }
  0xe3   : > { %p2405_p7 = por %p2404_p2, %p2403_p5 }
  0xe4   : > { %p2401_p13 = pneg %p2400_p6 }
  0xe5   : > { %p2407_p1 = por %p2406_p10, %p2405_p7 }
  0xe7   : > { %p2408_p0 = pnand %p2407_p1, %p2401_p13 }
  0xe9   : > { %2411 = shalt.err (!%p2408_p0)
}
  0xea   : > { %s2412_s28 = scalar_lea.vmem %s2974_s15, 2048  ;;  %s2566_s12 = smov [#allocation10]  }
  0xeb   : > { %p2413_p3 = scmp.ne.s32.totalorder %s2974_s15, %s2412_s28  ;;  %s2417_s1 = sshll.u32 %s2566_s12, 4  ;;  %s2418_s1 = int_to_ptr.vmem [resolvable:$false] %s2417_s1 }
  0xec   : > { %s2419_s16 = scalar_lea.vmem %s2418_s1, 4096  ;;  %p2420_p11 = scmp.lt.s32.totalorder %s2974_s15, %s2418_s1 }
  0xed   : > { %p2415_p4 = pnand %p2413_p3, %p3980_p8  ;;  %p2421_p6 = scmp.lt.s32.totalorder %s2419_s16, %s2412_s28 }
  0xef   : > { %p2416_p12 = pneg %p2415_p4  ;;  %p2422_p5 = por %p2421_p6, %p2420_p11 }
  0xf1   : > { %p2423_p2 = pnand %p2422_p5, %p2416_p12 }
  0xf3   : > { %2426 = shalt.err (!%p2423_p2)
}
  0xf4   : > { %s3983_s9 = scalar_lea.sflag [#allocation9], %s2727_s20  ;;  %s533_s17 = scalar_lea.vmem [#allocation13], %s2874_s24 }
  0xf5   : > { %2110 = dma.hbm_to_vmem [thread:$0]  (!%p3981_p9), %s2945_s22, 2048, %s2974_s15, %s3983_s9, %s2558_s11, %s2558_s11, %s2559_s13  }
  0xf6   : > { %s548_s26 = sshll.u32 %s533_s17, 4  ;;  %s2427_s29 = scalar_lea.hbm %s2980_s30, 2048  ;;  %s3009_s26 = int_to_ptr.vmem [resolvable:$true] %s548_s26 }
  0xf7   : > { %p2428_p13 = scmp.ne.s32.totalorder %s2980_s30, %s2427_s29  ;;  %s2432_s3 = scalar_lea.hbm %s3905_s6, 5120 }
  0xf8   : > { %p2433_p1 = scmp.lt.u32.totalorder %s2980_s30, %s3905_s6  ;;  %p2434_p0 = scmp.lt.u32.totalorder %s2432_s3, %s2427_s29 }
  0xf9   : > { %p2430_p7 = pnand %p2428_p13, %p3980_p8  ;;  %p2436_p4 = scmp.lt.u32.totalorder %s2427_s29, %s2980_s30 }
  0xfa   : > { %p2435_p3 = por %p2434_p0, %p2433_p1 }
  0xfb   : > { %p2431_p10 = pneg %p2430_p7 }
  0xfc   : > { %p2437_p12 = por %p2436_p4, %p2435_p3 }
  0xfe   : > { %p2438_p11 = pnand %p2437_p12, %p2431_p10 }
 0x100   : > { %2441 = shalt.err (!%p2438_p11)
}
 0x101   : > { %s2442_s24 = scalar_lea.vmem %s3009_s26, 2048  ;;  %s2567_s22 = smov [#allocation13]  }
 0x102   : > { %p2443_p6 = scmp.ne.s32.totalorder %s3009_s26, %s2442_s24  ;;  %s2447_s15 = sshll.u32 %s2567_s22, 4  ;;  %s2448_s15 = int_to_ptr.vmem [resolvable:$false] %s2447_s15 }
 0x103   : > { %s2449_s12 = scalar_lea.vmem %s2448_s15, 4096  ;;  %p2450_p13 = scmp.lt.s32.totalorder %s3009_s26, %s2448_s15 }
 0x104   : > { %p2445_p5 = pnand %p2443_p6, %p3980_p8  ;;  %p2451_p7 = scmp.lt.s32.totalorder %s2449_s12, %s2442_s24 }
 0x106   : > { %p2446_p2 = pneg %p2445_p5  ;;  %p2452_p1 = por %p2451_p7, %p2450_p13 }
 0x108   : > { %p2453_p0 = pnand %p2452_p1, %p2446_p2 }
 0x10a   : > { %2456 = shalt.err (!%p2453_p0)
}
 0x10b   : > { %s3984_s1 = scalar_lea.sflag [#allocation12], %s2727_s20  ;;  %p3985_p8 = scmp.ne.s32.totalorder %s3971_s25, 0 }
 0x10c   : > { %2116 = dma.hbm_to_vmem [thread:$0]  (!%p3981_p9), %s2980_s30, 2048, %s3009_s26, %s3984_s1, %s2558_s11, %s2558_s11, %s2559_s13  }
 0x10d   : > { %560 = sbr.rel (%p3985_p8) target bundleno = 898 (0x382), region = 56 }
 0x114   : > { %s3040_s27 = sand.u32 1, %s2539_s10   ;;  %p3986_p10 = scmp.ne.s32.totalorder %s3965_s21, 0 }
 0x115   : > { %s1957_s16 = sshll.u32 %s3040_s27, 7  ;;  %s563_s9 = scalar_lea.sflag [#allocation3], %s3040_s27 }
 0x116   : > { %s3044_s18 = scalar_lea.vmem [#allocation2], %s1957_s16 }
 0x117   : > { %2510 = dma.done.wait (%p3986_p10), %s563_s9, 2048  }
 0x118   : > { %2512 = vsyncadd (%p3986_p10), %s563_s9, 4294965248  ;;  %s3987_s20 = sld [smem:[#allocation29_spill]]  ;;  %s3052_s11 = sshll.u32 %s3040_s27, 5 }
 0x119   : > { %s3055_s30 = scalar_lea.vmem [#allocation5], %s3052_s11 }
 0x11e   : > { %s571_s25 = sand.u32 1, %s3987_s20  }
 0x11f   : > { %s572_s13 = scalar_lea.sflag [#allocation6], %s571_s25 }
 0x120   : > { %2514 = dma.done.wait (%p3986_p10), %s572_s13, 2560  }
 0x121   : > { %2516 = vsyncadd (%p3986_p10), %s572_s13, 4294964736  ;;  %s3061_s17 = scalar_lea.vmem [#allocation7], %s1957_s16  ;;  %s590_s26 = scalar_lea.sflag [#allocation9], %s571_s25 }
 0x122   : > { %s593_s29 = scalar_lea.vmem [#allocation8], %s3052_s11 }
 0x123   : > { %2518 = dma.done.wait (%p3986_p10), %s590_s26, 2560  }
 0x124   : > { %2520 = vsyncadd (%p3986_p10), %s590_s26, 4294964736  ;;  %s3068_s23 = scalar_lea.vmem [#allocation10], %s1957_s16  ;;  %s608_s14 = scalar_lea.sflag [#allocation12], %s571_s25 }
 0x125   : > { %s611_s3 = scalar_lea.vmem [#allocation11], %s3052_s11 }
 0x126   : > { %2522 = dma.done.wait (%p3986_p10), %s608_s14, 2560  }
 0x127   : > { %2524 = vsyncadd (%p3986_p10), %s608_s14, 4294964736  ;;  %s3075_s19 = scalar_lea.vmem [#allocation13], %s1957_s16  ;;  %p3988_p9 = scmp.eq.s32.totalorder %s3987_s20, 0 }
 0x129   : > { %2526 = dma.done.wait (%p3988_p9), [#allocation15], 656   ;;  %p3989_p3 = pmov %p3988_p9 }
 0x12a   : > { %v743_v0 = vld [vmem:[%s3061_s17 + $0x8] sm:$0xff]  ;;  %v742_v1 = vld [vmem:[%s3061_s17] sm:$0xff]  ;;  %s2568_s21 = smov 4   ;;  %vm874_vm0 = vcmask 1046528   ;;  %v3108_v12 = vld [vmem:[%s3044_s18 + $0x50] sm:$0xff]  ;;  %s2569_s28 = smov 8  }
 0x12b   : > { %2528 = vsyncadd (%p3989_p3), [#allocation15], 4294966640  ;;  %v3084_v2 = vld [vmem:[%s3061_s17 + $0x48] sm:$0xff]  ;;  %811 = vrot.lane.b32.xlu1 %v743_v0, %s2568_s21  ;;  %809 = vrot.lane.b32.xlu0 %v742_v1, %s2568_s21  ;;  %v3089_v3 = vld [vmem:[%s3061_s17 + $0x40] sm:$0xff]  ;;  %v894_v16 = vrot.slane %v3108_v12, 1  ;;  %s2570_s24 = smov 12  }
 0x12c   : > { %3990 = vst [vmem:[#allocation34_spill] sm:$0xff] %v3084_v2  ;;  %3991 = vst [vmem:[#allocation35_spill] sm:$0xff] %v3089_v3  ;;  %v3092_v4 = vld [vmem:[%s3044_s18 + $0x40] sm:$0xff]  ;;  %v3095_v5 = vld [vmem:[%s3044_s18 + $0x48] sm:$0xff]  ;;  %s2571_s22 = smov 16   ;;  %s2572_s15 = smov 20  }
 0x12d   : > { %v3936_v6 = vrot.slane %v3092_v4, 1  ;;  %v3099_v7 = vld [vmem:[%s3044_s18] sm:$0xff]  ;;  %v3102_v8 = vld [vmem:[%s3044_s18 + $0x8] sm:$0xff]  ;;  %v892_v9 = vrot.slane %v3095_v5, 1  ;;  %v3111_v13 = vld [vmem:[%s3044_s18 + $0x10] sm:$0xff]  ;;  %s2573_s12 = smov 24  }
 0x12e   : > { %v875_v10 = vrot.slane %v3099_v7, 1  ;;  %v876_v11 = vrot.slane %v3102_v8, 1  ;;  %v878_v17 = vrot.slane %v3111_v13, 1  ;;  %v3136_v20 = vld [vmem:[%s3068_s23 + $0x40] sm:$0xff]  ;;  %v769_v22 = vld [vmem:[%s3068_s23 + $0x48] sm:$0xff]  ;;  %v752_v26 = vld [vmem:[%s3061_s17 + $0x50] sm:$0xff] }
 0x12f   : > { %827 = vrot.lane.b32.xlu1 %v3084_v2, %s2568_s21  ;;  %825 = vrot.lane.b32.xlu0 %v3089_v3, %s2568_s21  ;;  %v3120_v14 = vsel %vm874_vm0, %v3936_v6, %v892_v9  ;;  %v3129_v18 = vsel %vm874_vm0, %v892_v9, %v894_v16  ;;  %3994 = vst [vmem:[#allocation38_spill] sm:$0xff] %v3136_v20  ;;  %v760_v21 = vld [vmem:[%s3068_s23] sm:$0xff]  ;;  %v761_v23 = vld [vmem:[%s3068_s23 + $0x8] sm:$0xff]  ;;  %v3935_v28 = vrot.slane %v3136_v20, 1  ;;  %v1102_v30 = vrot.slane %v769_v22, 1  ;;  %s2574_s1 = smov 28  }
 0x130   : > { %3992 = vst [vmem:[#allocation36_spill] sm:$0xff] %v3120_v14  ;;  %v877_v15 = vsel %vm874_vm0, %v875_v10, %v876_v11  ;;  %3993 = vst [vmem:[#allocation37_spill] sm:$0xff] %v3129_v18  ;;  %v879_v19 = vsel %vm874_vm0, %v876_v11, %v878_v17  ;;  %v785_v24 = vld [vmem:[%s3075_s19 + $0x40] sm:$0xff]  ;;  %v744_v27 = vld [vmem:[%s3061_s17 + $0x10] sm:$0xff]  ;;  %v1085_v29 = vrot.slane %v760_v21, 1  ;;  %v1086_v31 = vrot.slane %v761_v23, 1 }
 0x131   : > { %v777_v25 = vld [vmem:[%s3075_s19] sm:$0xff]  ;;  %v786_v32 = vld [vmem:[%s3075_s19 + $0x48] sm:$0xff]  ;;  %v1103_v34 = vsel %vm874_vm0, %v3935_v28, %v1102_v30  ;;  %v3164_v36 = vld [vmem:[%s3044_s18 + $0x58] sm:$0xff]  ;;  %s2575_s16 = smov 32   ;;  %vm1515_vm1 = vcmask 1043456   ;;  %vm1318_vm2 = vcmask 31744  }
 0x132   : > { %v778_v33 = vld [vmem:[%s3075_s19 + $0x8] sm:$0xff]  ;;  %v1087_v35 = vsel %vm874_vm0, %v1085_v29, %v1086_v31  ;;  %v3167_v37 = vld [vmem:[%s3044_s18 + $0x18] sm:$0xff]  ;;  %v896_v40 = vrot.slane %v3164_v36, 1  ;;  %v3176_v42 = vld [vmem:[%s3068_s23 + $0x50] sm:$0xff]  ;;  %vm1335_vm3 = vcmask 64512   ;;  %vm1352_vm4 = vcmask 97280  }
 0x133   : > { %924 = vrot.lane.b32.xlu1 %v3120_v14, %s2569_s28  ;;  %908 = vrot.lane.b32.xlu0 %v877_v15, %s2569_s28  ;;  %v753_v38 = vld [vmem:[%s3061_s17 + $0x58] sm:$0xff]  ;;  %v880_v41 = vrot.slane %v3167_v37, 1  ;;  %v3179_v43 = vld [vmem:[%s3068_s23 + $0x10] sm:$0xff]  ;;  %v1104_v46 = vrot.slane %v3176_v42, 1  ;;  %v1454_v60 = vld [vmem:[#allocation14] sm:$0xff]  ;;  %vm1369_vm5 = vcmask 130048  }
 0x134   : > { %v745_v39 = vld [vmem:[%s3061_s17 + $0x18] sm:$0xff]  ;;  %v897_v44 = vsel %vm874_vm0, %v894_v16, %v896_v40  ;;  %v1088_v47 = vrot.slane %v3179_v43, 1  ;;  %v3196_v50 = vld [vmem:[%s3044_s18 + $0x60] sm:$0xff]  ;;  %v787_v58 = vld [vmem:[%s3075_s19 + $0x50] sm:$0xff]  ;;  %vm1386_vm6 = vcmask 162816   ;;  %vm1403_vm7 = vcmask 195584  }
 0x135   : > { %v881_v45 = vsel %vm874_vm0, %v878_v17, %v880_v41  ;;  %v1105_v48 = vsel %vm874_vm0, %v1102_v30, %v1104_v46  ;;  %3995 = vst [vmem:[#allocation39_spill] sm:$0xff] %v3196_v50  ;;  %v3199_v51 = vld [vmem:[%s3044_s18 + $0x20] sm:$0xff]  ;;  %v898_v52 = vrot.slane %v3196_v50, 1  ;;  %v3228_v56 = vld [vmem:[%s3068_s23 + $0x58] sm:$0xff]  ;;  %v779_v59 = vld [vmem:[%s3075_s19 + $0x10] sm:$0xff]  ;;  %vm1420_vm8 = vcmask 228352  }
 0x136   : > { %v1089_v49 = vsel %vm874_vm0, %v1086_v31, %v1088_v47  ;;  %3996 = vst [vmem:[#allocation40_spill] sm:$0xff] %v3199_v51  ;;  %v882_v53 = vrot.slane %v3199_v51, 1  ;;  %v3231_v57 = vld [vmem:[%s3068_s23 + $0x18] sm:$0xff]  ;;  %v1455_v61 = vld [vmem:[#allocation14 + $0x8] sm:$0xff]  ;;  %v1456_v63 = vld [vmem:[#allocation14 + $0x10] sm:$0xff]  ;;  %v1106_v15 = vrot.slane %v3228_v56, 1 }
 0x137   : > { %926 = vrot.lane.b32.xlu1 %v3129_v18, %s2569_s28  ;;  %910 = vrot.lane.b32.xlu0 %v879_v19, %s2569_s28  ;;  %v899_v54 = vsel %vm874_vm0, %v896_v40, %v898_v52  ;;  %v2046_v62 = vpack.c.bf16 %v1455_v61, %v1454_v60  ;;  %v1457_v0 = vld [vmem:[#allocation14 + $0x18] sm:$0xff]  ;;  %v3246_v9 = vld [vmem:[%s3061_s17 + $0x60] sm:$0xff]  ;;  %v1090_v16 = vrot.slane %v3231_v57, 1  ;;  %v3306_v40 = vld [vmem:[%s3044_s18 + $0x70] sm:$0xff]  ;;  %vm1437_vm9 = vcmask 261120   ;;  %s1966_s9 = sshll.u32 %s3040_s27, 6 }
 0x138   : > { %v883_v55 = vsel %vm874_vm0, %v880_v41, %v882_v53  ;;  %v2050_v1 = vpack.c.bf16 %v1457_v0, %v1456_v63  ;;  %v3249_v10 = vld [vmem:[%s3061_s17 + $0x20] sm:$0xff]  ;;  %v788_v17 = vld [vmem:[%s3075_s19 + $0x58] sm:$0xff]  ;;  %3999 = vst [vmem:[#allocation43_spill] sm:$0xff] %v3306_v40  ;;  %v3309_v41 = vld [vmem:[%s3044_s18 + $0x30] sm:$0xff]  ;;  %vm1466_vm10 = vcmask 293888   ;;  %s4021_s20 = sld [smem:[#allocation26_spill]] }
 0x139   : > { %2047 = vmatprep.subr.bf16.mxu0 %v2046_v62  ;;  %2054 = vmatprep.subr.bf16.mxu1 %v2046_v62  ;;  %v1458_v11 = vld [vmem:[#allocation14 + $0x20] sm:$0xf]  ;;  %v780_v19 = vld [vmem:[%s3075_s19 + $0x18] sm:$0xff]  ;;  %4000 = vst [vmem:[#allocation44_spill] sm:$0xff] %v3309_v41  ;;  %v3453_v28 = vld [vmem:[%s3068_s23 + $0x30] sm:$0xff]  ;;  %s4022_s25 = sld [smem:[#allocation31_spill]] }
 0x13a   : > { %2049 = vmatpush3.bf16.msra.mxu0 %v2046_v62  ;;  %2057 = vmatpush3.bf16.msra.mxu1 %v2046_v62  ;;  %v3282_v30 = vld [vmem:[%s3068_s23 + $0x60] sm:$0xff]  ;;  %v3946_v18 = vrot.slane %v3453_v28, 1  ;;  %s4023_s26 = sld [smem:[#allocation49_spill]] }
 0x13b   : > { %988 = vrot.lane.b32.xlu1 %v3136_v20, %s2570_s24  ;;  %972 = vrot.lane.b32.xlu0 %v760_v21, %s2570_s24  ;;  %v1107_v21 = vsel %vm874_vm0, %v1104_v46, %v1106_v15  ;;  %v3285_v31 = vld [vmem:[%s3068_s23 + $0x20] sm:$0xff] }
 0x13c   : > { %2051 = vmatprep.subr.bf16.mxu0 %v2050_v1  ;;  %2055 = vmatprep.subr.bf16.mxu1 %v2050_v1  ;;  %v789_v62 = vld [vmem:[%s3075_s19 + $0x60] sm:$0xff] }
 0x13d   : > { %v781_v63 = vld [vmem:[%s3075_s19 + $0x20] sm:$0xff] }
 0x13e   : > { %2053 = vmatpush3.bf16.msra.mxu0 %v2050_v1  ;;  %2058 = vmatpush3.bf16.msra.mxu1 %v2050_v1  ;;  %s1990_s11 = sshll.u32 %s4021_s20, 10 }
 0x13f   : > { %990 = vrot.lane.b32.xlu1 %v769_v22, %s2570_s24  ;;  %974 = vrot.lane.b32.xlu0 %v761_v23, %s2570_s24  ;;  %v1091_v22 = vsel %vm874_vm0, %v1088_v47, %v1090_v16  ;;  %v3270_v23 = vld [vmem:[%s3044_s18 + $0x68] sm:$0xff]  ;;  %p4024_p12 = scmp.ne.s32.totalorder %s4022_s25, 0 }
 0x140   : > { %2020 = vmatprep.subr.msk.mxu0 %vm1515_vm1, %v1458_v11  ;;  %2056 = vmatprep.subr.msk.mxu1 %vm1515_vm1, %v1458_v11  ;;  %3997 = vst [vmem:[#allocation41_spill] sm:$0xff] %v3270_v23 }
 0x142   : > { %2021 = vmatpush3.msk.msra.mxu0 %vm1515_vm1, %v1458_v11  ;;  %2059 = vmatpush3.msk.msra.mxu1 %vm1515_vm1, %v1458_v11 }
 0x143   : > { %1052 = vrot.lane.b32.xlu1 %v785_v24, %s2571_s22  ;;  %1036 = vrot.lane.b32.xlu0 %v777_v25, %s2571_s22  ;;  %v3273_v24 = vld [vmem:[%s3044_s18 + $0x28] sm:$0xff] }
 0x144   : > { %3998 = vst [vmem:[#allocation42_spill] sm:$0xff] %v3273_v24  ;;  %v755_v25 = vld [vmem:[%s3061_s17 + $0x68] sm:$0xff]  ;;  %v884_v29 = vrot.slane %v3273_v24, 1 }
 0x147   : > { %829 = vrot.lane.b32.xlu1 %v752_v26, %s2568_s21  ;;  %813 = vrot.lane.b32.xlu0 %v744_v27, %s2568_s21 }
 0x14b   : > { %1054 = vrot.lane.b32.xlu1 %v786_v32, %s2571_s22  ;;  %1038 = vrot.lane.b32.xlu0 %v778_v33, %s2571_s22  ;;  %v885_v33 = vsel %vm874_vm0, %v882_v53, %v884_v29 }
 0x14f   : > { %1134 = vrot.lane.b32.xlu1 %v1103_v34, %s2572_s15  ;;  %1118 = vrot.lane.b32.xlu0 %v1087_v35, %s2572_s15  ;;  %v1108_v34 = vrot.slane %v3282_v30, 1  ;;  %v1092_v35 = vrot.slane %v3285_v31, 1 }
 0x153   : > { %831 = vrot.lane.b32.xlu1 %v753_v38, %s2568_s21  ;;  %815 = vrot.lane.b32.xlu0 %v745_v39, %s2568_s21 }
 0x157   : > { %928 = vrot.lane.b32.xlu1 %v897_v44, %s2569_s28  ;;  %912 = vrot.lane.b32.xlu0 %v881_v45, %s2569_s28 }
 0x15b   : > { %1136 = vrot.lane.b32.xlu1 %v1105_v48, %s2572_s15  ;;  %1120 = vrot.lane.b32.xlu0 %v1089_v49, %s2572_s15 }
 0x15f   : > { %1183 = vrot.lane.b32.xlu1 %v3108_v12, %s2573_s12  ;;  %1167 = vrot.lane.b32.xlu0 %v3111_v13, %s2573_s12 }
 0x163   : > { %930 = vrot.lane.b32.xlu1 %v899_v54, %s2569_s28  ;;  %914 = vrot.lane.b32.xlu0 %v883_v55, %s2569_s28 }
 0x167   : > { %992 = vrot.lane.b32.xlu1 %v3176_v42, %s2570_s24  ;;  %976 = vrot.lane.b32.xlu0 %v3179_v43, %s2570_s24  ;;  %v902_v42 = vrot.slane %v3306_v40, 1  ;;  %v886_v43 = vrot.slane %v3309_v41, 1 }
 0x169   : > { %v887_v47 = vsel %vm874_vm0, %v884_v29, %v886_v43 }
 0x16b   : > { %1185 = vrot.lane.b32.xlu1 %v3164_v36, %s2573_s12  ;;  %1169 = vrot.lane.b32.xlu0 %v3167_v37, %s2573_s12 }
 0x16f   : > { %1233 = vrot.lane.b32.xlu1 %v752_v26, %s2574_s1  ;;  %1217 = vrot.lane.b32.xlu0 %v744_v27, %s2574_s1  ;;  %v747_v26 = vld [vmem:[%s3061_s17 + $0x28] sm:$0xff]  ;;  %v900_v27 = vrot.slane %v3270_v23, 1 }
 0x171   : > { %v901_v32 = vsel %vm874_vm0, %v898_v52, %v900_v27  ;;  %v903_v46 = vsel %vm874_vm0, %v900_v27, %v902_v42  ;;  %v782_v27 = vld [vmem:[%s3075_s19 + $0x28] sm:$0xff] }
 0x173   : > { %994 = vrot.lane.b32.xlu1 %v3228_v56, %s2570_s24  ;;  %978 = vrot.lane.b32.xlu0 %v3231_v57, %s2570_s24 }
 0x177   : > { %1056 = vrot.lane.b32.xlu1 %v787_v58, %s2571_s22  ;;  %1040 = vrot.lane.b32.xlu0 %v779_v59, %s2571_s22  ;;  %v3360_v58 = vld [vmem:[%s3068_s23 + $0x68] sm:$0xff] }
 0x178   : > { %v3363_v59 = vld [vmem:[%s3068_s23 + $0x28] sm:$0xff] }
 0x17b   : > { %1235 = vrot.lane.b32.xlu1 %v753_v38, %s2574_s1  ;;  %1219 = vrot.lane.b32.xlu0 %v745_v39, %s2574_s1  ;;  %v1109_v38 = vsel %vm874_vm0, %v1106_v15, %v1108_v34  ;;  %v1093_v39 = vsel %vm874_vm0, %v1090_v16, %v1092_v35  ;;  %v3394_v16 = vld [vmem:[%s3061_s17 + $0x70] sm:$0xff] }
 0x17f   : > { %1286 = vrot.lane.b32.xlu1 %v897_v44, %s2575_s16  ;;  %1270 = vrot.lane.b32.xlu0 %v881_v45, %s2575_s16 }
 0x183   : > { %833 = vrot.lane.b32.xlu1 %v3246_v9, %s2568_s21  ;;  %817 = vrot.lane.b32.xlu0 %v3249_v10, %s2568_s21 }
 0x187   : > { %1058 = vrot.lane.b32.xlu1 %v788_v17, %s2571_s22  ;;  %1042 = vrot.lane.b32.xlu0 %v780_v19, %s2571_s22  ;;  %v3397_v17 = vld [vmem:[%s3061_s17 + $0x30] sm:$0xff] }
 0x18b   : > { %1138 = vrot.lane.b32.xlu1 %v1107_v21, %s2572_s15  ;;  %1122 = vrot.lane.b32.xlu0 %v1091_v22, %s2572_s15  ;;  %v1110_v22 = vrot.slane %v3360_v58, 1 }
 0x18f   : > { %1288 = vrot.lane.b32.xlu1 %v899_v54, %s2575_s16  ;;  %1272 = vrot.lane.b32.xlu0 %v883_v55, %s2575_s16 }
 0x193   : > { %835 = vrot.lane.b32.xlu1 %v755_v25, %s2568_s21  ;;  %819 = vrot.lane.b32.xlu0 %v747_v26, %s2568_s21 }
 0x197   : > { %932 = vrot.lane.b32.xlu1 %v901_v32, %s2569_s28  ;;  %916 = vrot.lane.b32.xlu0 %v885_v33, %s2569_s28 }
 0x19b   : > { %1140 = vrot.lane.b32.xlu1 %v1109_v38, %s2572_s15  ;;  %1124 = vrot.lane.b32.xlu0 %v1093_v39, %s2572_s15 }
 0x19d   : > { %v3315_v44 = vpop.permute.xlu1 %811  ;;  %v3317_v45 = vpop.permute.xlu0 %809 }
 0x19f   : > { %1187 = vrot.lane.b32.xlu1 %v3196_v50, %s2573_s12  ;;  %1171 = vrot.lane.b32.xlu0 %v3199_v51, %s2573_s12 }
 0x1a1   : > { %v3329_v48 = vpop.permute.xlu1 %827  ;;  %v3331_v49 = vpop.permute.xlu0 %825 }
 0x1a3   : > { %934 = vrot.lane.b32.xlu1 %v903_v46, %s2569_s28  ;;  %918 = vrot.lane.b32.xlu0 %v887_v47, %s2569_s28 }
 0x1a5   : > { %v3335_v52 = vpop.permute.xlu1 %924  ;;  %v3337_v53 = vpop.permute.xlu0 %908 }
 0x1a7   : > { %996 = vrot.lane.b32.xlu1 %v3282_v30, %s2570_s24  ;;  %980 = vrot.lane.b32.xlu0 %v3285_v31, %s2570_s24  ;;  %v3433_v30 = vld [vmem:[%s3044_s18 + $0x38] sm:$0xff] }
 0x1a8   : > { %v3438_v31 = vld [vmem:[%s3061_s17 + $0x78] sm:$0xff] }
 0x1a9   : > { %v3343_v54 = vpop.permute.xlu1 %926  ;;  %v3345_v55 = vpop.permute.xlu0 %910 }
 0x1ab   : > { %1189 = vrot.lane.b32.xlu1 %v3270_v23, %s2573_s12  ;;  %1173 = vrot.lane.b32.xlu0 %v3273_v24, %s2573_s12  ;;  %v3486_v23 = vld [vmem:[%s3055_s30] sm:$0xff] }
 0x1ac   : > { %4001 = vst [vmem:[#allocation45_spill] sm:$0xff] %v3486_v23  ;;  %v3949_v20 = vrot.slane %v3486_v23, 1 }
 0x1ad   : > { %v3351_v56 = vpop.permute.xlu1 %988  ;;  %v3353_v57 = vpop.permute.xlu0 %972 }
 0x1af   : > { %1237 = vrot.lane.b32.xlu1 %v3246_v9, %s2574_s1  ;;  %1221 = vrot.lane.b32.xlu0 %v3249_v10, %s2574_s1 }
 0x1b1   : > { %v3365_v60 = vpop.permute.xlu1 %990  ;;  %v3367_v61 = vpop.permute.xlu0 %974 }
 0x1b3   : > { %998 = vrot.lane.b32.xlu1 %v3360_v58, %s2570_s24  ;;  %982 = vrot.lane.b32.xlu0 %v3363_v59, %s2570_s24 }
 0x1b5   : > { %v3375_v0 = vpop.permute.xlu1 %1052  ;;  %v3377_v1 = vpop.permute.xlu0 %1036 }
 0x1b7   : > { %1060 = vrot.lane.b32.xlu1 %v789_v62, %s2571_s22  ;;  %1044 = vrot.lane.b32.xlu0 %v781_v63, %s2571_s22  ;;  %v3430_v63 = vld [vmem:[%s3044_s18 + $0x78] sm:$0xff]  ;;  %s692_s18 = scalar_lea.vmem [#allocation17], %s1966_s9 }
 0x1b8   : > { %s1680_s13 = sshll.u32 %s692_s18, 4  ;;  %s3847_s13 = int_to_ptr.vmem [resolvable:$true] %s1680_s13 }
 0x1b9   : > { %v3381_v9 = vpop.permute.xlu1 %829  ;;  %v3383_v10 = vpop.permute.xlu0 %813  ;;  %s2457_s14 = scalar_lea.vmem %s3847_s13, 1024 }
 0x1ba   : > { %p2458_p4 = scmp.ne.s32.totalorder %s3847_s13, %s2457_s14 }
 0x1bb   : > { %1239 = vrot.lane.b32.xlu1 %v755_v25, %s2574_s1  ;;  %1223 = vrot.lane.b32.xlu0 %v747_v26, %s2574_s1  ;;  %v1094_v25 = vrot.slane %v3363_v59, 1  ;;  %v790_v26 = vld [vmem:[%s3075_s19 + $0x68] sm:$0xff] }
 0x1bc   : > { %p2459_p11 = pnand %p2458_p4, %p4024_p12 }
 0x1bd   : > { %v3387_v11 = vpop.permute.xlu1 %1054  ;;  %v3389_v15 = vpop.permute.xlu0 %1038  ;;  %v1095_v38 = vsel %vm874_vm0, %v1092_v35, %v1094_v25  ;;  %v904_v35 = vrot.slane %v3430_v63, 1 }
 0x1be   : > { %p2460_p6 = pneg %p2459_p11 }
 0x1bf   : > { %1290 = vrot.lane.b32.xlu1 %v901_v32, %s2575_s16  ;;  %1274 = vrot.lane.b32.xlu0 %v885_v33, %s2575_s16  ;;  %v1111_v33 = vsel %vm874_vm0, %v1108_v34, %v1110_v22  ;;  %v3441_v34 = vld [vmem:[%s3061_s17 + $0x38] sm:$0xff] }
 0x1c1   : > { %v3399_v19 = vpop.permute.xlu1 %1134  ;;  %v3401_v21 = vpop.permute.xlu0 %1118 }
 0x1c3   : > { %837 = vrot.lane.b32.xlu1 %v3394_v16, %s2568_s21  ;;  %821 = vrot.lane.b32.xlu0 %v3397_v17, %s2568_s21 }
 0x1c5   : > { %v3411_v29 = vpop.permute.xlu1 %831  ;;  %v3413_v32 = vpop.permute.xlu0 %815 }
 0x1c7   : > { %1062 = vrot.lane.b32.xlu1 %v790_v26, %s2571_s22  ;;  %1046 = vrot.lane.b32.xlu0 %v782_v27, %s2571_s22  ;;  %v888_v26 = vrot.slane %v3433_v30, 1 }
 0x1c9   : > { %v929_v39 = vpop.permute.xlu1 %928  ;;  %v913_v58 = vpop.permute.xlu0 %912 }
 0x1cb   : > { %1142 = vrot.lane.b32.xlu1 %v1111_v33, %s2572_s15  ;;  %1126 = vrot.lane.b32.xlu0 %v1095_v38, %s2572_s15  ;;  %v3450_v38 = vld [vmem:[%s3068_s23 + $0x70] sm:$0xff] }
 0x1cc   : > { %v3947_v6 = vrot.slane %v3450_v38, 1 }
 0x1cd   : > { %v3425_v59 = vpop.permute.xlu1 %1136  ;;  %v3427_v62 = vpop.permute.xlu0 %1120 }
 0x1cf   : > { %1292 = vrot.lane.b32.xlu1 %v903_v46, %s2575_s16  ;;  %1276 = vrot.lane.b32.xlu0 %v887_v47, %s2575_s16  ;;  %v3462_v46 = vsel %vm874_vm0, %v902_v42, %v904_v35  ;;  %v3467_v47 = vsel %vm874_vm0, %v886_v43, %v888_v26  ;;  %v1113_v42 = vsel %vm874_vm0, %v1110_v22, %v3947_v6 }
 0x1d0   : > { %v1097_v43 = vsel %vm874_vm0, %v1094_v25, %v3946_v18  ;;  %v3502_v22 = vsel %vm874_vm0, %v904_v35, %v3949_v20  ;;  %v4002_v25 = vrot.slane %v3092_v4, 1  ;;  %v1329_v35 = vsel %vm1318_vm2, %v3108_v12, %v3381_v9 }
 0x1d1   : > { %v3445_v27 = vpop.permute.xlu1 %1183  ;;  %v3447_v33 = vpop.permute.xlu0 %1167 }
 0x1d3   : > { %839 = vrot.lane.b32.xlu1 %v3438_v31, %s2568_s21  ;;  %823 = vrot.lane.b32.xlu0 %v3441_v34, %s2568_s21 }
 0x1d5   : > { %v3471_v14 = vpop.permute.xlu1 %930  ;;  %v3473_v2 = vpop.permute.xlu0 %914 }
 0x1d7   : > { %936 = vrot.lane.b32.xlu1 %v3462_v46, %s2569_s28  ;;  %920 = vrot.lane.b32.xlu0 %v3467_v47, %s2569_s28 }
 0x1d9   : > { %v993_v3 = vpop.permute.xlu1 %992  ;;  %v977_v24 = vpop.permute.xlu0 %976 }
 0x1db   : > { %1144 = vrot.lane.b32.xlu1 %v1113_v42, %s2572_s15  ;;  %1128 = vrot.lane.b32.xlu0 %v1097_v43, %s2572_s15  ;;  %v3507_v42 = vsel %vm874_vm0, %v888_v26, %v4002_v25  ;;  %v1321_v26 = vsel %vm1318_vm2, %v3111_v13, %v3383_v10  ;;  %v1346_v25 = vsel %vm1335_vm3, %v1329_v35, %v929_v39 }
 0x1dc   : > { %4003 = vst [vmem:[#allocation46_spill] sm:$0xff] %v3507_v42  ;;  %v1338_v20 = vsel %vm1335_vm3, %v1321_v26, %v913_v58  ;;  %v1327_v39 = vsel %vm1318_vm2, %v3092_v4, %v3331_v49  ;;  %v3577_v58 = vld [vmem:[%s3068_s23 + $0x38] sm:$0xff]  ;;  %v1330_v35 = vsel %vm1318_vm2, %v3164_v36, %v3411_v29  ;;  %v1322_v26 = vsel %vm1318_vm2, %v3167_v37, %v3413_v32 }
 0x1dd   : > { %v3491_v51 = vpop.permute.xlu1 %1185  ;;  %v3493_v50 = vpop.permute.xlu0 %1169  ;;  %v1355_v12 = vsel %vm1352_vm4, %v1338_v20, %v977_v24 }
 0x1df   : > { %1191 = vrot.lane.b32.xlu1 %v3306_v40, %s2573_s12  ;;  %1175 = vrot.lane.b32.xlu0 %v3309_v41, %s2573_s12  ;;  %v1363_v40 = vsel %vm1352_vm4, %v1346_v25, %v993_v3  ;;  %v1344_v3 = vsel %vm1335_vm3, %v1327_v39, %v3335_v52  ;;  %v1347_v25 = vsel %vm1335_vm3, %v1330_v35, %v3471_v14 }
 0x1e0   : > { %v1328_v14 = vsel %vm1318_vm2, %v3095_v5, %v3329_v48 }
 0x1e1   : > { %v1234_v43 = vpop.permute.xlu1 %1233  ;;  %v1218_v18 = vpop.permute.xlu0 %1217 }
 0x1e3   : > { %938 = vrot.lane.b32.xlu1 %v3502_v22, %s2569_s28  ;;  %922 = vrot.lane.b32.xlu0 %v3507_v42, %s2569_s28  ;;  %v1319_v42 = vsel %vm1318_vm2, %v3099_v7, %v3317_v45  ;;  %v1361_v7 = vsel %vm1352_vm4, %v1344_v3, %v3351_v56 }
 0x1e4   : > { %v1336_v20 = vsel %vm1335_vm3, %v1319_v42, %v3337_v53  ;;  %v1378_v45 = vsel %vm1369_vm5, %v1361_v7, %v3375_v0  ;;  %v3572_v0 = vld [vmem:[%s3068_s23 + $0x78] sm:$0xff]  ;;  %s1665_s23 = scalar_lea.sflag [#allocation4], %s3040_s27 }
 0x1e5   : > { %v3513_v6 = vpop.permute.xlu1 %994  ;;  %v3515_v41 = vpop.permute.xlu0 %978  ;;  %v1395_v52 = vsel %vm1386_vm6, %v1378_v45, %v3399_v19 }
 0x1e6   : > { %v1412_v56 = vsel %vm1403_vm7, %v1395_v52, %v3445_v27  ;;  %v791_v27 = vld [vmem:[%s3075_s19 + $0x70] sm:$0xff] }
 0x1e7   : > { %1000 = vrot.lane.b32.xlu1 %v3450_v38, %s2570_s24  ;;  %984 = vrot.lane.b32.xlu0 %v3453_v28, %s2570_s24 }
 0x1e9   : > { %v1057_v9 = vpop.permute.xlu1 %1056  ;;  %v1041_v23 = vpop.permute.xlu0 %1040 }
 0x1ea   : > { %v3532_v13 = vsel %vm1369_vm5, %v1363_v40, %v1057_v9  ;;  %v3535_v10 = vsel %vm1369_vm5, %v1355_v12, %v1041_v23  ;;  %v1353_v23 = vsel %vm1352_vm4, %v1336_v20, %v3353_v57  ;;  %v1339_v12 = vsel %vm1335_vm3, %v1322_v26, %v3473_v2  ;;  %v4011_v26 = vld [vmem:[#allocation45_spill] sm:$0xff] }
 0x1eb   : > { %1193 = vrot.lane.b32.xlu1 %v3430_v63, %s2573_s12  ;;  %1177 = vrot.lane.b32.xlu0 %v3433_v30, %s2573_s12  ;;  %v1370_v49 = vsel %vm1369_vm5, %v1353_v23, %v3377_v1  ;;  %v1429_v1 = vsel %vm1420_vm8, %v1412_v56, %v1234_v43  ;;  %v783_v43 = vld [vmem:[%s3075_s19 + $0x30] sm:$0xff]  ;;  %v1364_v9 = vsel %vm1352_vm4, %v1347_v25, %v3513_v6  ;;  %v1098_v20 = vrot.slane %v3577_v58, 1  ;;  %v784_v23 = vld [vmem:[%s3075_s19 + $0x38] sm:$0xff] }
 0x1ec   : > { %v1387_v53 = vsel %vm1386_vm6, %v1370_v49, %v3401_v21  ;;  %v1356_v36 = vsel %vm1352_vm4, %v1339_v12, %v3515_v41  ;;  %v1320_v2 = vsel %vm1318_vm2, %v3102_v8, %v3315_v44  ;;  %v1345_v6 = vsel %vm1335_vm3, %v1328_v14, %v3343_v54  ;;  %v740_v25 = vld [vmem:[%s3055_s30 + $0x8] sm:$0xff] }
 0x1ed   : > { %v1236_v24 = vpop.permute.xlu1 %1235  ;;  %v1220_v40 = vpop.permute.xlu0 %1219  ;;  %v1404_v57 = vsel %vm1403_vm7, %v1387_v53, %v3447_v33  ;;  %v1337_v41 = vsel %vm1335_vm3, %v1320_v2, %v3345_v55  ;;  %v1362_v8 = vsel %vm1352_vm4, %v1345_v6, %v3365_v60  ;;  %v4005_v49 = vrot.slane %v3453_v28, 1  ;;  %v776_v53 = vld [vmem:[%s611_s3] sm:$0xff]  ;;  %s2576_s3 = smov [#allocation17]  }
 0x1ee   : > { %v1421_v19 = vsel %vm1420_vm8, %v1404_v57, %v1218_v18  ;;  %v1354_v44 = vsel %vm1352_vm4, %v1337_v41, %v3367_v61  ;;  %v1379_v54 = vsel %vm1369_vm5, %v1362_v8, %v3387_v11  ;;  %v1114_v11 = vrot.slane %v3572_v0, 1  ;;  %v4006_v57 = vld [vmem:[#allocation39_spill] sm:$0xff]  ;;  %v4012_v12 = vld [vmem:[#allocation41_spill] sm:$0xff] }
 0x1ef   : > { %1241 = vrot.lane.b32.xlu1 %v3394_v16, %s2574_s1  ;;  %1225 = vrot.lane.b32.xlu0 %v3397_v17, %s2574_s1  ;;  %v1371_v55 = vsel %vm1369_vm5, %v1354_v44, %v3389_v15  ;;  %v792_v15 = vld [vmem:[%s3075_s19 + $0x78] sm:$0xff]  ;;  %v1099_v52 = vsel %vm874_vm0, %v4005_v49, %v1098_v20  ;;  %v1116_v56 = vrot.slane %v776_v53, 1  ;;  %s2461_s19 = sshll.u32 %s2576_s3, 4  ;;  %s2462_s19 = int_to_ptr.vmem [resolvable:$false] %s2461_s19 }
 0x1f0   : > { %v1388_v60 = vsel %vm1386_vm6, %v1371_v55, %v3427_v62  ;;  %v1266_v55 = vrot.slane %v740_v25, 1  ;;  %s2463_s21 = scalar_lea.vmem %s2462_s19, 2048  ;;  %p2464_p5 = scmp.lt.s32.totalorder %s3847_s13, %s2462_s19 }
 0x1f1   : > { %v1287_v16 = vpop.permute.xlu1 %1286  ;;  %v1271_v21 = vpop.permute.xlu0 %1270  ;;  %p2465_p2 = scmp.lt.s32.totalorder %s2463_s21, %s2457_s14 }
 0x1f2   : > { %v1446_v17 = vsel %vm1437_vm9, %v1429_v1, %v1287_v16  ;;  %v1438_v42 = vsel %vm1437_vm9, %v1421_v19, %v1271_v21  ;;  %v4007_v1 = vld [vmem:[#allocation40_spill] sm:$0xff] }
 0x1f3   : > { %1002 = vrot.lane.b32.xlu1 %v3572_v0, %s2570_s24  ;;  %2034 = vmatprep.mubr.msk.f32.mxu1 %vm1466_vm10, %v1446_v17  ;;  %v1117_v17 = vsel %vm874_vm0, %v1114_v11, %v1116_v56  ;;  %p2466_p13 = por %p2465_p2, %p2464_p5 }
 0x1f4   : > { %986 = vrot.lane.b32.xlu0 %v3577_v58, %s2570_s24  ;;  %2022 = vmatprep.mubr.msk.f32.mxu0 %vm1466_vm10, %v1438_v42  ;;  %v4008_v58 = vld [vmem:[#allocation46_spill] sm:$0xff] }
 0x1f5   : > { %v834_v18 = vpop.permute.xlu1 %833  ;;  %v818_v33 = vpop.permute.xlu0 %817  ;;  %p2467_p7 = pnand %p2466_p13, %p2460_p6 }
 0x1f6   : > { %v1331_v0 = vsel %vm1318_vm2, %v4006_v57, %v834_v18  ;;  %v4009_v18 = vld [vmem:[#allocation38_spill] sm:$0xff] }
 0x1f7   : > { %1064 = vrot.lane.b32.xlu1 %v791_v27, %s2571_s22 }
 0x1f8   : > { %1048 = vrot.lane.b32.xlu0 %v783_v43, %s2571_s22 }
 0x1f9   : > { %v1059_v29 = vpop.permute.xlu1 %1058  ;;  %v1043_v39 = vpop.permute.xlu0 %1042 }
 0x1fa   : > { %v3606_v37 = vsel %vm1369_vm5, %v1364_v9, %v1059_v29  ;;  %v3609_v32 = vsel %vm1369_vm5, %v1356_v36, %v1043_v39  ;;  %v4013_v36 = vld [vmem:[#allocation42_spill] sm:$0xff] }
 0x1fb   : > { %1243 = vrot.lane.b32.xlu1 %v3438_v31, %s2574_s1  ;;  %v1396_v31 = vsel %vm1386_vm6, %v1379_v54, %v3425_v59 }
 0x1fc   : > { %1227 = vrot.lane.b32.xlu0 %v3441_v34, %s2574_s1  ;;  %v1413_v61 = vsel %vm1403_vm7, %v1396_v31, %v3491_v51  ;;  %v1405_v34 = vsel %vm1403_vm7, %v1388_v60, %v3493_v50  ;;  %v4014_v31 = vld [vmem:[#allocation35_spill] sm:$0xff]  ;;  %v759_v60 = vld [vmem:[%s593_s29 + $0x8] sm:$0xff] }
 0x1fd   : > { %v3629_v48 = vpop.permute.xlu1 %1138  ;;  %v3631_v3 = vpop.permute.xlu0 %1122  ;;  %v1430_v59 = vsel %vm1420_vm8, %v1413_v61, %v1236_v24  ;;  %v1422_v62 = vsel %vm1420_vm8, %v1405_v34, %v1220_v40 }
 0x1ff   : > { %1294 = vrot.lane.b32.xlu1 %v3462_v46, %s2575_s16 }
 0x200   : > { %1278 = vrot.lane.b32.xlu0 %v3467_v47, %s2575_s16  ;;  %v4004_v47 = vrot.slane %v3450_v38, 1  ;;  %v1323_v38 = vsel %vm1318_vm2, %v4007_v1, %v818_v33  ;;  %v4010_v33 = vrot.slane %v4009_v18, 1  ;;  %v1389_v1 = vsel %vm1386_vm6, %v3535_v10, %v3631_v3 }
 0x201   : > { %v1289_v46 = vpop.permute.xlu1 %1288  ;;  %v1273_v7 = vpop.permute.xlu0 %1272 }
 0x202   : > { %v1447_v51 = vsel %vm1437_vm9, %v1430_v59, %v1289_v46  ;;  %v1439_v50 = vsel %vm1437_vm9, %v1422_v62, %v1273_v7  ;;  %v1115_v24 = vsel %vm874_vm0, %v4004_v47, %v1114_v11  ;;  %v1101_v43 = vsel %vm874_vm0, %v1098_v20, %v4010_v33  ;;  %v741_v11 = vld [vmem:[%s3055_s30 + $0x10] sm:$0xff]  ;;  %v4017_v7 = vld [vmem:[#allocation36_spill] sm:$0xff] }
 0x203   : > { %1066 = vrot.lane.b32.xlu1 %v792_v15, %s2571_s22  ;;  %2035 = vmatmul.mubr.msk.f32.vlgmr.msra.gmra.mrb[0].mxu1 %vm1466_vm10, %v1447_v51  ;;  %v4016_v15 = vrot.slane %v4011_v26, 1  ;;  %v1268_v62 = vrot.slane %v741_v11, 1 }
 0x204   : > { %1050 = vrot.lane.b32.xlu0 %v784_v23, %s2571_s22  ;;  %2023 = vmatmul.mubr.msk.f32.vlgmr.msra.gmra.mrb[0].mxu0 %vm1466_vm10, %v1439_v50 }
 0x205   : > { %v836_v40 = vpop.permute.xlu1 %835  ;;  %v820_v45 = vpop.permute.xlu0 %819  ;;  %v1267_v59 = vsel %vm874_vm0, %v4016_v15, %v1266_v55  ;;  %v1269_v23 = vsel %vm874_vm0, %v1266_v55, %v1268_v62 }
 0x206   : > { %v1332_v9 = vsel %vm1318_vm2, %v4012_v12, %v836_v40  ;;  %v1324_v29 = vsel %vm1318_vm2, %v4013_v36, %v820_v45  ;;  %v4018_v40 = vld [vmem:[#allocation37_spill] sm:$0xff] }
 0x207   : > { %1146 = vrot.lane.b32.xlu1 %v1115_v24, %s2572_s15 }
 0x208   : > { %1130 = vrot.lane.b32.xlu0 %v1099_v52, %s2572_s15 }
 0x209   : > { %v933_v19 = vpop.permute.xlu1 %932  ;;  %v917_v16 = vpop.permute.xlu0 %916 }
 0x20a   : > { %v1348_v28 = vsel %vm1335_vm3, %v1331_v0, %v933_v19  ;;  %v1340_v21 = vsel %vm1335_vm3, %v1323_v38, %v917_v16  ;;  %v1397_v0 = vsel %vm1386_vm6, %v3532_v13, %v3629_v48 }
 0x20b   : > { %1296 = vrot.lane.b32.xlu1 %v3502_v22, %s2575_s16 }
 0x20c   : > { %1280 = vrot.lane.b32.xlu0 %v4008_v58, %s2575_s16 }
 0x20d   : > { %v3682_v42 = vpop.permute.xlu1 %1140  ;;  %v3684_v27 = vpop.permute.xlu0 %1124 }
 0x20f   : > { %1148 = vrot.lane.b32.xlu1 %v1117_v17, %s2572_s15 }
 0x210   : > { %1132 = vrot.lane.b32.xlu0 %v1101_v43, %s2572_s15 }
 0x211   : > { %v1188_v35 = vpop.permute.xlu1 %1187  ;;  %v1172_v22 = vpop.permute.xlu0 %1171 }
 0x212   : > { %v1414_v38 = vsel %vm1403_vm7, %v1397_v0, %v1188_v35  ;;  %v1406_v19 = vsel %vm1403_vm7, %v1389_v1, %v1172_v22 }
 0x213   : > { %1195 = vrot.lane.b32.xlu1 %v4011_v26, %s2573_s12  ;;  %v1398_v26 = vsel %vm1386_vm6, %v3606_v37, %v3682_v42  ;;  %v4019_v42 = vld [vmem:[#allocation43_spill] sm:$0xff] }
 0x214   : > { %1179 = vrot.lane.b32.xlu0 %v3092_v4, %s2573_s12  ;;  %v758_v4 = vld [vmem:[%s593_s29] sm:$0xff]  ;;  %s3845_s29 = scalar_lea.hbm %s4023_s26, %s1990_s11 }
 0x215   : > { %v935_v39 = vpop.permute.xlu1 %934  ;;  %v919_v2 = vpop.permute.xlu0 %918 }
 0x216   : > { %v1349_v14 = vsel %vm1335_vm3, %v1332_v9, %v935_v39  ;;  %v1341_v6 = vsel %vm1335_vm3, %v1324_v29, %v919_v2 }
 0x217   : > { %1197 = vrot.lane.b32.xlu1 %v740_v25, %s2573_s12  ;;  %v1390_v25 = vsel %vm1386_vm6, %v3609_v32, %v3684_v27 }
 0x218   : > { %1181 = vrot.lane.b32.xlu0 %v3095_v5, %s2573_s12  ;;  %v4015_v5 = vld [vmem:[#allocation34_spill] sm:$0xff] }
 0x219   : > { %v997_v41 = vpop.permute.xlu1 %996  ;;  %v981_v8 = vpop.permute.xlu0 %980 }
 0x21a   : > { %v1365_v44 = vsel %vm1352_vm4, %v1348_v28, %v997_v41  ;;  %v1357_v54 = vsel %vm1352_vm4, %v1340_v21, %v981_v8 }
 0x21b   : > { %1245 = vrot.lane.b32.xlu1 %v758_v4, %s2574_s1  ;;  %v4020_v4 = vld [vmem:[#allocation44_spill] sm:$0xff] }
 0x21c   : > { %1229 = vrot.lane.b32.xlu0 %v4014_v31, %s2574_s1 }
 0x21d   : > { %v1190_v61 = vpop.permute.xlu1 %1189  ;;  %v1174_v34 = vpop.permute.xlu0 %1173 }
 0x21e   : > { %v1415_v12 = vsel %vm1403_vm7, %v1398_v26, %v1190_v61  ;;  %v1407_v9 = vsel %vm1403_vm7, %v1390_v25, %v1174_v34 }
 0x21f   : > { %1247 = vrot.lane.b32.xlu1 %v759_v60, %s2574_s1 }
 0x220   : > { %1231 = vrot.lane.b32.xlu0 %v4015_v5, %s2574_s1 }
 0x221   : > { %v1238_v20 = vpop.permute.xlu1 %1237  ;;  %v1222_v46 = vpop.permute.xlu0 %1221 }
 0x222   : > { %v1431_v16 = vsel %vm1420_vm8, %v1414_v38, %v1238_v20  ;;  %v1423_v28 = vsel %vm1420_vm8, %v1406_v19, %v1222_v46 }
 0x223   : > { %1298 = vrot.lane.b32.xlu1 %v1267_v59, %s2575_s16 }
 0x224   : > { %1282 = vrot.lane.b32.xlu0 %v4017_v7, %s2575_s16 }
 0x225   : > { %v999_v51 = vpop.permute.xlu1 %998  ;;  %v983_v50 = vpop.permute.xlu0 %982 }
 0x226   : > { %v1366_v47 = vsel %vm1352_vm4, %v1349_v14, %v999_v51  ;;  %v1358_v24 = vsel %vm1352_vm4, %v1341_v6, %v983_v50 }
 0x227   : > { %1300 = vrot.lane.b32.xlu1 %v1269_v23, %s2575_s16 }
 0x228   : > { %1284 = vrot.lane.b32.xlu0 %v4018_v40, %s2575_s16 }
 0x229   : > { %v1061_v45 = vpop.permute.xlu1 %1060  ;;  %v1045_v49 = vpop.permute.xlu0 %1044 }
 0x22a   : > { %v3731_v52 = vsel %vm1369_vm5, %v1365_v44, %v1061_v45  ;;  %v3734_v53 = vsel %vm1369_vm5, %v1357_v54, %v1045_v49 }
 0x22d   : > { %v1240_v56 = vpop.permute.xlu1 %1239  ;;  %v1224_v57 = vpop.permute.xlu0 %1223 }
 0x22e   : > { %v1432_v36 = vsel %vm1420_vm8, %v1415_v12, %v1240_v56  ;;  %v1424_v29 = vsel %vm1420_vm8, %v1407_v9, %v1224_v57 }
 0x231   : > { %v1291_v21 = vpop.permute.xlu1 %1290  ;;  %v1275_v58 = vpop.permute.xlu0 %1274 }
 0x232   : > { %v1448_v17 = vsel %vm1437_vm9, %v1431_v16, %v1291_v21  ;;  %v1440_v18 = vsel %vm1437_vm9, %v1423_v28, %v1275_v58 }
 0x233   : > { %2025 = vmatprep.mubr.msk.f32.mxu0 %vm1466_vm10, %v1440_v18  ;;  %2037 = vmatprep.mubr.msk.f32.mxu1 %vm1466_vm10, %v1448_v17 }
 0x235   : > { %v838_v13 = vpop.permute.xlu1 %837  ;;  %v822_v10 = vpop.permute.xlu0 %821 }
 0x236   : > { %v1333_v27 = vsel %vm1318_vm2, %v4019_v42, %v838_v13  ;;  %v1325_v41 = vsel %vm1318_vm2, %v4020_v4, %v822_v10 }
 0x239   : > { %v1063_v48 = vpop.permute.xlu1 %1062  ;;  %v1047_v3 = vpop.permute.xlu0 %1046 }
 0x23a   : > { %v1383_v33 = vsel %vm1369_vm5, %v1366_v47, %v1063_v48  ;;  %v1375_v43 = vsel %vm1369_vm5, %v1358_v24, %v1047_v3 }
 0x23d   : > { %v1143_v35 = vpop.permute.xlu1 %1142  ;;  %v1127_v22 = vpop.permute.xlu0 %1126 }
 0x23e   : > { %v1399_v45 = vsel %vm1386_vm6, %v3731_v52, %v1143_v35  ;;  %v1391_v49 = vsel %vm1386_vm6, %v3734_v53, %v1127_v22 }
 0x241   : > { %v1293_v39 = vpop.permute.xlu1 %1292  ;;  %v1277_v2 = vpop.permute.xlu0 %1276 }
 0x242   : > { %v1449_v14 = vsel %vm1437_vm9, %v1432_v36, %v1293_v39  ;;  %v1441_v6 = vsel %vm1437_vm9, %v1424_v29, %v1277_v2 }
 0x243   : > { %2026 = vmatmul.mubr.msk.f32.gmra.mrb[2].mxu0 %vm1466_vm10, %v1441_v6  ;;  %2038 = vmatmul.mubr.msk.f32.gmra.mrb[2].mxu1 %vm1466_vm10, %v1449_v14 }
 0x245   : > { %v3766_v37 = vpop.permute.xlu1 %839  ;;  %v3768_v32 = vpop.permute.xlu0 %823 }
 0x249   : > { %v937_v8 = vpop.permute.xlu1 %936  ;;  %v921_v44 = vpop.permute.xlu0 %920 }
 0x24a   : > { %v1350_v54 = vsel %vm1335_vm3, %v1333_v27, %v937_v8  ;;  %v1342_v55 = vsel %vm1335_vm3, %v1325_v41, %v921_v44  ;;  %v1334_v41 = vsel %vm1318_vm2, %v3430_v63, %v3766_v37 }
 0x24d   : > { %v1145_v31 = vpop.permute.xlu1 %1144  ;;  %v1129_v60 = vpop.permute.xlu0 %1128 }
 0x24e   : > { %v1400_v17 = vsel %vm1386_vm6, %v1383_v33, %v1145_v31  ;;  %v1392_v18 = vsel %vm1386_vm6, %v1375_v43, %v1129_v60  ;;  %v1326_v31 = vsel %vm1318_vm2, %v3433_v30, %v3768_v32 }
 0x251   : > { %v1192_v61 = vpop.permute.xlu1 %1191  ;;  %v1176_v34 = vpop.permute.xlu0 %1175 }
 0x252   : > { %v1416_v56 = vsel %vm1403_vm7, %v1399_v45, %v1192_v61  ;;  %v1408_v57 = vsel %vm1403_vm7, %v1391_v49, %v1176_v34 }
 0x255   : > { %v939_v11 = vpop.permute.xlu1 %938  ;;  %v923_v5 = vpop.permute.xlu0 %922 }
 0x256   : > { %v1343_v61 = vsel %vm1335_vm3, %v1326_v31, %v923_v5 }
 0x259   : > { %v1001_v15 = vpop.permute.xlu1 %1000  ;;  %v985_v59 = vpop.permute.xlu0 %984 }
 0x25a   : > { %v1367_v14 = vsel %vm1352_vm4, %v1350_v54, %v1001_v15  ;;  %v1359_v42 = vsel %vm1352_vm4, %v1342_v55, %v985_v59  ;;  %v1351_v54 = vsel %vm1335_vm3, %v1334_v41, %v939_v11 }
 0x25d   : > { %v1194_v62 = vpop.permute.xlu1 %1193  ;;  %v1178_v20 = vpop.permute.xlu0 %1177 }
 0x25e   : > { %v1417_v13 = vsel %vm1403_vm7, %v1400_v17, %v1194_v62  ;;  %v1409_v10 = vsel %vm1403_vm7, %v1392_v18, %v1178_v20 }
 0x261   : > { %v1242_v46 = vpop.permute.xlu1 %1241  ;;  %v1226_v7 = vpop.permute.xlu0 %1225 }
 0x262   : > { %v1433_v0 = vsel %vm1420_vm8, %v1416_v56, %v1242_v46  ;;  %v1425_v38 = vsel %vm1420_vm8, %v1408_v57, %v1226_v7  ;;  %v1967_v56 = vld [vmem:[#allocation16] ss:$0 sm:$0xff] }
 0x265   : > { %v1003_v23 = vpop.permute.xlu1 %1002 }
 0x266   : > { %v987_v51 = vpop.permute.xlu0 %986  ;;  %v1368_v34 = vsel %vm1352_vm4, %v1351_v54, %v1003_v23 }
 0x267   : > { %v1360_v59 = vsel %vm1352_vm4, %v1343_v61, %v987_v51 }
 0x269   : > { %v1065_v50 = vpop.permute.xlu1 %1064 }
 0x26a   : > { %v1049_v47 = vpop.permute.xlu0 %1048  ;;  %v1384_v27 = vsel %vm1369_vm5, %v1367_v14, %v1065_v50 }
 0x26b   : > { %v1376_v8 = vsel %vm1369_vm5, %v1359_v42, %v1049_v47 }
 0x26d   : > { %v1244_v24 = vpop.permute.xlu1 %1243 }
 0x26e   : > { %v1228_v40 = vpop.permute.xlu0 %1227  ;;  %v1434_v48 = vsel %vm1420_vm8, %v1417_v13, %v1244_v24 }
 0x26f   : > { %v1426_v35 = vsel %vm1420_vm8, %v1409_v10, %v1228_v40 }
 0x271   : > { %v1295_v1 = vpop.permute.xlu1 %1294 }
 0x272   : > { %v1450_v19 = vsel %vm1437_vm9, %v1433_v0, %v1295_v1  ;;  %v1279_v16 = vpop.permute.xlu0 %1278 }
 0x273   : > { %v1442_v28 = vsel %vm1437_vm9, %v1425_v38, %v1279_v16  ;;  %2040 = vmatprep.mubr.msk.f32.mxu1 %vm1466_vm10, %v1450_v19 }
 0x274   : > { %2028 = vmatprep.mubr.msk.f32.mxu0 %vm1466_vm10, %v1442_v28 }
 0x275   : > { %v1067_v52 = vpop.permute.xlu1 %1066 }
 0x276   : > { %v1051_v53 = vpop.permute.xlu0 %1050  ;;  %v1385_v62 = vsel %vm1369_vm5, %v1368_v34, %v1067_v52 }
 0x277   : > { %v1377_v20 = vsel %vm1369_vm5, %v1360_v59, %v1051_v53 }
 0x279   : > { %v1147_v21 = vpop.permute.xlu1 %1146 }
 0x27a   : > { %v1131_v58 = vpop.permute.xlu0 %1130  ;;  %v1401_v44 = vsel %vm1386_vm6, %v1384_v27, %v1147_v21 }
 0x27b   : > { %v1393_v60 = vsel %vm1386_vm6, %v1376_v8, %v1131_v58 }
 0x27d   : > { %v1297_v3 = vpop.permute.xlu1 %1296 }
 0x27e   : > { %v1451_v22 = vsel %vm1437_vm9, %v1434_v48, %v1297_v3  ;;  %v1281_v26 = vpop.permute.xlu0 %1280 }
 0x27f   : > { %v1443_v25 = vsel %vm1437_vm9, %v1426_v35, %v1281_v26  ;;  %2041 = vmatmul.mubr.msk.f32.gmra.mrb[4].mxu1 %vm1466_vm10, %v1451_v22 }
 0x280   : > { %2029 = vmatmul.mubr.msk.f32.gmra.mrb[4].mxu0 %vm1466_vm10, %v1443_v25 }
 0x281   : > { %v1149_v33 = vpop.permute.xlu1 %1148 }
 0x282   : > { %v1133_v43 = vpop.permute.xlu0 %1132  ;;  %v1402_v5 = vsel %vm1386_vm6, %v1385_v62, %v1149_v33 }
 0x283   : > { %v1394_v7 = vsel %vm1386_vm6, %v1377_v20, %v1133_v43 }
 0x285   : > { %v1196_v12 = vpop.permute.xlu1 %1195 }
 0x286   : > { %v1180_v9 = vpop.permute.xlu0 %1179  ;;  %v1418_v55 = vsel %vm1403_vm7, %v1401_v44, %v1196_v12 }
 0x287   : > { %v1410_v63 = vsel %vm1403_vm7, %v1393_v60, %v1180_v9 }
 0x289   : > { %v1198_v36 = vpop.permute.xlu1 %1197 }
 0x28a   : > { %v1182_v29 = vpop.permute.xlu0 %1181  ;;  %v1419_v23 = vsel %vm1403_vm7, %v1402_v5, %v1198_v36 }
 0x28b   : > { %v1411_v51 = vsel %vm1403_vm7, %v1394_v7, %v1182_v29 }
 0x28d   : > { %v1246_v39 = vpop.permute.xlu1 %1245 }
 0x28e   : > { %v1230_v2 = vpop.permute.xlu0 %1229  ;;  %v1435_v37 = vsel %vm1420_vm8, %v1418_v55, %v1246_v39 }
 0x28f   : > { %v1427_v30 = vsel %vm1420_vm8, %v1410_v63, %v1230_v2 }
 0x291   : > { %v1248_v6 = vpop.permute.xlu1 %1247 }
 0x292   : > { %v1232_v4 = vpop.permute.xlu0 %1231  ;;  %v1436_v50 = vsel %vm1420_vm8, %v1419_v23, %v1248_v6 }
 0x293   : > { %v1428_v24 = vsel %vm1420_vm8, %v1411_v51, %v1232_v4 }
 0x295   : > { %v1299_v15 = vpop.permute.xlu1 %1298 }
 0x296   : > { %v1452_v32 = vsel %vm1437_vm9, %v1435_v37, %v1299_v15  ;;  %v1283_v11 = vpop.permute.xlu0 %1282 }
 0x297   : > { %v1444_v46 = vsel %vm1437_vm9, %v1427_v30, %v1283_v11  ;;  %2043 = vmatprep.mubr.msk.f32.mxu1 %vm1466_vm10, %v1452_v32 }
 0x298   : > { %2031 = vmatprep.mubr.msk.f32.mxu0 %vm1466_vm10, %v1444_v46 }
 0x299   : > { %v1301_v47 = vpop.permute.xlu1 %1300 }
 0x29a   : > { %v1453_v40 = vsel %vm1437_vm9, %v1436_v50, %v1301_v47  ;;  %v1285_v45 = vpop.permute.xlu0 %1284 }
 0x29b   : > { %v1445_v49 = vsel %vm1437_vm9, %v1428_v24, %v1285_v45  ;;  %2044 = vmatmul.mubr.msk.f32.gmra.mrb[6].mxu1 %vm1466_vm10, %v1453_v40 }
 0x29c   : > { %2032 = vmatmul.mubr.msk.f32.gmra.mrb[6].mxu0 %vm1466_vm10, %v1445_v49 }
 0x2d6   : > { %v2036_v57 = vpop.f32.mrb[0].mxu1 }
 0x2d7   : > { %v2024_v0 = vpop.f32.mrb[0].mxu0  ;;  %v1621_v1 = vpop.f32.mrb[1].mxu1 }
 0x2d8   : > { %v1585_v38 = vpop.f32.mrb[1].mxu0  ;;  %v1622_v19 = vadd.f32 %v1967_v56, %v1621_v1 }
 0x2d9   : > { %v1586_v16 = vadd.f32 %v1967_v56, %v1585_v38 }
 0x2da   : > { %1660 = vst.msk [vmem:[%s692_s18 + $0x20] sm:$0xff] %vm1318_vm2, %v1622_v19 }
 0x2db   : > { %1656 = vst.msk [vmem:[%s692_s18] sm:$0xff] %vm1318_vm2, %v1586_v16 }
 0x316   : > { %v2027_v28 = vpop.f32.mrb[2].mxu0  ;;  %v2039_v52 = vpop.f32.mrb[2].mxu1 }
 0x317   : > { %v1594_v53 = vpop.f32.mrb[3].mxu0  ;;  %v1630_v21 = vpop.f32.mrb[3].mxu1 }
 0x318   : > { %v1595_v58 = vadd.f32 %v1967_v56, %v1594_v53  ;;  %v1631_v17 = vadd.f32 %v1967_v56, %v1630_v21 }
 0x31a   : > { %1657 = vst.msk [vmem:[%s692_s18 + $0x8] sm:$0xff] %vm1318_vm2, %v1595_v58  ;;  %1661 = vst.msk [vmem:[%s692_s18 + $0x28] sm:$0xff] %vm1318_vm2, %v1631_v17 }
 0x352   : > { %v2042_v18 = vpop.f32.mrb[4].mxu1 }
 0x353   : > { %v2030_v13 = vpop.f32.mrb[4].mxu0  ;;  %v1639_v10 = vpop.f32.mrb[5].mxu1 }
 0x354   : > { %v1603_v48 = vpop.f32.mrb[5].mxu0  ;;  %v1640_v3 = vadd.f32 %v1967_v56, %v1639_v10 }
 0x355   : > { %v1604_v35 = vadd.f32 %v1967_v56, %v1603_v48 }
 0x356   : > { %1662 = vst.msk [vmem:[%s692_s18 + $0x30] sm:$0xff] %vm1318_vm2, %v1640_v3 }
 0x357   : > { %1658 = vst.msk [vmem:[%s692_s18 + $0x10] sm:$0xff] %vm1318_vm2, %v1604_v35 }
 0x36e   : > { %v2045_v22 = vpop.f32.mrb[6].mxu1 }
 0x36f   : > { %v2033_v26 = vpop.f32.mrb[6].mxu0  ;;  %v1648_v25 = vpop.f32.mrb[7].mxu1 }
 0x370   : > { %v1612_v33 = vpop.f32.mrb[7].mxu0  ;;  %v1649_v43 = vadd.f32 %v1967_v56, %v1648_v25 }
 0x371   : > { %v1613_v12 = vadd.f32 %v1967_v56, %v1612_v33 }
 0x372   : > { %1663 = vst.msk [vmem:[%s692_s18 + $0x38] sm:$0xff] %vm1318_vm2, %v1649_v43 }
 0x373   : > { %1659 = vst.msk [vmem:[%s692_s18 + $0x18] sm:$0xff] %vm1318_vm2, %v1613_v12 }
 0x374   : > { %2470 = shalt.err (!%p2467_p7)
}
 0x375   : > { %s2471_s24 = scalar_lea.hbm %s3845_s29, 1024  ;;  %s2475_s12 = scalar_lea.hbm %s4023_s26, 2048 }
 0x376   : > { %p2472_p1 = scmp.ne.s32.totalorder %s3845_s29, %s2471_s24  ;;  %p2476_p10 = scmp.lt.u32.totalorder %s3845_s29, %s4023_s26 }
 0x377   : > { %p2477_p9 = scmp.lt.u32.totalorder %s2475_s12, %s2471_s24  ;;  %p2479_p4 = scmp.lt.u32.totalorder %s2471_s24, %s3845_s29 }
 0x378   : > { %p2473_p0 = pnand %p2472_p1, %p4024_p12 }
 0x379   : > { %p2478_p3 = por %p2477_p9, %p2476_p10 }
 0x37a   : > { %p2474_p8 = pneg %p2473_p0 }
 0x37b   : > { %p2480_p11 = por %p2479_p4, %p2478_p3 }
 0x37d   : > { %p2481_p6 = pnand %p2480_p11, %p2474_p8 }
 0x37f   : > { %2484 = shalt.err (!%p2481_p6)
}
 0x380   : > { %s2577_s9 = smov 128  }
 0x381   : > { %2086 = dma.vmem_to_hbm [thread:$0]  (%p4024_p12), %s3847_s13, 1024, %s3845_s29, %s1665_s23, %s2577_s9, %s2577_s9, %s2569_s28  }
 0x382 PF: > { %s4025_s18 = sld [smem:[#allocation24_spill]]  ;;  %s4026_s20 = sld [smem:[#allocation33_spill]] }
 0x383   : > { %s4027_s11 = sld [smem:[#allocation28_spill]] }
 0x388   : > { %s1695_s30 = sand.u32 1, %s4025_s18   ;;  %p4028_p5 = scmp.ne.s32.totalorder %s4026_s20, 0 }
 0x389   : > { %p4029_p2 = scmp.ge.s32.totalorder %s4027_s11, 2  ;;  %s1696_s17 = scalar_lea.sflag [#allocation4], %s1695_s30 }
 0x38b   : > { %p2118_p13 = pnand %p4029_p2, %p4028_p5 }
 0x38d   : > { %2530 = dma.done.wait (!%p2118_p13), %s1696_s17, 1024  }
 0x38e   : > { %2532 = vsyncadd (!%p2118_p13), %s1696_s17, 4294966272  ;;  %s35_s14 = sadd.s32 1, %s4027_s11   ;;  %s4030_s25 = sld [smem:[#allocation25_spill]] }
 0x38f   : > { %p32_p7 = scmp.ge.s32.totalorder %s35_s14, 4   ;;  %s4031_s11 = sld [smem:[#allocation32_spill]] }
 0x390   : > { %s4032_s12 = sld [smem:[#allocation27_spill]]  ;;  %s4033_s13 = sld [smem:[#allocation30_spill]] }
 0x391   : > { %s4034_s30 = smov %s2539_s10  ;;  %34 = sbr.rel (!%p32_p7) target bundleno = 17 (0x11), region = 181 }
 0x394   : > { %s4035_s10 = smov %s4030_s25 }
 0x398   :  { %1701 = vsyncpa [#allocation3], 1 }
 0x399   :  { %1703 = vsyncpa [#allocation3 + $0x1], 1 }
 0x39a   :  { %1704 = vsyncpa [#allocation6], 1 }
 0x39b   :  { %1706 = vsyncpa [#allocation6 + $0x1], 1 }
 0x39c   :  { %1707 = vsyncpa [#allocation9], 1 }
 0x39d   :  { %1709 = vsyncpa [#allocation9 + $0x1], 1 }
 0x39e   :  { %1710 = vsyncpa [#allocation12], 1 }
 0x39f   :  { %1712 = vsyncpa [#allocation12 + $0x1], 1 }
 0x3a0   :  { %1713 = vsyncpa [#allocation15], 1 }
 0x3a1   :  { %1714 = vsyncpa [#allocation4], 1 }
 0x3a2   :  { %1716 = vsyncpa [#allocation4 + $0x1], 1 }

</bundles_post_ra>
